<compile_context>
chip_gen: v7x
topology: tpu7x:2x2x1
jax: 0.10.0
libtpu: 0.0.40
codegen_flags: <defaults>
</compile_context>

<pallas_src>
import functools
import math

import jax
import jax.numpy as jnp
from jax.experimental import pallas as pl
from jax.experimental.pallas import tpu as pltpu


# ------------------------------ kernel helpers --------------------------------

def _zero_border_3d(pad_ref):
    """Zero only the 1-element spatial border of a (Hp, Wp, C) padded scratch."""
    Hp, Wp, C = pad_ref.shape
    z_row = jnp.zeros((1, Wp, C), pad_ref.dtype)
    z_col = jnp.zeros((Hp, 1, C), pad_ref.dtype)
    pad_ref[0:1, :, :] = z_row
    pad_ref[Hp - 1:Hp, :, :] = z_row
    pad_ref[:, 0:1, :] = z_col
    pad_ref[:, Wp - 1:Wp, :] = z_col


def _im2col_3x3(pad_ref, Hs, Ws):
    """9-tap im2col from a padded (Hs+2, Ws+2, C) scratch -> (Hs*Ws, 9*C)."""
    C = pad_ref.shape[-1]
    slabs = [pad_ref[dy:dy + Hs, dx:dx + Ws, :]
             for dy in range(3) for dx in range(3)]
    return jnp.concatenate(slabs, axis=-1).reshape(Hs * Ws, 9 * C)


# --------------------------------- kernel --------------------------------------

def _basic_block_kernel(x_ref, w1_ref, b1_ref, w2_ref, b2_ref, o_ref,
                        xpad1, xpad2, *, stride, proj):
    """Fused BasicBlock forward for one batch item (eval-mode BN folded).

    stride==1: x_ref is (1, H, W, Cin)           (NHWC)
    stride==2: x_ref is (1, Ho, Wo, 4*Cin)       (space-to-depth, lane blocks
                                                  ordered (row phase, col phase))
    w1_ref: (K1, N1) bf16  -- conv1 (+BN1) im2col weights, with the projection
                              shortcut fused as output columns [Cout:2*Cout]
    w2_ref: (9*Cout, Cout) bf16 -- conv2 (+BN2) im2col weights
    o_ref : (1, Ho, Wo, Cout) f32
    """
    _, Ho, Wo, Cout = o_ref.shape

    # ---------------- conv1 (+BN1 folded, + fused projection shortcut) --------
    if stride == 1:
        _, H, W, Cin = x_ref.shape
        _zero_border_3d(xpad1)                                  # border only
        xpad1[1:H + 1, 1:W + 1, :] = x_ref[0].astype(xpad1.dtype)
        cols1 = _im2col_3x3(xpad1, Ho, Wo)                      # (Ho*Wo, 9*Cin)
    else:
        # stride == 2.  Padded input kept column-pair-folded:
        #   xpad1[q, i', j', p*Cin + ci] = padded_x[2*i'+q, 2*j'+p, ci]
        # so every tap slab is a contiguous slice (no strided loads, no dense
        # selection matmul).  Weight rows for the unused dx==3 column are zero.
        C = x_ref.shape[-1] // 4
        zr = jnp.zeros((1, 1, Wo + 1, 2 * C), xpad1.dtype)
        zc = jnp.zeros((2, Ho + 1, 1, 2 * C), xpad1.dtype)
        xpad1[0:1, 0:1, :, :] = zr                  # padded row 0
        xpad1[1:2, Ho:Ho + 1, :, :] = zr            # padded row H+1
        xpad1[:, :, 0:1, :] = zc                    # padded col 0
        xpad1[:, :, Wo:Wo + 1, :] = zc              # padded col W+1
        blk = lambda k: x_ref[0, :, :, k * C:(k + 1) * C].astype(xpad1.dtype)
        xpad1[1, 0:Ho, 0:Wo, C:2 * C] = blk(0)          # even rows, even cols
        xpad1[1, 0:Ho, 1:Wo + 1, 0:C] = blk(1)          # even rows, odd  cols
        xpad1[0, 1:Ho + 1, 0:Wo, C:2 * C] = blk(2)      # odd  rows, even cols
        xpad1[0, 1:Ho + 1, 1:Wo + 1, 0:C] = blk(3)      # odd  rows, odd  cols
        slabs = [xpad1[q, di:di + Ho, dj:dj + Wo, :]
                 for (di, q) in ((0, 0), (0, 1), (1, 0))        # dy = 0, 1, 2
                 for dj in range(2)]                            # dj' = 0, 1
        cols1 = jnp.concatenate(slabs, axis=-1).reshape(Ho * Wo, 12 * C)

    h1s = jnp.dot(cols1, w1_ref[...],
                  preferred_element_type=jnp.float32) + b1_ref[...]
    h1 = jnp.maximum(h1s[:, :Cout], 0.0)                        # conv1+BN1+ReLU
    if proj:
        short = h1s[:, Cout:]                                   # fused 1x1 shortcut
    else:
        short = x_ref[0].astype(jnp.float32).reshape(Ho * Wo, Cout)

    # ---------------- conv2 (+BN2 folded) --------------------------------------
    _zero_border_3d(xpad2)
    xpad2[1:Ho + 1, 1:Wo + 1, :] = h1.reshape(Ho, Wo, Cout).astype(xpad2.dtype)
    cols2 = _im2col_3x3(xpad2, Ho, Wo)                          # (Ho*Wo, 9*Cout)
    h2 = jnp.dot(cols2, w2_ref[...],
                 preferred_element_type=jnp.float32) + b2_ref[...]

    o_ref[0] = jnp.maximum(h2 + short, 0.0).reshape(Ho, Wo, Cout)


# --------------------------------- wrapper --------------------------------------

def basic_block_forward(x_nchw, params, *, stride):
    """PyTorch-layout (NCHW) eval-mode BasicBlock forward, one fused pallas_call."""
    B, Cin, H, W = x_nchw.shape
    Cout = params["w2"].shape[1]
    proj = params["w1"].shape[1] == 2 * Cout
    assert stride in (1, 2), "only stride 1 or 2 (ResNet BasicBlock) supported"
    assert proj or (stride == 1 and Cin == Cout), \
        "identity shortcut requires stride == 1 and Cin == Cout"

    Ho = (H - 1) // stride + 1
    Wo = (W - 1) // stride + 1

    x = jnp.transpose(x_nchw, (0, 2, 3, 1)).astype(jnp.float32)         # NHWC
    if stride == 2:
        assert H % 2 == 0 and W % 2 == 0
        assert params["w1"].shape[0] == 12 * Cin
        # space-to-depth: lane blocks of size Cin ordered (row phase, col phase)
        x_in = x.reshape(B, Ho, 2, Wo, 2, Cin).transpose(0, 1, 3, 2, 4, 5)
        x_in = x_in.reshape(B, Ho, Wo, 4 * Cin)
        xpad1_alloc = pltpu.VMEM((2, Ho + 1, Wo + 1, 2 * Cin), jnp.bfloat16)
    else:
        assert params["w1"].shape[0] == 9 * Cin
        x_in = x
        xpad1_alloc = pltpu.VMEM((H + 2, W + 2, Cin), jnp.bfloat16)

    kern = functools.partial(_basic_block_kernel, stride=stride, proj=proj)
    xin_block = (1,) + x_in.shape[1:]

    out_nhwc = pl.pallas_call(
        kern,
        out_shape=jax.ShapeDtypeStruct((B, Ho, Wo, Cout), jnp.float32),
        grid_spec=pltpu.PrefetchScalarGridSpec(
            num_scalar_prefetch=0,
            grid=(B,),
            in_specs=[
                pl.BlockSpec(xin_block, lambda b: (b, 0, 0, 0)),
                pl.BlockSpec(params["w1"].shape, lambda b: (0, 0)),
                pl.BlockSpec(params["b1"].shape, lambda b: (0, 0)),
                pl.BlockSpec(params["w2"].shape, lambda b: (0, 0)),
                pl.BlockSpec(params["b2"].shape, lambda b: (0, 0)),
            ],
            out_specs=pl.BlockSpec((1, Ho, Wo, Cout), lambda b: (b, 0, 0, 0)),
            scratch_shapes=[xpad1_alloc,
                            pltpu.VMEM((Ho + 2, Wo + 2, Cout), jnp.bfloat16)],
        ),
        compiler_params=pltpu.CompilerParams(
            dimension_semantics=("parallel",),        # one image per TC step
            vmem_limit_bytes=32 * 1024 * 1024),
    )(x_in, params["w1"], params["b1"], params["w2"], params["b2"])

    return jnp.transpose(out_nhwc, (0, 3, 1, 2))                 # back to NCHW


# ----------------------- params: init + eval-mode BN folding --------------------

def _bn_stats(key, c):
    k1, k2, k3, k4 = jax.random.split(key, 4)
    return (1.0 + 0.1 * jax.random.normal(k1, (c,), jnp.float32),   # gamma
            0.1 * jax.random.normal(k2, (c,), jnp.float32),          # beta
            0.1 * jax.random.normal(k3, (c,), jnp.float32),          # running mean
            jax.random.uniform(k4, (c,), jnp.float32, 0.5, 1.5))     # running var


def init_block_params(key, cin, cout, stride):
    """Raw PyTorch-style params: conv weights (HWIO) + BN (gamma,beta,mean,var)."""
    proj = (stride != 1) or (cin != cout)
    ks = jax.random.split(key, 6)
    p = {
        "conv1_w": jax.random.normal(ks[0], (3, 3, cin, cout), jnp.float32)
                   / math.sqrt(9.0 * cin),
        "conv2_w": jax.random.normal(ks[1], (3, 3, cout, cout), jnp.float32)
                   / math.sqrt(9.0 * cout),
    }
    p["bn1_g"], p["bn1_b"], p["bn1_m"], p["bn1_v"] = _bn_stats(ks[2], cout)
    p["bn2_g"], p["bn2_b"], p["bn2_m"], p["bn2_v"] = _bn_stats(ks[3], cout)
    if proj:
        p["sc_w"] = jax.random.normal(ks[4], (cin, cout), jnp.float32) \
                    / math.sqrt(float(cin))
        p["bns_g"], p["bns_b"], p["bns_m"], p["bns_v"] = _bn_stats(ks[5], cout)
    return p


def _fold_bn(w, g, b, m, v, eps=1e-5):
    scale = g / jnp.sqrt(v + eps)          # per-Cout
    return w * scale, b - m * scale        # w's last axis is Cout -> broadcasts


def prepare_params(raw, stride):
    """Fold eval-mode BN into the convs, fuse the projection shortcut into the
    conv1 matmul (extra N columns), and lay weights out as bf16 im2col matrices."""
    cin, cout = raw["conv1_w"].shape[2], raw["conv1_w"].shape[3]
    w1f, b1 = _fold_bn(raw["conv1_w"], raw["bn1_g"], raw["bn1_b"],
                       raw["bn1_m"], raw["bn1_v"])
    w2f, b2 = _fold_bn(raw["conv2_w"], raw["bn2_g"], raw["bn2_b"],
                       raw["bn2_m"], raw["bn2_v"])
    if stride == 2:
        # Row layout (dy, dj', p, ci) with dx = 2*dj' + p; dx==3 rows are zero.
        w1p = jnp.pad(w1f, ((0, 0), (0, 1), (0, 0), (0, 0)))    # (3,4,cin,cout)
        w1m = w1p.reshape(12 * cin, cout)
        center = 5 * cin                   # (dy=1, dj'=0, p=1)  <=> tap (1, 1)
    else:
        w1m = w1f.reshape(9 * cin, cout)   # rows ordered (dy, dx, ci)
        center = 4 * cin                   # tap (dy=1, dx=1)
    if "sc_w" in raw:
        wsf, bs = _fold_bn(raw["sc_w"], raw["bns_g"], raw["bns_b"],
                           raw["bns_m"], raw["bns_v"])
        # 1x1/stride-s shortcut reads exactly the centre tap of conv1's im2col,
        # so it rides along as extra output columns (fills the 256-wide MXU).
        w1s = jnp.zeros_like(w1m).at[center:center + cin, :].set(wsf)
        w1m = jnp.concatenate([w1m, w1s], axis=1)
        b1 = jnp.concatenate([b1, bs])
    return {"w1": w1m.astype(jnp.bfloat16),
            "b1": b1[None, :].astype(jnp.float32),
            "w2": w2f.reshape(9 * cout, cout).astype(jnp.bfloat16),
            "b2": b2[None, :].astype(jnp.float32)}


# ----------------------------- pure-JAX reference --------------------------------

def _bn_ref(x, g, b, m, v, eps=1e-5):
    s = (g / jnp.sqrt(v + eps))[None, :, None, None]
    t = (b - m * g / jnp.sqrt(v + eps))[None, :, None, None]
    return x * s + t


def basic_block_reference(x, raw, stride):
    cin, cout = raw["conv1_w"].shape[2], raw["conv1_w"].shape[3]
    conv = lambda v, w, s, p: jax.lax.conv_general_dilated(
        v, w, window_strides=(s, s), padding=p,
        dimension_numbers=("NCHW", "HWIO", "NCHW"))
    h = jax.nn.relu(_bn_ref(conv(x, raw["conv1_w"], stride, ((1, 1), (1, 1))),
                            raw["bn1_g"], raw["bn1_b"], raw["bn1_m"], raw["bn1_v"]))
    h = _bn_ref(conv(h, raw["conv2_w"], 1, ((1, 1), (1, 1))),
                raw["bn2_g"], raw["bn2_b"], raw["bn2_m"], raw["bn2_v"])
    if stride != 1 or cin != cout:
        sc = _bn_ref(conv(x, raw["sc_w"][None, None], stride, ((0, 0), (0, 0))),
                     raw["bns_g"], raw["bns_b"], raw["bns_m"], raw["bns_v"])
    else:
        sc = x
    return jax.nn.relu(h + sc)


def _check(out, ref):
    # bf16 matmul operands with f32 accumulation -> ~1e-3 rel-max error expected.
    err = float(jnp.max(jnp.abs(out - ref)) / (jnp.max(jnp.abs(ref)) + 1e-6))
    assert err < 2e-2, f"mismatch vs reference: rel-max err {err}"


# ----------------------------------- main ----------------------------------------

if __name__ == "__main__":
    key = jax.random.PRNGKey(0)
    k1, k2, k3, k4, k5, k6 = jax.random.split(key, 6)

    # Config A: projection shortcut, stride 2 (64 -> 128 channels, 16x16).
    raw_a = init_block_params(k1, 64, 128, 2)
    x_a = jax.random.normal(k2, (2, 64, 16, 16), jnp.float32)     # NCHW, like PyTorch
    out_a = jax.block_until_ready(
        basic_block_forward(x_a, prepare_params(raw_a, 2), stride=2))
    assert out_a.shape == (2, 128, 8, 8), out_a.shape
    assert bool(jnp.all(jnp.isfinite(out_a))) and bool(jnp.all(out_a >= 0.0))
    _check(out_a, basic_block_reference(x_a, raw_a, 2))

    # Config B: identity shortcut, stride 1 (128 channels, 16x16).
    raw_b = init_block_params(k3, 128, 128, 1)
    x_b = jax.random.normal(k4, (2, 128, 16, 16), jnp.float32)
    out_b = jax.block_until_ready(
        basic_block_forward(x_b, prepare_params(raw_b, 1), stride=1))
    assert out_b.shape == (2, 128, 16, 16), out_b.shape
    _check(out_b, basic_block_reference(x_b, raw_b, 1))

    # Config C: projection shortcut with stride 1 (128 -> 256 channels, 8x8).
    raw_c = init_block_params(k5, 128, 256, 1)
    x_c = jax.random.normal(k6, (2, 128, 8, 8), jnp.float32)
    out_c = jax.block_until_ready(
        basic_block_forward(x_c, prepare_params(raw_c, 1), stride=1))
    assert out_c.shape == (2, 256, 8, 8), out_c.shape
    _check(out_c, basic_block_reference(x_c, raw_c, 1))

    print("KERNEL_OK")
</pallas_src>

<mosaic_0001>
module attributes {stable_mosaic.version = 11 : i64} {
  func.func @_basic_block_kernel(%arg0: i32, %arg1: memref<1x8x8x256xf32, #tpu.memory_space<vmem>>, %arg2: memref<768x256xbf16, #tpu.memory_space<vmem>>, %arg3: memref<1x256xf32, #tpu.memory_space<vmem>>, %arg4: memref<1152x128xbf16, #tpu.memory_space<vmem>>, %arg5: memref<1x128xf32, #tpu.memory_space<vmem>>, %arg6: memref<1x8x8x128xf32, #tpu.memory_space<vmem>>, %arg7: memref<2x9x9x128xbf16, #tpu.memory_space<vmem>>, %arg8: memref<10x10x128xbf16, #tpu.memory_space<vmem>>) attributes {dimension_semantics = [#tpu.dimension_semantics<parallel>], iteration_bounds = array<i64: 2>, scalar_prefetch = 0 : i64, scratch_operands = 2 : i64, tpu.core_type = #tpu.core_type<tc>, window_params = [{transform_indices = @transform_0, window_bounds = array<i64: 1, 8, 8, 256>}, {pipeline_mode = #tpu.pipeline_mode<synchronous>, transform_indices = @transform_1, window_bounds = array<i64: 768, 256>}, {pipeline_mode = #tpu.pipeline_mode<synchronous>, transform_indices = @transform_2, window_bounds = array<i64: 1, 256>}, {pipeline_mode = #tpu.pipeline_mode<synchronous>, transform_indices = @transform_3, window_bounds = array<i64: 1152, 128>}, {pipeline_mode = #tpu.pipeline_mode<synchronous>, transform_indices = @transform_4, window_bounds = array<i64: 1, 128>}, {transform_indices = @transform_5, window_bounds = array<i64: 1, 8, 8, 128>}]} {
    %cst = arith.constant 0.000000e+00 : bf16
    %0 = vector.broadcast %cst : bf16 to vector<1x1x9x128xbf16>
    %cst_0 = arith.constant 0.000000e+00 : bf16
    %1 = vector.broadcast %cst_0 : bf16 to vector<2x9x1x128xbf16>
    %c0 = arith.constant 0 : index
    %c0_1 = arith.constant 0 : index
    %c0_2 = arith.constant 0 : index
    %c0_3 = arith.constant 0 : index
    %2 = vector.load %arg7[%c0, %c0_1, %c0_2, %c0_3] : memref<2x9x9x128xbf16, #tpu.memory_space<vmem>>, vector<1x1x9x128xbf16>
    tpu.vector_store %arg7[%c0, %c0_1, %c0_2, %c0_3], %0 {strides = array<i32>} : memref<2x9x9x128xbf16, #tpu.memory_space<vmem>>, vector<1x1x9x128xbf16>,
    %c1 = arith.constant 1 : index
    %c8 = arith.constant 8 : index
    %c0_4 = arith.constant 0 : index
    %c0_5 = arith.constant 0 : index
    %3 = vector.load %arg7[%c1, %c8, %c0_4, %c0_5] : memref<2x9x9x128xbf16, #tpu.memory_space<vmem>>, vector<1x1x9x128xbf16>
    tpu.vector_store %arg7[%c1, %c8, %c0_4, %c0_5], %0 {strides = array<i32>} : memref<2x9x9x128xbf16, #tpu.memory_space<vmem>>, vector<1x1x9x128xbf16>,
    %c0_6 = arith.constant 0 : index
    %c0_7 = arith.constant 0 : index
    %c0_8 = arith.constant 0 : index
    %c0_9 = arith.constant 0 : index
    %4 = vector.load %arg7[%c0_6, %c0_7, %c0_8, %c0_9] : memref<2x9x9x128xbf16, #tpu.memory_space<vmem>>, vector<2x9x1x128xbf16>
    tpu.vector_store %arg7[%c0_6, %c0_7, %c0_8, %c0_9], %1 {strides = array<i32>} : memref<2x9x9x128xbf16, #tpu.memory_space<vmem>>, vector<2x9x1x128xbf16>,
    %c0_10 = arith.constant 0 : index
    %c0_11 = arith.constant 0 : index
    %c8_12 = arith.constant 8 : index
    %c0_13 = arith.constant 0 : index
    %5 = vector.load %arg7[%c0_10, %c0_11, %c8_12, %c0_13] : memref<2x9x9x128xbf16, #tpu.memory_space<vmem>>, vector<2x9x1x128xbf16>
    tpu.vector_store %arg7[%c0_10, %c0_11, %c8_12, %c0_13], %1 {strides = array<i32>} : memref<2x9x9x128xbf16, #tpu.memory_space<vmem>>, vector<2x9x1x128xbf16>,
    %c0_14 = arith.constant 0 : index
    %c0_15 = arith.constant 0 : index
    %c0_16 = arith.constant 0 : index
    %c0_17 = arith.constant 0 : index
    %6 = vector.load %arg1[%c0_14, %c0_15, %c0_16, %c0_17] : memref<1x8x8x256xf32, #tpu.memory_space<vmem>>, vector<1x8x8x64xf32>
    %7 = vector.shape_cast %6 : vector<1x8x8x64xf32> to vector<8x8x64xf32>
    %8 = arith.truncf %7 : vector<8x8x64xf32> to vector<8x8x64xbf16>
    %c1_18 = arith.constant 1 : index
    %c0_19 = arith.constant 0 : index
    %c0_20 = arith.constant 0 : index
    %c64 = arith.constant 64 : index
    %9 = vector.load %arg7[%c1_18, %c0_19, %c0_20, %c64] : memref<2x9x9x128xbf16, #tpu.memory_space<vmem>>, vector<1x8x8x64xbf16>
    %10 = vector.shape_cast %9 : vector<1x8x8x64xbf16> to vector<8x8x64xbf16>
    %11 = vector.shape_cast %8 : vector<8x8x64xbf16> to vector<1x8x8x64xbf16>
    tpu.vector_store %arg7[%c1_18, %c0_19, %c0_20, %c64], %11 {strides = array<i32>} : memref<2x9x9x128xbf16, #tpu.memory_space<vmem>>, vector<1x8x8x64xbf16>,
    %c0_21 = arith.constant 0 : index
    %c0_22 = arith.constant 0 : index
    %c0_23 = arith.constant 0 : index
    %c64_24 = arith.constant 64 : index
    %12 = vector.load %arg1[%c0_21, %c0_22, %c0_23, %c64_24] : memref<1x8x8x256xf32, #tpu.memory_space<vmem>>, vector<1x8x8x64xf32>
    %13 = vector.shape_cast %12 : vector<1x8x8x64xf32> to vector<8x8x64xf32>
    %14 = arith.truncf %13 : vector<8x8x64xf32> to vector<8x8x64xbf16>
    %c1_25 = arith.constant 1 : index
    %c0_26 = arith.constant 0 : index
    %c1_27 = arith.constant 1 : index
    %c0_28 = arith.constant 0 : index
    %15 = vector.load %arg7[%c1_25, %c0_26, %c1_27, %c0_28] : memref<2x9x9x128xbf16, #tpu.memory_space<vmem>>, vector<1x8x8x64xbf16>
    %16 = vector.shape_cast %15 : vector<1x8x8x64xbf16> to vector<8x8x64xbf16>
    %17 = vector.shape_cast %14 : vector<8x8x64xbf16> to vector<1x8x8x64xbf16>
    tpu.vector_store %arg7[%c1_25, %c0_26, %c1_27, %c0_28], %17 {strides = array<i32>} : memref<2x9x9x128xbf16, #tpu.memory_space<vmem>>, vector<1x8x8x64xbf16>,
    %c0_29 = arith.constant 0 : index
    %c0_30 = arith.constant 0 : index
    %c0_31 = arith.constant 0 : index
    %c128 = arith.constant 128 : index
    %18 = vector.load %arg1[%c0_29, %c0_30, %c0_31, %c128] : memref<1x8x8x256xf32, #tpu.memory_space<vmem>>, vector<1x8x8x64xf32>
    %19 = vector.shape_cast %18 : vector<1x8x8x64xf32> to vector<8x8x64xf32>
    %20 = arith.truncf %19 : vector<8x8x64xf32> to vector<8x8x64xbf16>
    %c0_32 = arith.constant 0 : index
    %c1_33 = arith.constant 1 : index
    %c0_34 = arith.constant 0 : index
    %c64_35 = arith.constant 64 : index
    %21 = vector.load %arg7[%c0_32, %c1_33, %c0_34, %c64_35] : memref<2x9x9x128xbf16, #tpu.memory_space<vmem>>, vector<1x8x8x64xbf16>
    %22 = vector.shape_cast %21 : vector<1x8x8x64xbf16> to vector<8x8x64xbf16>
    %23 = vector.shape_cast %20 : vector<8x8x64xbf16> to vector<1x8x8x64xbf16>
    tpu.vector_store %arg7[%c0_32, %c1_33, %c0_34, %c64_35], %23 {strides = array<i32>} : memref<2x9x9x128xbf16, #tpu.memory_space<vmem>>, vector<1x8x8x64xbf16>,
    %c0_36 = arith.constant 0 : index
    %c0_37 = arith.constant 0 : index
    %c0_38 = arith.constant 0 : index
    %c192 = arith.constant 192 : index
    %24 = vector.load %arg1[%c0_36, %c0_37, %c0_38, %c192] : memref<1x8x8x256xf32, #tpu.memory_space<vmem>>, vector<1x8x8x64xf32>
    %25 = vector.shape_cast %24 : vector<1x8x8x64xf32> to vector<8x8x64xf32>
    %26 = arith.truncf %25 : vector<8x8x64xf32> to vector<8x8x64xbf16>
    %c0_39 = arith.constant 0 : index
    %c1_40 = arith.constant 1 : index
    %c1_41 = arith.constant 1 : index
    %c0_42 = arith.constant 0 : index
    %27 = vector.load %arg7[%c0_39, %c1_40, %c1_41, %c0_42] : memref<2x9x9x128xbf16, #tpu.memory_space<vmem>>, vector<1x8x8x64xbf16>
    %28 = vector.shape_cast %27 : vector<1x8x8x64xbf16> to vector<8x8x64xbf16>
    %29 = vector.shape_cast %26 : vector<8x8x64xbf16> to vector<1x8x8x64xbf16>
    tpu.vector_store %arg7[%c0_39, %c1_40, %c1_41, %c0_42], %29 {strides = array<i32>} : memref<2x9x9x128xbf16, #tpu.memory_space<vmem>>, vector<1x8x8x64xbf16>,
    %c0_43 = arith.constant 0 : index
    %c0_44 = arith.constant 0 : index
    %c0_45 = arith.constant 0 : index
    %c0_46 = arith.constant 0 : index
    %30 = vector.load %arg7[%c0_43, %c0_44, %c0_45, %c0_46] : memref<2x9x9x128xbf16, #tpu.memory_space<vmem>>, vector<1x8x8x128xbf16>
    %31 = vector.shape_cast %30 : vector<1x8x8x128xbf16> to vector<8x8x128xbf16>
    %c0_47 = arith.constant 0 : index
    %c0_48 = arith.constant 0 : index
    %c1_49 = arith.constant 1 : index
    %c0_50 = arith.constant 0 : index
    %32 = vector.load %arg7[%c0_47, %c0_48, %c1_49, %c0_50] : memref<2x9x9x128xbf16, #tpu.memory_space<vmem>>, vector<1x8x8x128xbf16>
    %33 = vector.shape_cast %32 : vector<1x8x8x128xbf16> to vector<8x8x128xbf16>
    %c1_51 = arith.constant 1 : index
    %c0_52 = arith.constant 0 : index
    %c0_53 = arith.constant 0 : index
    %c0_54 = arith.constant 0 : index
    %34 = vector.load %arg7[%c1_51, %c0_52, %c0_53, %c0_54] : memref<2x9x9x128xbf16, #tpu.memory_space<vmem>>, vector<1x8x8x128xbf16>
    %35 = vector.shape_cast %34 : vector<1x8x8x128xbf16> to vector<8x8x128xbf16>
    %c1_55 = arith.constant 1 : index
    %c0_56 = arith.constant 0 : index
    %c1_57 = arith.constant 1 : index
    %c0_58 = arith.constant 0 : index
    %36 = vector.load %arg7[%c1_55, %c0_56, %c1_57, %c0_58] : memref<2x9x9x128xbf16, #tpu.memory_space<vmem>>, vector<1x8x8x128xbf16>
    %37 = vector.shape_cast %36 : vector<1x8x8x128xbf16> to vector<8x8x128xbf16>
    %c0_59 = arith.constant 0 : index
    %c1_60 = arith.constant 1 : index
    %c0_61 = arith.constant 0 : index
    %c0_62 = arith.constant 0 : index
    %38 = vector.load %arg7[%c0_59, %c1_60, %c0_61, %c0_62] : memref<2x9x9x128xbf16, #tpu.memory_space<vmem>>, vector<1x8x8x128xbf16>
    %39 = vector.shape_cast %38 : vector<1x8x8x128xbf16> to vector<8x8x128xbf16>
    %c0_63 = arith.constant 0 : index
    %c1_64 = arith.constant 1 : index
    %c1_65 = arith.constant 1 : index
    %c0_66 = arith.constant 0 : index
    %40 = vector.load %arg7[%c0_63, %c1_64, %c1_65, %c0_66] : memref<2x9x9x128xbf16, #tpu.memory_space<vmem>>, vector<1x8x8x128xbf16>
    %41 = vector.shape_cast %40 : vector<1x8x8x128xbf16> to vector<8x8x128xbf16>
    %42 = tpu.concatenate %31, %33, %35, %37, %39, %41 in 2 : vector<8x8x128xbf16>, vector<8x8x128xbf16>, vector<8x8x128xbf16>, vector<8x8x128xbf16>, vector<8x8x128xbf16>, vector<8x8x128xbf16> -> vector<8x8x768xbf16>
    %43 = vector.shape_cast %42 : vector<8x8x768xbf16> to vector<64x768xbf16>
    %c0_67 = arith.constant 0 : index
    %c0_68 = arith.constant 0 : index
    %44 = vector.load %arg2[%c0_67, %c0_68] : memref<768x256xbf16, #tpu.memory_space<vmem>>, vector<768x256xbf16>
    %cst_69 = arith.constant dense<0.000000e+00> : vector<64x256xf32>
    %45 = tpu.matmul %43, %44, %cst_69 {dimension_numbers = #tpu.dot_dimension_numbers<[1], [0], [0], [1], [0, 0, 1, 1], [], []>} : vector<64x768xbf16>, vector<768x256xbf16>, vector<64x256xf32> -> vector<64x256xf32>
    %c0_70 = arith.constant 0 : index
    %c0_71 = arith.constant 0 : index
    %46 = vector.load %arg3[%c0_70, %c0_71] : memref<1x256xf32, #tpu.memory_space<vmem>>, vector<1x256xf32>
    %47 = vector.broadcast %46 : vector<1x256xf32> to vector<64x256xf32>
    %48 = arith.addf %45, %47 : vector<64x256xf32>
    %49 = vector.extract_strided_slice %48 {offsets = [0, 0], sizes = [64, 128], strides = [1, 1]} : vector<64x256xf32> to vector<64x128xf32>
    %cst_72 = arith.constant 0.000000e+00 : f32
    %50 = vector.broadcast %cst_72 : f32 to vector<64x128xf32>
    %51 = arith.maximumf %49, %50 : vector<64x128xf32>
    %52 = vector.extract_strided_slice %48 {offsets = [0, 128], sizes = [64, 128], strides = [1, 1]} : vector<64x256xf32> to vector<64x128xf32>
    %cst_73 = arith.constant 0.000000e+00 : bf16
    %53 = vector.broadcast %cst_73 : bf16 to vector<1x10x128xbf16>
    %cst_74 = arith.constant 0.000000e+00 : bf16
    %54 = vector.broadcast %cst_74 : bf16 to vector<10x1x128xbf16>
    %c0_75 = arith.constant 0 : index
    %c0_76 = arith.constant 0 : index
    %c0_77 = arith.constant 0 : index
    %55 = vector.load %arg8[%c0_75, %c0_76, %c0_77] : memref<10x10x128xbf16, #tpu.memory_space<vmem>>, vector<1x10x128xbf16>
    tpu.vector_store %arg8[%c0_75, %c0_76, %c0_77], %53 {strides = array<i32>} : memref<10x10x128xbf16, #tpu.memory_space<vmem>>, vector<1x10x128xbf16>,
    %c9 = arith.constant 9 : index
    %c0_78 = arith.constant 0 : index
    %c0_79 = arith.constant 0 : index
    %56 = vector.load %arg8[%c9, %c0_78, %c0_79] : memref<10x10x128xbf16, #tpu.memory_space<vmem>>, vector<1x10x128xbf16>
    tpu.vector_store %arg8[%c9, %c0_78, %c0_79], %53 {strides = array<i32>} : memref<10x10x128xbf16, #tpu.memory_space<vmem>>, vector<1x10x128xbf16>,
    %c0_80 = arith.constant 0 : index
    %c0_81 = arith.constant 0 : index
    %c0_82 = arith.constant 0 : index
    %57 = vector.load %arg8[%c0_80, %c0_81, %c0_82] : memref<10x10x128xbf16, #tpu.memory_space<vmem>>, vector<10x1x128xbf16>
    tpu.vector_store %arg8[%c0_80, %c0_81, %c0_82], %54 {strides = array<i32>} : memref<10x10x128xbf16, #tpu.memory_space<vmem>>, vector<10x1x128xbf16>,
    %c0_83 = arith.constant 0 : index
    %c9_84 = arith.constant 9 : index
    %c0_85 = arith.constant 0 : index
    %58 = vector.load %arg8[%c0_83, %c9_84, %c0_85] : memref<10x10x128xbf16, #tpu.memory_space<vmem>>, vector<10x1x128xbf16>
    tpu.vector_store %arg8[%c0_83, %c9_84, %c0_85], %54 {strides = array<i32>} : memref<10x10x128xbf16, #tpu.memory_space<vmem>>, vector<10x1x128xbf16>,
    %59 = vector.shape_cast %51 : vector<64x128xf32> to vector<8x8x128xf32>
    %60 = arith.truncf %59 : vector<8x8x128xf32> to vector<8x8x128xbf16>
    %c1_86 = arith.constant 1 : index
    %c1_87 = arith.constant 1 : index
    %c0_88 = arith.constant 0 : index
    %61 = vector.load %arg8[%c1_86, %c1_87, %c0_88] : memref<10x10x128xbf16, #tpu.memory_space<vmem>>, vector<8x8x128xbf16>
    tpu.vector_store %arg8[%c1_86, %c1_87, %c0_88], %60 {strides = array<i32>} : memref<10x10x128xbf16, #tpu.memory_space<vmem>>, vector<8x8x128xbf16>,
    %c0_89 = arith.constant 0 : index
    %c0_90 = arith.constant 0 : index
    %c0_91 = arith.constant 0 : index
    %62 = vector.load %arg8[%c0_89, %c0_90, %c0_91] : memref<10x10x128xbf16, #tpu.memory_space<vmem>>, vector<8x8x128xbf16>
    %c0_92 = arith.constant 0 : index
    %c1_93 = arith.constant 1 : index
    %c0_94 = arith.constant 0 : index
    %63 = vector.load %arg8[%c0_92, %c1_93, %c0_94] : memref<10x10x128xbf16, #tpu.memory_space<vmem>>, vector<8x8x128xbf16>
    %c0_95 = arith.constant 0 : index
    %c2 = arith.constant 2 : index
    %c0_96 = arith.constant 0 : index
    %64 = vector.load %arg8[%c0_95, %c2, %c0_96] : memref<10x10x128xbf16, #tpu.memory_space<vmem>>, vector<8x8x128xbf16>
    %c1_97 = arith.constant 1 : index
    %c0_98 = arith.constant 0 : index
    %c0_99 = arith.constant 0 : index
    %65 = vector.load %arg8[%c1_97, %c0_98, %c0_99] : memref<10x10x128xbf16, #tpu.memory_space<vmem>>, vector<8x8x128xbf16>
    %c1_100 = arith.constant 1 : index
    %c1_101 = arith.constant 1 : index
    %c0_102 = arith.constant 0 : index
    %66 = vector.load %arg8[%c1_100, %c1_101, %c0_102] : memref<10x10x128xbf16, #tpu.memory_space<vmem>>, vector<8x8x128xbf16>
    %c1_103 = arith.constant 1 : index
    %c2_104 = arith.constant 2 : index
    %c0_105 = arith.constant 0 : index
    %67 = vector.load %arg8[%c1_103, %c2_104, %c0_105] : memref<10x10x128xbf16, #tpu.memory_space<vmem>>, vector<8x8x128xbf16>
    %c2_106 = arith.constant 2 : index
    %c0_107 = arith.constant 0 : index
    %c0_108 = arith.constant 0 : index
    %68 = vector.load %arg8[%c2_106, %c0_107, %c0_108] : memref<10x10x128xbf16, #tpu.memory_space<vmem>>, vector<8x8x128xbf16>
    %c2_109 = arith.constant 2 : index
    %c1_110 = arith.constant 1 : index
    %c0_111 = arith.constant 0 : index
    %69 = vector.load %arg8[%c2_109, %c1_110, %c0_111] : memref<10x10x128xbf16, #tpu.memory_space<vmem>>, vector<8x8x128xbf16>
    %c2_112 = arith.constant 2 : index
    %c2_113 = arith.constant 2 : index
    %c0_114 = arith.constant 0 : index
    %70 = vector.load %arg8[%c2_112, %c2_113, %c0_114] : memref<10x10x128xbf16, #tpu.memory_space<vmem>>, vector<8x8x128xbf16>
    %71 = tpu.concatenate %62, %63, %64, %65, %66, %67, %68, %69, %70 in 2 : vector<8x8x128xbf16>, vector<8x8x128xbf16>, vector<8x8x128xbf16>, vector<8x8x128xbf16>, vector<8x8x128xbf16>, vector<8x8x128xbf16>, vector<8x8x128xbf16>, vector<8x8x128xbf16>, vector<8x8x128xbf16> -> vector<8x8x1152xbf16>
    %72 = vector.shape_cast %71 : vector<8x8x1152xbf16> to vector<64x1152xbf16>
    %c0_115 = arith.constant 0 : index
    %c0_116 = arith.constant 0 : index
    %73 = vector.load %arg4[%c0_115, %c0_116] : memref<1152x128xbf16, #tpu.memory_space<vmem>>, vector<1152x128xbf16>
    %cst_117 = arith.constant dense<0.000000e+00> : vector<64x128xf32>
    %74 = tpu.matmul %72, %73, %cst_117 {dimension_numbers = #tpu.dot_dimension_numbers<[1], [0], [0], [1], [0, 0, 1, 1], [], []>} : vector<64x1152xbf16>, vector<1152x128xbf16>, vector<64x128xf32> -> vector<64x128xf32>
    %c0_118 = arith.constant 0 : index
    %c0_119 = arith.constant 0 : index
    %75 = vector.load %arg5[%c0_118, %c0_119] : memref<1x128xf32, #tpu.memory_space<vmem>>, vector<1x128xf32>
    %76 = vector.broadcast %75 : vector<1x128xf32> to vector<64x128xf32>
    %77 = arith.addf %74, %76 : vector<64x128xf32>
    %78 = arith.addf %77, %52 : vector<64x128xf32>
    %cst_120 = arith.constant 0.000000e+00 : f32
    %79 = vector.broadcast %cst_120 : f32 to vector<64x128xf32>
    %80 = arith.maximumf %78, %79 : vector<64x128xf32>
    %81 = vector.shape_cast %80 : vector<64x128xf32> to vector<8x8x128xf32>
    %c0_121 = arith.constant 0 : index
    %c0_122 = arith.constant 0 : index
    %c0_123 = arith.constant 0 : index
    %c0_124 = arith.constant 0 : index
    %82 = vector.load %arg6[%c0_121, %c0_122, %c0_123, %c0_124] : memref<1x8x8x128xf32, #tpu.memory_space<vmem>>, vector<1x8x8x128xf32>
    %83 = vector.shape_cast %82 : vector<1x8x8x128xf32> to vector<8x8x128xf32>
    %84 = vector.shape_cast %81 : vector<8x8x128xf32> to vector<1x8x8x128xf32>
    tpu.vector_store %arg6[%c0_121, %c0_122, %c0_123, %c0_124], %84 {strides = array<i32>} : memref<1x8x8x128xf32, #tpu.memory_space<vmem>>, vector<1x8x8x128xf32>,
    return
  }
  func.func @transform_0(%arg0: i32) -> (i32, i32, i32, i32) {
    %c0_i32 = arith.constant 0 : i32
    %c0_i32_0 = arith.constant 0 : i32
    %c0_i32_1 = arith.constant 0 : i32
    %c0_i32_2 = arith.constant 0 : i32
    return %arg0, %c0_i32, %c0_i32_0, %c0_i32_1 : i32, i32, i32, i32
  }
  func.func @transform_1(%arg0: i32) -> (i32, i32) {
    %c0_i32 = arith.constant 0 : i32
    %c0_i32_0 = arith.constant 0 : i32
    %c0_i32_1 = arith.constant 0 : i32
    return %c0_i32, %c0_i32_0 : i32, i32
  }
  func.func @transform_2(%arg0: i32) -> (i32, i32) {
    %c0_i32 = arith.constant 0 : i32
    %c0_i32_0 = arith.constant 0 : i32
    %c0_i32_1 = arith.constant 0 : i32
    return %c0_i32, %c0_i32_0 : i32, i32
  }
  func.func @transform_3(%arg0: i32) -> (i32, i32) {
    %c0_i32 = arith.constant 0 : i32
    %c0_i32_0 = arith.constant 0 : i32
    %c0_i32_1 = arith.constant 0 : i32
    return %c0_i32, %c0_i32_0 : i32, i32
  }
  func.func @transform_4(%arg0: i32) -> (i32, i32) {
    %c0_i32 = arith.constant 0 : i32
    %c0_i32_0 = arith.constant 0 : i32
    %c0_i32_1 = arith.constant 0 : i32
    return %c0_i32, %c0_i32_0 : i32, i32
  }
  func.func @transform_5(%arg0: i32) -> (i32, i32, i32, i32) {
    %c0_i32 = arith.constant 0 : i32
    %c0_i32_0 = arith.constant 0 : i32
    %c0_i32_1 = arith.constant 0 : i32
    %c0_i32_2 = arith.constant 0 : i32
    return %arg0, %c0_i32, %c0_i32_0, %c0_i32_1 : i32, i32, i32, i32
  }
}

</mosaic_0001>

<bundles_post_ra>
// kernel: tpu_custom_call.1
= control target key start
LH: loop header
LB: loop body
LE: loop exit
PB: predicated region body
PF: predicated region fallthrough
CT: control target
= control target key end

     0   :  { %10 = vsyncpa [#allocation5], 0  ;;  %s6091_s0 = inlined_call_operand.hbm [shape: f32[2,8,8,256], index: 0, kind: input, shape index: {}]   ;;  %s6092_s1 = inlined_call_operand.hbm [shape: bf16[768,256], index: 1, kind: input, shape index: {}]   ;;  %s6093_s2 = inlined_call_operand.vmem [shape: f32[1,256], index: 2, kind: input, shape index: {}]   ;;  %s6094_s3 = inlined_call_operand.hbm [shape: bf16[1152,128], index: 3, kind: input, shape index: {}]   ;;  %s6095_s4 = inlined_call_operand.vmem [shape: f32[1,128], index: 4, kind: input, shape index: {}]   ;;  %s6096_s5 = inlined_call_operand.hbm [shape: f32[2,8,8,128], index: 5, kind: output, shape index: {}]  }
   0x1   :  { %12 = vsyncpa [#allocation5 + $0x1], 0 }
   0x2   :  { %13 = vsyncpa [#allocation8], 0 }
   0x3   :  { %14 = vsyncpa [#allocation6], 0 }
   0x4   :  { %16 = vsyncpa [#allocation6 + $0x1], 0  ;;  %s5247_s18 = smov 0   ;;  %s5249_s19 = smov 0  }
   0x5   :  { %s5251_s20 = smov 0   ;;  %s5253_s21 = smov 0  }
   0x6 LB: > { %s5268_s22 = sadd.s32 4294967295, %s5201_s21   ;;  %s4012_s23 = sadd.s32 4294967294, %s5201_s21   ;;  %s5201_s21 = sphi %s5253_s21, %s6126_s21   ;;  %s5197_s20 = sphi %s5251_s20, %s6125_s20   ;;  %s5193_s19 = sphi %s5249_s19, %s6124_s19   ;;  %s5189_s18 = sphi %s5247_s18, %s6123_s18  }
   0x7   : > { %p42_p0 = scmp.ne.s32.totalorder %s5193_s19, %s5189_s18  ;;  %p6097_p1 = scmp.eq.s32.totalorder %s5268_s22, 0 }
   0x8   : > { %p156_p3 = scmp.eq.s32.totalorder %s4012_s23, 1  ;;  %p4013_p5 = scmp.ge.s32.totalorder %s5201_s21, 1 }
   0x9   : > { %p5277_p4 = por %p6097_p1, %p42_p0  ;;  %p163_p7 = scmp.lt.s32.totalorder %s5201_s21, 3 }
   0xa   : > { %p5282_p6 = por %p156_p3, %p42_p0  ;;  %s5203_s27 = smov [#allocation7]  }
   0xb   : > { %s6100_s24 = scalar_select %p5277_p4, 1, 0 }
   0xc   : > { %s6101_s25 = scalar_select %p5282_p6, 1, 0 }
   0xd   : > { %p5287_p8 = pnand %p4013_p5, %p163_p7  ;;  %s175_s28 = sshll.u32 %s5203_s27, 4  ;;  %s5291_s28 = int_to_ptr.vmem [resolvable:$true] %s175_s28 }
   0xe   : > { %s5204_s30 = smov [#allocation9]   ;;  %s5045_s9 = scalar_lea.hbm %s6092_s1, 12288 }
   0xf   : > { %p4669_p9 = pneg %p5287_p8  ;;  %s191_s6 = sshll.u32 %s5204_s30, 4  ;;  %s5302_s6 = int_to_ptr.vmem [resolvable:$true] %s191_s6 }
  0x10   : > { %p5046_p12 = scmp.ne.s32.totalorder %s6092_s1, %s5045_s9  ;;  %p5052_p5 = scmp.lt.u32.totalorder %s5045_s9, %s6092_s1 }
  0x11   : > { %p5298_p11 = pnand %p4669_p9, %p6097_p1 }
  0x13   : > { %p5047_p13 = pneg %p5298_p11 }
  0x15   : > { %p5048_p0 = pnand %p5047_p13, %p5046_p12 }
  0x17   : > { %p5049_p3 = pneg %p5048_p0 }
  0x19   : > { %p5054_p7 = pnand %p5052_p5, %p5049_p3 }
  0x1b   : > { %5057 = shalt.err (!%p5054_p7)
}
  0x1c   : > { %s5058_s14 = scalar_lea.vmem %s5291_s28, 12288  ;;  %p5066_p2 = scmp.lt.s32.totalorder %s5291_s28, %s5291_s28 }
  0x1d   : > { %p5059_p9 = scmp.ne.s32.totalorder %s5291_s28, %s5058_s14  ;;  %p5067_p12 = scmp.lt.s32.totalorder %s5058_s14, %s5058_s14 }
  0x1f   : > { %p5061_p10 = pnand %p5059_p9, %p5047_p13  ;;  %p5068_p0 = por %p5067_p12, %p5066_p2 }
  0x21   : > { %p5062_p1 = pneg %p5061_p10 }
  0x23   : > { %p5069_p6 = pnand %p5068_p0, %p5062_p1 }
  0x25   : > { %5072 = shalt.err (!%p5069_p6)
}
  0x26   : > { %s5205_s15 = smov 128   ;;  %s5206_s16 = smov 8  }
  0x27   : > { %4672 = dma.hbm_to_vmem [thread:$0]  (!%p5298_p11), %s6092_s1, 12288, %s5291_s28, [#allocation8], %s5205_s15, %s5205_s15, %s5206_s16  }
  0x28   : > { %s5073_s7 = scalar_lea.hbm %s6094_s3, 9216 }
  0x29   : > { %p5074_p2 = scmp.ne.s32.totalorder %s6094_s3, %s5073_s7  ;;  %p5080_p10 = scmp.lt.u32.totalorder %s5073_s7, %s6094_s3 }
  0x2b   : > { %p5076_p1 = pnand %p5074_p2, %p5047_p13 }
  0x2d   : > { %p5077_p6 = pneg %p5076_p1 }
  0x2f   : > { %p5082_p3 = pnand %p5080_p10, %p5077_p6 }
  0x31   : > { %5085 = shalt.err (!%p5082_p3)
}
  0x32   : > { %s5086_s28 = scalar_lea.vmem %s5302_s6, 9216  ;;  %p5094_p12 = scmp.lt.s32.totalorder %s5302_s6, %s5302_s6 }
  0x33   : > { %p5087_p5 = scmp.ne.s32.totalorder %s5302_s6, %s5086_s28  ;;  %p5095_p0 = scmp.lt.s32.totalorder %s5086_s28, %s5086_s28 }
  0x35   : > { %p5089_p7 = pnand %p5087_p5, %p5047_p13  ;;  %p5096_p2 = por %p5095_p0, %p5094_p12 }
  0x37   : > { %p5090_p9 = pneg %p5089_p7 }
  0x39   : > { %p5097_p1 = pnand %p5096_p2, %p5090_p9 }
  0x3b   : > { %5100 = shalt.err (!%p5097_p1)
}
  0x3c   : > { %s5207_s12 = smov 64   ;;  %s5208_s13 = smov 4  }
  0x3d   : > { %4675 = dma.hbm_to_vmem [thread:$0]  (!%p5298_p11), %s6094_s3, 9216, %s5302_s6, [#allocation8], %s5207_s12, %s5207_s12, %s5208_s13  }
  0x3e   : > { %s5357_s16 = sadd.s32 1, %s5201_s21   ;;  %s29_s23 = sadd.s32 1, %s5197_s20 }
  0x3f   : > { %s26_s17 = ssub.s32 %s5201_s21, %s5357_s16  ;;  %p36_p6 = scmp.ne.s32.totalorder %s5197_s20, %s5193_s19 }
  0x40   : > { %p27_p13 = scmp.eq.s32.totalorder %s26_s17, 0  ;;  %p37_p10 = scmp.eq.s32.totalorder %s5201_s21, 0 }
  0x41   : > { %p6104_p5 = scmp.eq.s32.totalorder %s5268_s22, 1  ;;  %p4686_p9 = scmp.lt.s32.totalorder %s5201_s21, 2 }
  0x42   : > { %s5366_s27 = scalar_select %p27_p13, %s5197_s20, %s29_s23  }
  0x43   : > { %p38_p3 = por %p37_p10, %p36_p6  ;;  %p5370_p7 = por %p6104_p5, %p36_p6 }
  0x44   : > { %s208_s29 = sand.u32 1, %s5197_s20   ;;  %s4371_s6 = sshll.u32 %s5201_s21, 11 }
  0x45   : > { %s6105_s30 = scalar_select %p5370_p7, 1, 0 }
  0x46   : > { %s4017_s7 = sshll.u32 %s208_s29, 7  ;;  %s5380_s10 = scalar_lea.hbm %s6091_s0, %s4371_s6 }
  0x47   : > { %s212_s11 = scalar_lea.vmem [#allocation4], %s4017_s7  ;;  %p5384_p11 = pnand %p4686_p9, %p38_p3 }
  0x48   : > { %s219_s28 = sshll.u32 %s212_s11, 4  ;;  %s5388_s13 = scalar_lea.sflag [#allocation5], %s208_s29  ;;  %s5382_s28 = int_to_ptr.vmem [resolvable:$true] %s219_s28 }
  0x49   : > { %s5101_s14 = scalar_lea.hbm %s5380_s10, 2048  ;;  %p5103_p0 = pneg %p5384_p11 }
  0x4a   : > { %p5102_p12 = scmp.ne.s32.totalorder %s5380_s10, %s5101_s14  ;;  %s5106_s23 = scalar_lea.hbm %s6091_s0, 4096 }
  0x4b   : > { %p5107_p13 = scmp.lt.u32.totalorder %s5380_s10, %s6091_s0  ;;  %p5108_p6 = scmp.lt.u32.totalorder %s5106_s23, %s5101_s14 }
  0x4c   : > { %p5104_p2 = pnand %p5103_p0, %p5102_p12  ;;  %p5110_p3 = scmp.lt.u32.totalorder %s5101_s14, %s5380_s10 }
  0x4d   : > { %p5109_p10 = por %p5108_p6, %p5107_p13 }
  0x4e   : > { %p5105_p1 = pneg %p5104_p2 }
  0x4f   : > { %p5111_p5 = por %p5110_p3, %p5109_p10 }
  0x51   : > { %p5112_p9 = pnand %p5111_p5, %p5105_p1 }
  0x53   : > { %5115 = shalt.err (!%p5112_p9)
}
  0x54   : > { %s5116_s29 = scalar_lea.vmem %s5382_s28, 2048  ;;  %s5209_s8 = smov [#allocation4]  }
  0x55   : > { %p5117_p12 = scmp.ne.s32.totalorder %s5382_s28, %s5116_s29  ;;  %s5121_s9 = sshll.u32 %s5209_s8, 4  ;;  %s5122_s9 = int_to_ptr.vmem [resolvable:$false] %s5121_s9 }
  0x56   : > { %s5123_s11 = scalar_lea.vmem %s5122_s9, 4096  ;;  %p5124_p4 = scmp.lt.s32.totalorder %s5382_s28, %s5122_s9 }
  0x57   : > { %p5119_p2 = pnand %p5117_p12, %p5103_p0  ;;  %p5125_p13 = scmp.lt.s32.totalorder %s5123_s11, %s5116_s29 }
  0x59   : > { %p5120_p7 = pneg %p5119_p2  ;;  %p5126_p6 = por %p5125_p13, %p5124_p4 }
  0x5b   : > { %p5127_p10 = pnand %p5126_p6, %p5120_p7 }
  0x5d   : > { %5130 = shalt.err (!%p5127_p10)
}
  0x5e   : > { %s5210_s14 = smov 256   ;;  %s5211_s15 = smov 16  }
  0x5f   : > { %4679 = dma.hbm_to_vmem [thread:$0]  (!%p5384_p11), %s5380_s10, 2048, %s5382_s28, %s5388_s13, %s5210_s14, %s5210_s14, %s5211_s15  }
  0x60   : > { %231 = sbr.rel (%p5287_p8) target bundleno = 1000 (0x3e8), region = 40  ;;  %s5419_s17 = sand.u32 (!%p5287_p8), 1, %s5193_s19  }
  0x61   : > { %s4021_s23 = sshll.u32 (!%p5287_p8), %s5419_s17, 7  ;;  %s234_s7 = scalar_lea.sflag (!%p5287_p8), [#allocation5], %s5419_s17 }
  0x62   : > { %s5423_s6 = scalar_lea.vmem (!%p5287_p8), [#allocation4], %s4021_s23  ;;  %p6107_p4 = scmp.ne.s32.totalorder (!%p5287_p8), %s6100_s24, 0 }
  0x67   : > { %5176 = dma.done.wait (%p6107_p4), %s234_s7, 2048  }
  0x68   : > { %5178 = vsyncadd (%p6107_p4), %s234_s7, 4294965248  ;;  %p6108_p7 = scmp.eq.s32.totalorder %s5268_s22, 0 }
  0x6a   : > { %5180 = dma.done.wait (%p6108_p7), [#allocation8], 21504   ;;  %p6109_p8 = pmov %p6108_p7 }
  0x6b   : > { %v5212_v0 = vmov 0   ;;  %vm274_vm0 = vcmask 1040384   ;;  %vm275_vm1 = vsmask.f32 256  ;;  %v282_v2 = vld [vmem:[#allocation2 + $0x8c] sm:$0x1] }
  0x6c   : > { %5182 = vsyncadd (%p6109_p8), [#allocation8], 4294945792  ;;  %273 = vst [vmem:[#allocation2] sm:$0xf] %v5212_v0  ;;  %v672_v3 = vld [vmem:[%s5423_s6 + $0x8] sm:$0xff]  ;;  %s5213_s24 = smov 64  }
  0x6d   : > { %281 = vst [vmem:[#allocation2 + $0x88] sm:$0xf] %v5212_v0  ;;  %2168 = vst [vmem:[#allocation3] sm:$0xf] %v5212_v0  ;;  %v4388_v5 = vpack.c.bf16 %v672_v3, %v672_v3  ;;  %v673_v8 = vld [vmem:[%s5423_s6 + $0x18] sm:$0xff]  ;;  %v674_v10 = vld [vmem:[%s5423_s6 + $0x28] sm:$0xff] }
  0x6e   : > { %2169 = vst [vmem:[#allocation3 + $0x4] sm:$0x1] %v5212_v0  ;;  %2171 = vst [vmem:[#allocation3 + $0x48] sm:$0xf] %v5212_v0  ;;  %v4734_v11 = vld [vmem:[#allocation7 + $0x4] ss:$8 sps:$4 sm:$0xff]   ;;  %v4389_v14 = vpack.c.bf16 %v673_v8, %v673_v8  ;;  %v4390_v19 = vpack.c.bf16 %v674_v10, %v674_v10 }
  0x6f   : > { %2172 = vst [vmem:[#allocation3 + $0x4c] sm:$0x1] %v5212_v0  ;;  %vm5435_vm2 = vmand %vm274_vm0, %vm275_vm1  ;;  %712 = vrot.lane.b32.xlu0 %v4388_v5, %s5213_s24  ;;  %v786_v6 = vshrl.u32 %v4388_v5, 16  ;;  %v789_v7 = vshll.u32 %v4388_v5, 16  ;;  %v4736_v15 = vld [vmem:[#allocation7] ss:$8 sps:$4 sm:$0xff]   ;;  %1941 = vmatprep.subr.bf16.mxu0 %v4734_v11 }
  0x70   : > { %v283_v4 = vsel %vm5435_vm2, 0, %v282_v2  ;;  %v675_v16 = vld [vmem:[%s5423_s6 + $0x38] sm:$0xff]  ;;  %v676_v20 = vld [vmem:[%s5423_s6 + $0x48] sm:$0xff]  ;;  %v794_v21 = vshrl.u32 %v4389_v14, 16  ;;  %1942 = vmatpush1.bf16.msra.mxu0 %v4736_v15  ;;  %v797_v28 = vshll.u32 %v4389_v14, 16  ;;  %v802_v29 = vshrl.u32 %v4390_v19, 16 }
  0x71   : > { %284 = vst [vmem:[#allocation2 + $0x8c] sm:$0x1] %v283_v4  ;;  %v788_v9 = vrot.slane %v786_v6, 7  ;;  %v4737_v17 = vld [vmem:[#allocation7 + $0x14] ss:$8 sps:$4 sm:$0xff]   ;;  %v4391_v25 = vpack.c.bf16 %v675_v16, %v675_v16  ;;  %v5453_v26 = vpack.c.bf16 %v676_v20, %v676_v20  ;;  %v805_v35 = vshll.u32 %v4390_v19, 16 }
  0x72   : > { %v4739_v23 = vld [vmem:[#allocation7 + $0x10] ss:$8 sps:$4 sm:$0xff]   ;;  %1943 = vmatprep.subr.bf16.mxu0 %v4737_v17  ;;  %v4740_v24 = vld [vmem:[#allocation7 + $0x24] ss:$8 sps:$4 sm:$0xff]   ;;  %v796_v27 = vrot.slane %v794_v21, 7  ;;  %v804_v34 = vrot.slane %v802_v29, 7 }
  0x73   : > { %v792_v12 = vrot.slane %v788_v9, 4  ;;  %v791_v13 = vor.u32 %v789_v7, %v788_v9  ;;  %v4742_v30 = vld [vmem:[#allocation7 + $0x20] ss:$8 sps:$4 sm:$0xff]   ;;  %v4743_v31 = vld [vmem:[#allocation7 + $0x34] ss:$8 sps:$4 sm:$0xff]   ;;  %v810_v41 = vshrl.u32 %v4391_v25, 16 }
  0x74   : > { %1944 = vmatpush1.bf16.msra.mxu0 %v4739_v23  ;;  %v799_v32 = vor.u32 %v797_v28, %v796_v27  ;;  %v800_v33 = vrot.slane %v796_v27, 4  ;;  %v4745_v36 = vld [vmem:[#allocation7 + $0x30] ss:$8 sps:$4 sm:$0xff]   ;;  %v4746_v37 = vld [vmem:[#allocation7 + $0x44] ss:$8 sps:$4 sm:$0xff]   ;;  %v807_v38 = vor.u32 %v805_v35, %v804_v34  ;;  %v808_v39 = vrot.slane %v804_v34, 4 }
  0x75   : > { %851 = vrot.lane.b32.xlu1 %v792_v12, %s5213_s24  ;;  %849 = vrot.lane.b32.xlu0 %v791_v13, %s5213_s24  ;;  %v677_v40 = vld [vmem:[%s5423_s6 + $0x58] sm:$0xff]  ;;  %v678_v42 = vld [vmem:[%s5423_s6 + $0x68] sm:$0xff]  ;;  %v818_v45 = vshrl.u32 %v5453_v26, 16  ;;  %v812_v49 = vrot.slane %v810_v41, 7  ;;  %v813_v50 = vshll.u32 %v4391_v25, 16  ;;  %v821_v56 = vshll.u32 %v5453_v26, 16 }
  0x76   : > { %1945 = vmatprep.subr.bf16.mxu0 %v4740_v24  ;;  %v4748_v43 = vld [vmem:[#allocation7 + $0x40] ss:$8 sps:$4 sm:$0xff]   ;;  %v4749_v44 = vld [vmem:[#allocation7 + $0x54] ss:$8 sps:$4 sm:$0xff]   ;;  %v5465_v47 = vpack.c.bf16 %v677_v40, %v677_v40  ;;  %v5467_v48 = vpack.c.bf16 %v678_v42, %v678_v42  ;;  %v4751_v51 = vld [vmem:[#allocation7 + $0x50] ss:$8 sps:$4 sm:$0xff]  }
  0x77   : > { %v288_v46 = vld [vmem:[#allocation2 + $0x8] sm:$0x1]  ;;  %v4752_v53 = vld [vmem:[#allocation7 + $0x64] ss:$8 sps:$4 sm:$0xff]   ;;  %v820_v55 = vrot.slane %v818_v45, 7  ;;  %v815_v59 = vor.u32 %v813_v50, %v812_v49  ;;  %v816_v60 = vrot.slane %v812_v49, 4 }
  0x78   : > { %v390_v18 = vld [vmem:[#allocation2 + $0x8c] sm:$0x1]  ;;  %1946 = vmatpush1.bf16.msra.mxu0 %v4742_v30  ;;  %v289_v52 = vsel %vm5435_vm2, 0, %v288_v46  ;;  %v291_v58 = vld [vmem:[#allocation2 + $0x10] sm:$0x1]  ;;  %v826_v61 = vshrl.u32 %v5465_v47, 16 }
  0x79   : > { %v391_v22 = vsel %vm5435_vm2, 0, %v390_v18  ;;  %714 = vrot.lane.b32.xlu1 %v4389_v14, %s5213_s24  ;;  %716 = vrot.lane.b32.xlu0 %v4390_v19, %s5213_s24  ;;  %290 = vst [vmem:[#allocation2 + $0x8] sm:$0x1] %v289_v52  ;;  %v342_v54 = vld [vmem:[#allocation2 + $0xc] sm:$0x1]  ;;  %v292_v62 = vsel %vm5435_vm2, 0, %v291_v58  ;;  %v823_v10 = vor.u32 %v821_v56, %v820_v55 }
  0x7a   : > { %392 = vst [vmem:[#allocation2 + $0x8c] sm:$0x1] %v391_v22  ;;  %1947 = vmatprep.subr.bf16.mxu0 %v4743_v31  ;;  %v343_v57 = vsel %vm5435_vm2, 0, %v342_v54  ;;  %v294_v63 = vld [vmem:[#allocation2 + $0x18] sm:$0x1]  ;;  %v394_v7 = vld [vmem:[%s5423_s6 + $0x10] sm:$0xff] }
  0x7b   : > { %344 = vst [vmem:[#allocation2 + $0xc] sm:$0x1] %v343_v57  ;;  %v4754_v0 = vld [vmem:[#allocation7 + $0x60] ss:$8 sps:$4 sm:$0xff]   ;;  %293 = vst [vmem:[#allocation2 + $0x10] sm:$0x1] %v292_v62  ;;  %v5499_v24 = vpack.c.bf16 %v394_v7, %v394_v7 }
  0x7c   : > { %1948 = vmatpush1.bf16.msra.mxu0 %v4745_v36  ;;  %v295_v2 = vsel %vm5435_vm2, 0, %v294_v63  ;;  %v297_v3 = vld [vmem:[#allocation2 + $0x20] sm:$0x1]  ;;  %v4755_v4 = vld [vmem:[#allocation7 + $0x74] ss:$8 sps:$4 sm:$0xff]   ;;  %v824_v11 = vrot.slane %v820_v55, 4 }
  0x7d   : > { %718 = vrot.lane.b32.xlu1 %v4391_v25, %s5213_s24  ;;  %720 = vrot.lane.b32.xlu0 %v5453_v26, %s5213_s24  ;;  %296 = vst [vmem:[#allocation2 + $0x18] sm:$0x1] %v295_v2  ;;  %v298_v5 = vsel %vm5435_vm2, 0, %v297_v3  ;;  %v300_v6 = vld [vmem:[#allocation2 + $0x28] sm:$0x1]  ;;  %v393_v12 = vld [vmem:[%s5423_s6] sm:$0xff] }
  0x7e   : > { %1949 = vmatprep.subr.bf16.mxu0 %v4746_v37  ;;  %299 = vst [vmem:[#allocation2 + $0x20] sm:$0x1] %v298_v5  ;;  %v301_v8 = vsel %vm5435_vm2, 0, %v300_v6  ;;  %v345_v9 = vld [vmem:[#allocation2 + $0x14] sm:$0x1]  ;;  %v829_v15 = vshll.u32 %v5465_v47, 16  ;;  %v5501_v25 = vpack.c.bf16 %v393_v12, %v393_v12 }
  0x7f   : > { %v4757_v13 = vld [vmem:[#allocation7 + $0x70] ss:$8 sps:$4 sm:$0xff]   ;;  %302 = vst [vmem:[#allocation2 + $0x28] sm:$0x1] %v301_v8  ;;  %v346_v14 = vsel %vm5435_vm2, 0, %v345_v9  ;;  %v828_v17 = vrot.slane %v826_v61, 7 }
  0x80   : > { %1950 = vmatpush1.bf16.msra.mxu0 %v4748_v43  ;;  %347 = vst [vmem:[#allocation2 + $0x14] sm:$0x1] %v346_v14  ;;  %v348_v16 = vld [vmem:[#allocation2 + $0x1c] sm:$0x1]  ;;  %v834_v18 = vshrl.u32 %v5467_v48, 16  ;;  %v1323_v26 = vld [vmem:[#allocation7 + $0x90] sm:$0xff] }
  0x81   : > { %853 = vrot.lane.b32.xlu1 %v799_v32, %s5213_s24  ;;  %855 = vrot.lane.b32.xlu0 %v800_v33, %s5213_s24  ;;  %v4758_v19 = vld [vmem:[#allocation7 + $0x84] ss:$8 sps:$4 sm:$0xff]   ;;  %v349_v20 = vsel %vm5435_vm2, 0, %v348_v16  ;;  %v4760_v21 = vld [vmem:[#allocation7 + $0x80] ss:$8 sps:$4 sm:$0xff]   ;;  %v1324_v34 = vld [vmem:[#allocation7 + $0x98] sm:$0xff]  ;;  %v831_v41 = vor.u32 %v829_v15, %v828_v17 }
  0x82   : > { %1951 = vmatprep.subr.bf16.mxu0 %v4749_v44  ;;  %350 = vst [vmem:[#allocation2 + $0x1c] sm:$0x1] %v349_v20  ;;  %v303_v22 = vld [vmem:[#allocation2 + $0x30] sm:$0x1]  ;;  %v306_v23 = vld [vmem:[#allocation2 + $0x38] sm:$0x1]  ;;  %v4123_v45 = vcombine.low %v1323_v26, %v1324_v34 }
  0x83   : > { %v304_v27 = vsel %vm5435_vm2, 0, %v303_v22  ;;  %v307_v28 = vsel %vm5435_vm2, 0, %v306_v23  ;;  %v277_v29 = vld [vmem:[#allocation2 + $0x4] sm:$0x1]  ;;  %v285_v30 = vld [vmem:[#allocation2] sm:$0x1] }
  0x84   : > { %1952 = vmatpush1.bf16.msra.mxu0 %v4751_v51  ;;  %305 = vst [vmem:[#allocation2 + $0x30] sm:$0x1] %v304_v27  ;;  %308 = vst [vmem:[#allocation2 + $0x38] sm:$0x1] %v307_v28  ;;  %v278_v31 = vsel %vm5435_vm2, 0, %v277_v29  ;;  %v286_v32 = vsel %vm5435_vm2, 0, %v285_v30 }
  0x85   : > { %857 = vrot.lane.b32.xlu1 %v807_v38, %s5213_s24  ;;  %859 = vrot.lane.b32.xlu0 %v808_v39, %s5213_s24  ;;  %v336_v33 = vld [vmem:[#allocation2 + $0x88] sm:$0x1]  ;;  %v4761_v35 = vld [vmem:[#allocation7 + $0x94] ss:$8 sps:$4 sm:$0xff]   ;;  %279 = vst [vmem:[#allocation2 + $0x4] sm:$0x1] %v278_v31 }
  0x86   : > { %1953 = vmatprep.subr.bf16.mxu0 %v4752_v53  ;;  %287 = vst [vmem:[#allocation2] sm:$0x1] %v286_v32  ;;  %v337_v36 = vsel %vm5435_vm2, 0, %v336_v33  ;;  %v836_v37 = vrot.slane %v834_v18, 7  ;;  %v837_v38 = vshll.u32 %v5467_v48, 16  ;;  %v832_v40 = vrot.slane %v828_v17, 4 }
  0x87   : > { %338 = vst [vmem:[#allocation2 + $0x88] sm:$0x1] %v337_v36  ;;  %v351_v39 = vld [vmem:[#allocation2 + $0x24] sm:$0x1]  ;;  %v508_v42 = vshrl.u32 %v5501_v25, 16  ;;  %v511_v50 = vshll.u32 %v5501_v25, 16 }
  0x88   : > { %1954 = vmatpush1.bf16.msra.mxu0 %v4754_v0  ;;  %v352_v43 = vsel %vm5435_vm2, 0, %v351_v39  ;;  %v354_v44 = vld [vmem:[#allocation2 + $0x2c] sm:$0x1]  ;;  %v312_v49 = vld [vmem:[#allocation2 + $0x48] sm:$0x1]  ;;  %v840_v53 = vrot.slane %v836_v37, 4  ;;  %v839_v54 = vor.u32 %v837_v38, %v836_v37 }
  0x89   : > { %722 = vrot.lane.b32.xlu1 %v5465_v47, %s5213_s24  ;;  %724 = vrot.lane.b32.xlu0 %v5467_v48, %s5213_s24  ;;  %353 = vst [vmem:[#allocation2 + $0x24] sm:$0x1] %v352_v43  ;;  %v355_v46 = vsel %vm5435_vm2, 0, %v354_v44  ;;  %v4763_v47 = vld [vmem:[#allocation7 + $0xa4] ss:$8 sps:$4 sm:$0xff]   ;;  %v313_v52 = vsel %vm5435_vm2, 0, %v312_v49 }
  0x8a   : > { %1955 = vmatprep.subr.bf16.mxu0 %v4755_v4  ;;  %356 = vst [vmem:[#allocation2 + $0x2c] sm:$0x1] %v355_v46  ;;  %v315_v48 = vld [vmem:[#allocation2 + $0x50] sm:$0x1]  ;;  %v510_v55 = vrot.slane %v508_v42, 7  ;;  %v516_v56 = vshrl.u32 %v5499_v24, 16 }
  0x8b   : > { %v316_v51 = vsel %vm5435_vm2, 0, %v315_v48  ;;  %314 = vst [vmem:[#allocation2 + $0x48] sm:$0x1] %v313_v52  ;;  %v357_v57 = vld [vmem:[#allocation2 + $0x34] sm:$0x1]  ;;  %v519_v63 = vshll.u32 %v5499_v24, 16 }
  0x8c   : > { %1956 = vmatpush1.bf16.msra.mxu0 %v4757_v13  ;;  %317 = vst [vmem:[#allocation2 + $0x50] sm:$0x1] %v316_v51  ;;  %v4765_v58 = vld [vmem:[#allocation7 + $0xa0] ss:$8 sps:$4 sm:$0xff]   ;;  %v4766_v61 = vld [vmem:[#allocation7 + $0xb4] ss:$8 sps:$4 sm:$0xff]   ;;  %v513_v2 = vor.u32 %v511_v50, %v510_v55 }
  0x8d   : > { %861 = vrot.lane.b32.xlu1 %v815_v59, %s5213_s24  ;;  %863 = vrot.lane.b32.xlu0 %v816_v60, %s5213_s24  ;;  %v339_v59 = vld [vmem:[#allocation2 + $0x4] sm:$0x1]  ;;  %v358_v60 = vsel %vm5435_vm2, 0, %v357_v57  ;;  %v360_v0 = vld [vmem:[#allocation2 + $0x3c] sm:$0x1]  ;;  %v518_v3 = vrot.slane %v516_v56, 7 }
  0x8e   : > { %1957 = vmatprep.subr.bf16.mxu0 %v4758_v19  ;;  %v340_v62 = vsel %vm5435_vm2, 0, %v339_v59  ;;  %359 = vst [vmem:[#allocation2 + $0x34] sm:$0x1] %v358_v60  ;;  %v514_v4 = vrot.slane %v510_v55, 4  ;;  %v361_v5 = vsel %vm5435_vm2, 0, %v360_v0  ;;  %v395_v9 = vld [vmem:[%s5423_s6 + $0x20] sm:$0xff] }
  0x8f   : > { %341 = vst [vmem:[#allocation2 + $0x4] sm:$0x1] %v340_v62  ;;  %v4768_v6 = vld [vmem:[#allocation7 + $0xb0] ss:$8 sps:$4 sm:$0xff]   ;;  %362 = vst [vmem:[#allocation2 + $0x3c] sm:$0x1] %v361_v5  ;;  %v521_v12 = vor.u32 %v519_v63, %v518_v3  ;;  %v4374_v19 = vpack.c.bf16 %v395_v9, %v395_v9 }
  0x90   : > { %1958 = vmatpush1.bf16.msra.mxu0 %v4760_v21  ;;  %v4769_v7 = vld [vmem:[#allocation7 + $0xc4] ss:$8 sps:$4 sm:$0xff]   ;;  %v522_v13 = vrot.slane %v518_v3, 4  ;;  %v318_v14 = vld [vmem:[#allocation2 + $0x58] sm:$0x1]  ;;  %v398_v28 = vld [vmem:[%s5423_s6 + $0x50] sm:$0xff] }
  0x91   : > { %865 = vrot.lane.b32.xlu1 %v823_v10, %s5213_s24  ;;  %867 = vrot.lane.b32.xlu0 %v824_v11, %s5213_s24  ;;  %v366_v8 = vld [vmem:[#allocation2 + $0x4c] sm:$0x1]  ;;  %v396_v10 = vld [vmem:[%s5423_s6 + $0x30] sm:$0xff]  ;;  %v4771_v16 = vld [vmem:[#allocation7 + $0xc0] ss:$8 sps:$4 sm:$0xff]   ;;  %v319_v17 = vsel %vm5435_vm2, 0, %v318_v14  ;;  %v5562_v36 = vpack.c.bf16 %v398_v28, %v398_v28 }
  0x92   : > { %1959 = vmatprep.subr.bf16.mxu0 %v4761_v35  ;;  %v367_v11 = vsel %vm5435_vm2, 0, %v366_v8  ;;  %v369_v15 = vld [vmem:[#allocation2 + $0x54] sm:$0x1]  ;;  %320 = vst [vmem:[#allocation2 + $0x58] sm:$0x1] %v319_v17  ;;  %v397_v23 = vld [vmem:[%s5423_s6 + $0x40] sm:$0xff] }
  0x93   : > { %368 = vst [vmem:[#allocation2 + $0x4c] sm:$0x1] %v367_v11  ;;  %v370_v18 = vsel %vm5435_vm2, 0, %v369_v15  ;;  %v4772_v20 = vld [vmem:[#allocation7 + $0xd4] ss:$8 sps:$4 sm:$0xff]   ;;  %v4376_v33 = vpack.c.bf16 %v397_v23, %v397_v23  ;;  %v527_v35 = vshll.u32 %v4374_v19, 16 }
  0x94   : > { %1960 = vmatpush1.bf16.msra.mxu0 %v4123_v45  ;;  %371 = vst [vmem:[#allocation2 + $0x54] sm:$0x1] %v370_v18  ;;  %v324_v21 = vld [vmem:[#allocation2 + $0x68] sm:$0x1]  ;;  %v321_v22 = vld [vmem:[#allocation2 + $0x60] sm:$0x1] }
  0x95   : > { %435 = vrot.lane.b32.xlu0 %v5499_v24, %s5213_s24  ;;  %433 = vrot.lane.b32.xlu1 %v5501_v25, %s5213_s24  ;;  %v4375_v24 = vpack.c.bf16 %v396_v10, %v396_v10  ;;  %v524_v25 = vshrl.u32 %v4374_v19, 16  ;;  %v325_v26 = vsel %vm5435_vm2, 0, %v324_v21  ;;  %v322_v27 = vsel %vm5435_vm2, 0, %v321_v22  ;;  %v4774_v29 = vld [vmem:[#allocation7 + $0xd0] ss:$8 sps:$4 sm:$0xff]   ;;  %v399_v56 = vld [vmem:[%s5423_s6 + $0x60] sm:$0xff] }
  0x96   : > { %1961 = vmatprep.subr.bf16.mxu0 %v4763_v47  ;;  %326 = vst [vmem:[#allocation2 + $0x68] sm:$0x1] %v325_v26  ;;  %323 = vst [vmem:[#allocation2 + $0x60] sm:$0x1] %v322_v27  ;;  %v327_v30 = vld [vmem:[#allocation2 + $0x70] sm:$0x1]  ;;  %v4378_v63 = vpack.c.bf16 %v399_v56, %v399_v56 }
  0x97   : > { %v4775_v31 = vld [vmem:[#allocation7 + $0xe4] ss:$8 sps:$4 sm:$0xff]   ;;  %v328_v32 = vsel %vm5435_vm2, 0, %v327_v30  ;;  %v526_v34 = vrot.slane %v524_v25, 7  ;;  %v532_v37 = vshrl.u32 %v4375_v24, 16  ;;  %v535_v49 = vshll.u32 %v4375_v24, 16 }
  0x98   : > { %1962 = vmatpush1.bf16.msra.mxu0 %v4765_v58  ;;  %329 = vst [vmem:[#allocation2 + $0x70] sm:$0x1] %v328_v32  ;;  %v372_v38 = vld [vmem:[#allocation2 + $0x5c] sm:$0x1]  ;;  %v4777_v39 = vld [vmem:[#allocation7 + $0xe0] ss:$8 sps:$4 sm:$0xff]  }
  0x99   : > { %871 = vrot.lane.b32.xlu0 %v832_v40, %s5213_s24  ;;  %869 = vrot.lane.b32.xlu1 %v831_v41, %s5213_s24  ;;  %v4778_v40 = vld [vmem:[#allocation7 + $0xf4] ss:$8 sps:$4 sm:$0xff]   ;;  %v373_v41 = vsel %vm5435_vm2, 0, %v372_v38  ;;  %v330_v42 = vld [vmem:[#allocation2 + $0x78] sm:$0x1]  ;;  %v529_v47 = vor.u32 %v527_v35, %v526_v34  ;;  %v534_v48 = vrot.slane %v532_v37, 7 }
  0x9a   : > { %1963 = vmatprep.subr.bf16.mxu0 %v4766_v61  ;;  %374 = vst [vmem:[#allocation2 + $0x5c] sm:$0x1] %v373_v41  ;;  %v375_v43 = vld [vmem:[#allocation2 + $0x64] sm:$0x1]  ;;  %v4780_v44 = vld [vmem:[#allocation7 + $0xf0] ss:$8 sps:$4 sm:$0xff]  }
  0x9b   : > { %v331_v45 = vsel %vm5435_vm2, 0, %v330_v42  ;;  %v376_v46 = vsel %vm5435_vm2, 0, %v375_v43  ;;  %v530_v50 = vrot.slane %v526_v34, 4  ;;  %v4785_v51 = vld [vmem:[#allocation7 + $0x104] ss:$8 sps:$4 sm:$0xff]   ;;  %v540_v52 = vshrl.u32 %v4376_v33, 16 }
  0x9c   : > { %1964 = vmatpush1.bf16.msra.mxu0 %v4768_v6  ;;  %332 = vst [vmem:[#allocation2 + $0x78] sm:$0x1] %v331_v45  ;;  %377 = vst [vmem:[#allocation2 + $0x64] sm:$0x1] %v376_v46  ;;  %v537_v55 = vor.u32 %v535_v49, %v534_v48  ;;  %v538_v57 = vrot.slane %v534_v48, 4  ;;  %v400_v61 = vld [vmem:[%s5423_s6 + $0x70] sm:$0xff] }
  0x9d   : > { %875 = vrot.lane.b32.xlu0 %v840_v53, %s5213_s24  ;;  %873 = vrot.lane.b32.xlu1 %v839_v54, %s5213_s24  ;;  %v378_v53 = vld [vmem:[#allocation2 + $0x6c] sm:$0x1]  ;;  %v381_v54 = vld [vmem:[#allocation2 + $0x74] sm:$0x1]  ;;  %v333_v58 = vld [vmem:[#allocation2 + $0x80] sm:$0x1]  ;;  %v4379_v3 = vpack.c.bf16 %v400_v61, %v400_v61 }
  0x9e   : > { %1965 = vmatprep.subr.bf16.mxu0 %v4769_v7  ;;  %v379_v59 = vsel %vm5435_vm2, 0, %v378_v53  ;;  %v382_v60 = vsel %vm5435_vm2, 0, %v381_v54  ;;  %v334_v62 = vsel %vm5435_vm2, 0, %v333_v58  ;;  %v542_v0 = vrot.slane %v540_v52, 7  ;;  %v384_v6 = vld [vmem:[#allocation2 + $0x7c] sm:$0x1] }
  0x9f   : > { %380 = vst [vmem:[#allocation2 + $0x6c] sm:$0x1] %v379_v59  ;;  %383 = vst [vmem:[#allocation2 + $0x74] sm:$0x1] %v382_v60  ;;  %v551_v5 = vshll.u32 %v5562_v36, 16  ;;  %v556_v11 = vshrl.u32 %v4378_v63, 16 }
  0xa0   : > { %1966 = vmatpush1.bf16.msra.mxu0 %v4771_v16  ;;  %335 = vst [vmem:[#allocation2 + $0x80] sm:$0x1] %v334_v62  ;;  %v387_v7 = vld [vmem:[#allocation2 + $0x84] sm:$0x1]  ;;  %v546_v10 = vrot.slane %v542_v0, 4  ;;  %v564_v15 = vshrl.u32 %v4379_v3, 16 }
  0xa1   : > { %571 = vrot.lane.b32.xlu1 %v513_v2, %s5213_s24  ;;  %573 = vrot.lane.b32.xlu0 %v514_v4, %s5213_s24  ;;  %v543_v2 = vshll.u32 %v4376_v33, 16  ;;  %v548_v4 = vshrl.u32 %v5562_v36, 16  ;;  %v388_v14 = vsel %vm5435_vm2, 0, %v387_v7  ;;  %v558_v17 = vrot.slane %v556_v11, 7  ;;  %v309_v21 = vld [vmem:[#allocation2 + $0x40] sm:$0x1] }
  0xa2   : > { %1967 = vmatprep.subr.bf16.mxu0 %v4772_v20  ;;  %389 = vst [vmem:[#allocation2 + $0x84] sm:$0x1] %v388_v14  ;;  %v559_v18 = vshll.u32 %v4378_v63, 16  ;;  %v567_v22 = vshll.u32 %v4379_v3, 16  ;;  %v310_v23 = vsel %vm5435_vm2, 0, %v309_v21  ;;  %v566_v25 = vrot.slane %v564_v15, 7 }
  0xa3   : > { %v545_v8 = vor.u32 %v543_v2, %v542_v0  ;;  %v550_v9 = vrot.slane %v548_v4, 7  ;;  %v562_v26 = vrot.slane %v558_v17, 4  ;;  %311 = vst [vmem:[#allocation2 + $0x40] sm:$0x1] %v310_v23  ;;  %vm625_vm3 = vcmask 516096   ;;  %v4943_v1 = vld [vmem:[#allocation9 + $0x98] sm:$0xff]  }
  0xa4   : > { %1968 = vmatpush1.bf16.msra.mxu0 %v4774_v29  ;;  %v561_v29 = vor.u32 %v559_v18, %v558_v17  ;;  %v570_v30 = vrot.slane %v566_v25, 4  ;;  %vm458_vm4 = vcmask 1043968   ;;  %vm5610_vm5 = vmand %vm625_vm3, %vm275_vm1  ;;  %vm619_vm6 = vcmask 519168   ;;  %v900_v38 = vld [vmem:[#allocation2 + $0xc] sm:$0x1]  ;;  %s4024_s8 = sshll.u32 %s5419_s17, 6 }
  0xa5   : > { %575 = vrot.lane.b32.xlu1 %v521_v12, %s5213_s24  ;;  %577 = vrot.lane.b32.xlu0 %v522_v13, %s5213_s24  ;;  %v679_v12 = vld [vmem:[%s5423_s6 + $0x78] sm:$0xff]  ;;  %v385_v13 = vsel %vm5435_vm2, 0, %v384_v6  ;;  %v553_v16 = vor.u32 %v551_v5, %v550_v9  ;;  %vm620_vm7 = vsmask.f32 7938  ;;  %v945_v42 = vld [vmem:[#allocation2] sm:$0xf] }
  0xa6   : > { %1969 = vmatprep.subr.bf16.mxu0 %v4775_v31  ;;  %386 = vst [vmem:[#allocation2 + $0x7c] sm:$0x1] %v385_v13  ;;  %v4395_v20 = vpack.c.bf16 %v679_v12, %v679_v12  ;;  %v569_v31 = vor.u32 %v567_v22, %v566_v25  ;;  %vm5616_vm8 = vmand %vm619_vm6, %vm620_vm7  ;;  %v953_v43 = vld [vmem:[#allocation2 + $0x4] sm:$0x1]  ;;  %v906_v53 = vld [vmem:[#allocation2 + $0x14] sm:$0x1] }
  0xa7   : > { %v4057_v49 = vcombine.low %v945_v42, %v953_v43  ;;  %v912_v0 = vld [vmem:[#allocation2 + $0x1c] sm:$0x1]  ;;  %v4783_v12 = vld [vmem:[#allocation7 + $0x100] ss:$8 sps:$4 sm:$0xff]   ;;  %v918_v18 = vld [vmem:[#allocation2 + $0x24] sm:$0x1] }
  0xa8   : > { %1970 = vmatpush1.bf16.msra.mxu0 %v4777_v39  ;;  %v842_v27 = vshrl.u32 %v4395_v20, 16  ;;  %v4789_v13 = vld [vmem:[#allocation7 + $0x114] ss:$8 sps:$4 sm:$0xff]   ;;  %v4787_v22 = vld [vmem:[#allocation7 + $0x110] ss:$8 sps:$4 sm:$0xff]   ;;  %vm5749_vm9 = vmand %vm274_vm0, %vm620_vm7  ;;  %vm2347_vm10 = vcmask 1043456  }
  0xa9   : > { %437 = vrot.lane.b32.xlu1 %v4374_v19, %s5213_s24  ;;  %439 = vrot.lane.b32.xlu0 %v4375_v24, %s5213_s24  ;;  %v554_v19 = vrot.slane %v550_v9, 4  ;;  %v363_v24 = vld [vmem:[#allocation2 + $0x44] sm:$0x1]  ;;  %v1036_v52 = vshll.u32 %v4057_v49, 16  ;;  %v1034_v60 = vshrl.u32 %v4057_v49, 16  ;;  %vm5811_vm11 = vmand %vm2347_vm10, %vm620_vm7  ;;  %s6026_s9 = scalar_lea.vmem [#allocation10], %s4024_s8 }
  0xaa   : > { %1971 = vmatprep.subr.bf16.mxu0 %v4778_v40  ;;  %v364_v28 = vsel %vm5435_vm2, 0, %v363_v24  ;;  %v844_v32 = vrot.slane %v842_v27, 7  ;;  %v4864_v39 = vld [vmem:[#allocation7 + $0x250] ss:$8 sps:$4 sm:$0xff]   ;;  %s3920_s11 = sshll.u32 %s6026_s9, 4  ;;  %s4412_s14 = sshll.u32 %s5268_s22, 10  ;;  %s6038_s11 = int_to_ptr.vmem [resolvable:$true] %s3920_s11 }
  0xab   : > { %365 = vst [vmem:[#allocation2 + $0x44] sm:$0x1] %v364_v28  ;;  %v1038_v61 = vrot.slane %v1036_v52, 1  ;;  %s6044_s7 = scalar_lea.hbm %s6096_s5, %s4412_s14  ;;  %s3907_s22 = scalar_lea.sflag [#allocation6], %s5419_s17 }
  0xac   : > { %1972 = vmatpush1.bf16.msra.mxu0 %v4780_v44  ;;  %v848_v35 = vrot.slane %v844_v32, 4  ;;  %s5131_s6 = scalar_lea.vmem %s6038_s11, 1024  ;;  %p6120_p0 = scmp.ne.s32.totalorder %s6105_s30, 0 }
  0xad   : > { %441 = vrot.lane.b32.xlu1 %v4376_v33, %s5213_s24  ;;  %443 = vrot.lane.b32.xlu0 %v5562_v36, %s5213_s24  ;;  %v845_v33 = vshll.u32 %v4395_v20, 16  ;;  %v1039_v6 = vor.u32 %v1038_v61, %v1034_v60  ;;  %p5132_p11 = scmp.ne.s32.totalorder %s6038_s11, %s5131_s6 }
  0xae   : > { %2014 = vmatprep.subr.bf16.mxu0 %v4785_v51 }
  0xaf   : > { %v847_v34 = vor.u32 %v845_v33, %v844_v32  ;;  %v924_v33 = vld [vmem:[#allocation2 + $0x2c] sm:$0x1]  ;;  %p5133_p1 = pnand %p5132_p11, %p6120_p0 }
  0xb1   : > { %579 = vrot.lane.b32.xlu1 %v529_v47, %s5213_s24  ;;  %581 = vrot.lane.b32.xlu0 %v530_v50, %s5213_s24  ;;  %p5134_p3 = pneg %p5133_p1 }
  0xb5   : > { %583 = vrot.lane.b32.xlu1 %v537_v55, %s5213_s24  ;;  %585 = vrot.lane.b32.xlu0 %v538_v57, %s5213_s24 }
  0xb9   : > { %445 = vrot.lane.b32.xlu1 %v4378_v63, %s5213_s24  ;;  %447 = vrot.lane.b32.xlu0 %v4379_v3, %s5213_s24 }
  0xbd   : > { %587 = vrot.lane.b32.xlu1 %v545_v8, %s5213_s24  ;;  %589 = vrot.lane.b32.xlu0 %v546_v10, %s5213_s24 }
  0xc1   : > { %591 = vrot.lane.b32.xlu1 %v553_v16, %s5213_s24  ;;  %593 = vrot.lane.b32.xlu0 %v554_v19, %s5213_s24 }
  0xc5   : > { %595 = vrot.lane.b32.xlu1 %v561_v29, %s5213_s24  ;;  %597 = vrot.lane.b32.xlu0 %v562_v26, %s5213_s24  ;;  %v4792_v29 = vld [vmem:[#allocation7 + $0x124] ss:$8 sps:$4 sm:$0xff]  }
  0xc9   : > { %599 = vrot.lane.b32.xlu1 %v569_v31, %s5213_s24  ;;  %601 = vrot.lane.b32.xlu0 %v570_v30, %s5213_s24 }
  0xcd   : > { %726 = vrot.lane.b32.xlu1 %v4395_v20, %s5213_s24  ;;  %877 = vrot.lane.b32.xlu0 %v847_v34, %s5213_s24 }
  0xd1   : > { %879 = vrot.lane.b32.xlu1 %v848_v35, %s5213_s24  ;;  %s5214_s24 = smov [#allocation10]  }
  0xd2   : > { %s5135_s26 = sshll.u32 %s5214_s24, 4  ;;  %s5136_s26 = int_to_ptr.vmem [resolvable:$false] %s5135_s26 }
  0xd3   : > { %s5137_s10 = scalar_lea.vmem %s5136_s26, 2048  ;;  %p5138_p5 = scmp.lt.s32.totalorder %s6038_s11, %s5136_s26 }
  0xd4   : > { %p5139_p9 = scmp.lt.s32.totalorder %s5137_s10, %s5131_s6 }
  0xd6   : > { %p5140_p12 = por %p5139_p9, %p5138_p5 }
  0xd8   : > { %p5141_p2 = pnand %p5140_p12, %p5134_p3 }
  0xe1   : > { %v713_v37 = vpop.permute.xlu0 %712 }
  0xe2   : > { %737 = vst.msk [vmem:[#allocation2 + $0x8] sm:$0xf] %vm458_vm4, %v713_v37 }
  0xe7   : > { %v852_v40 = vpop.permute.xlu1 %851  ;;  %v850_v41 = vpop.permute.xlu0 %849 }
  0xe8   : > { %v901_v44 = vsel %vm5610_vm5, %v852_v40, %v900_v38 }
  0xe9   : > { %902 = vst [vmem:[#allocation2 + $0xc] sm:$0x1] %v901_v44  ;;  %v897_v45 = vld [vmem:[#allocation2 + $0x8] sm:$0xf] }
  0xea   : > { %v898_v46 = vsel %vm5616_vm8, %v850_v41, %v897_v45  ;;  %v4790_v41 = vld [vmem:[#allocation7 + $0x120] ss:$8 sps:$4 sm:$0xff]  }
  0xeb   : > { %899 = vst [vmem:[#allocation2 + $0x8] sm:$0xf] %v898_v46  ;;  %v715_v47 = vpop.permute.xlu1 %714  ;;  %v717_v48 = vpop.permute.xlu0 %716  ;;  %v4795_v46 = vld [vmem:[#allocation7 + $0x134] ss:$8 sps:$4 sm:$0xff]  }
  0xec   : > { %738 = vst.msk [vmem:[#allocation2 + $0x10] sm:$0xf] %vm458_vm4, %v715_v47  ;;  %739 = vst.msk [vmem:[#allocation2 + $0x18] sm:$0xf] %vm458_vm4, %v717_v48 }
  0xef   : > { %v719_v50 = vpop.permute.xlu1 %718  ;;  %v721_v51 = vpop.permute.xlu0 %720 }
  0xf0   : > { %740 = vst.msk [vmem:[#allocation2 + $0x20] sm:$0xf] %vm458_vm4, %v719_v50  ;;  %741 = vst.msk [vmem:[#allocation2 + $0x28] sm:$0xf] %vm458_vm4, %v721_v51  ;;  %v954_v54 = vld [vmem:[#allocation2 + $0xc] sm:$0x1] }
  0xf1   : > { %v4793_v51 = vld [vmem:[#allocation7 + $0x130] ss:$8 sps:$4 sm:$0xff]  }
  0xf2   : > { %v946_v55 = vld [vmem:[#allocation2 + $0x8] sm:$0xf] }
  0xf3   : > { %v854_v56 = vpop.permute.xlu1 %853  ;;  %v903_v57 = vld [vmem:[#allocation2 + $0x10] sm:$0xf]  ;;  %v856_v58 = vpop.permute.xlu0 %855  ;;  %v4058_v59 = vcombine.low %v946_v55, %v954_v54  ;;  %v909_v2 = vld [vmem:[#allocation2 + $0x18] sm:$0xf]  ;;  %v4081_v17 = vcombine.low %v945_v42, %v946_v55 }
  0xf4   : > { %v904_v62 = vsel %vm5616_vm8, %v854_v56, %v903_v57  ;;  %v907_v63 = vsel %vm5610_vm5, %v856_v58, %v906_v53  ;;  %v4798_v53 = vld [vmem:[#allocation7 + $0x144] ss:$8 sps:$4 sm:$0xff]   ;;  %v930_v57 = vld [vmem:[#allocation2 + $0x34] sm:$0x1] }
  0xf5   : > { %905 = vst [vmem:[#allocation2 + $0x10] sm:$0xf] %v904_v62  ;;  %908 = vst [vmem:[#allocation2 + $0x14] sm:$0x1] %v907_v63  ;;  %v1043_v3 = vshll.u32 %v4058_v59, 16  ;;  %v1041_v7 = vshrl.u32 %v4058_v59, 16 }
  0xf6   : > { %v4796_v63 = vld [vmem:[#allocation7 + $0x140] ss:$8 sps:$4 sm:$0xff]  }
  0xf7   : > { %v858_v4 = vpop.permute.xlu1 %857  ;;  %v860_v5 = vpop.permute.xlu0 %859  ;;  %v1045_v8 = vrot.slane %v1043_v3, 1  ;;  %v915_v21 = vld [vmem:[#allocation2 + $0x20] sm:$0xf]  ;;  %v921_v32 = vld [vmem:[#allocation2 + $0x28] sm:$0xf] }
  0xf8   : > { %v910_v9 = vsel %vm5616_vm8, %v858_v4, %v909_v2  ;;  %v913_v10 = vsel %vm5610_vm5, %v860_v5, %v912_v0  ;;  %v4804_v4 = vld [vmem:[#allocation7 + $0x154] ss:$8 sps:$4 sm:$0xff]  }
  0xf9   : > { %911 = vst [vmem:[#allocation2 + $0x18] sm:$0xf] %v910_v9  ;;  %914 = vst [vmem:[#allocation2 + $0x1c] sm:$0x1] %v913_v10  ;;  %v1046_v11 = vor.u32 %v1045_v8, %v1041_v7  ;;  %v936_v7 = vld [vmem:[#allocation2 + $0x3c] sm:$0x1] }
  0xfb   : > { %v723_v14 = vpop.permute.xlu1 %722  ;;  %v725_v15 = vpop.permute.xlu0 %724  ;;  %v4082_v16 = vcombine.low %v1039_v6, %v1046_v11 }
  0xfc   : > { %742 = vst.msk [vmem:[#allocation2 + $0x30] sm:$0xf] %vm458_vm4, %v723_v14  ;;  %743 = vst.msk [vmem:[#allocation2 + $0x38] sm:$0xf] %vm458_vm4, %v725_v15  ;;  %v5638_v19 = vld [vmem:[#allocation2 + $0x10] sm:$0xf] }
  0xfd   : > { %v955_v20 = vld [vmem:[#allocation2 + $0x14] sm:$0x1]  ;;  %1973 = vmatprep.mubr.bf16.mxu0 %v4082_v16  ;;  %v4802_v14 = vld [vmem:[#allocation7 + $0x150] ss:$8 sps:$4 sm:$0xff]  }
  0xfe   : > { %v4059_v23 = vcombine.low %v5638_v19, %v955_v20  ;;  %1974 = vmatmul.mubr.bf16.vlgmr.msra.gmra.mrb[0].mxu0 %v4081_v17 }
  0xff   : > { %2015 = vmatpush1.bf16.msra.mxu0 %v4783_v12  ;;  %v862_v24 = vpop.permute.xlu1 %861  ;;  %v864_v25 = vpop.permute.xlu0 %863 }
 0x100   : > { %v1050_v26 = vshll.u32 %v4059_v23, 16  ;;  %v916_v27 = vsel %vm5616_vm8, %v862_v24, %v915_v21  ;;  %v919_v28 = vsel %vm5610_vm5, %v864_v25, %v918_v18  ;;  %2016 = vmatprep.subr.bf16.mxu0 %v4789_v13  ;;  %v948_v30 = vld [vmem:[#allocation2 + $0x18] sm:$0xf]  ;;  %v956_v31 = vld [vmem:[#allocation2 + $0x1c] sm:$0x1]  ;;  %v1048_v35 = vshrl.u32 %v4059_v23, 16 }
 0x101   : > { %917 = vst [vmem:[#allocation2 + $0x20] sm:$0xf] %v916_v27  ;;  %920 = vst [vmem:[#allocation2 + $0x24] sm:$0x1] %v919_v28  ;;  %v4060_v34 = vcombine.low %v948_v30, %v956_v31  ;;  %v4087_v54 = vcombine.low %v5638_v19, %v948_v30  ;;  %v4807_v19 = vld [vmem:[#allocation7 + $0x164] ss:$8 sps:$4 sm:$0xff]  }
 0x102   : > { %v1052_v37 = vrot.slane %v1050_v26, 1  ;;  %v627_v23 = vld [vmem:[#allocation2 + $0x4c] sm:$0x1]  ;;  %v4805_v25 = vld [vmem:[#allocation7 + $0x160] ss:$8 sps:$4 sm:$0xff]  }
 0x103   : > { %2017 = vmatpush1.bf16.msra.mxu0 %v4787_v22  ;;  %v866_v38 = vpop.permute.xlu1 %865  ;;  %v868_v40 = vpop.permute.xlu0 %867  ;;  %v1055_v42 = vshrl.u32 %v4060_v34, 16  ;;  %v1057_v43 = vshll.u32 %v4060_v34, 16  ;;  %v927_v58 = vld [vmem:[#allocation2 + $0x30] sm:$0xf]  ;;  %v933_v8 = vld [vmem:[#allocation2 + $0x38] sm:$0xf] }
 0x104   : > { %v922_v44 = vsel %vm5616_vm8, %v866_v38, %v921_v32  ;;  %v925_v45 = vsel %vm5610_vm5, %v868_v40, %v924_v33  ;;  %2018 = vmatprep.subr.bf16.mxu0 %v4792_v29  ;;  %v1053_v47 = vor.u32 %v1052_v37, %v1048_v35  ;;  %v4813_v30 = vld [vmem:[#allocation7 + $0x174] ss:$8 sps:$4 sm:$0xff]  }
 0x105   : > { %923 = vst [vmem:[#allocation2 + $0x28] sm:$0xf] %v922_v44  ;;  %926 = vst [vmem:[#allocation2 + $0x2c] sm:$0x1] %v925_v45  ;;  %v1059_v48 = vrot.slane %v1057_v43, 1 }
 0x106   : > { %v633_v35 = vld [vmem:[#allocation2 + $0x54] sm:$0x1] }
 0x107   : > { %2019 = vmatpush1.bf16.msra.mxu0 %v4790_v41  ;;  %v436_v49 = vpop.permute.xlu0 %435  ;;  %v434_v50 = vpop.permute.xlu1 %433  ;;  %v1060_v52 = vor.u32 %v1059_v48, %v1055_v42  ;;  %v4811_v41 = vld [vmem:[#allocation7 + $0x170] ss:$8 sps:$4 sm:$0xff]  }
 0x108   : > { %460 = vst.msk [vmem:[#allocation2 + $0x50] sm:$0xf] %vm458_vm4, %v436_v49  ;;  %459 = vst.msk [vmem:[#allocation2 + $0x48] sm:$0xf] %vm458_vm4, %v434_v50  ;;  %2020 = vmatprep.subr.bf16.mxu0 %v4795_v46  ;;  %v5652_v55 = vld [vmem:[#allocation2 + $0x20] sm:$0xf] }
 0x109   : > { %v957_v56 = vld [vmem:[#allocation2 + $0x24] sm:$0x1]  ;;  %v4088_v59 = vcombine.low %v1053_v47, %v1060_v52 }
 0x10a   : > { %v4061_v60 = vcombine.low %v5652_v55, %v957_v56  ;;  %v4816_v46 = vld [vmem:[#allocation7 + $0x184] ss:$8 sps:$4 sm:$0xff]  }
 0x10b   : > { %2021 = vmatpush1.bf16.msra.mxu0 %v4793_v51  ;;  %v872_v61 = vpop.permute.xlu0 %871  ;;  %v870_v62 = vpop.permute.xlu1 %869  ;;  %1983 = vmatprep.mubr.bf16.mxu0 %v4088_v59 }
 0x10c   : > { %v1064_v0 = vshll.u32 %v4061_v60, 16  ;;  %v931_v2 = vsel %vm5610_vm5, %v872_v61, %v930_v57  ;;  %v928_v3 = vsel %vm5616_vm8, %v870_v62, %v927_v58  ;;  %2022 = vmatprep.subr.bf16.mxu0 %v4798_v53  ;;  %1984 = vmatmul.mubr.bf16.gmra.mrb[4].mxu0 %v4087_v54  ;;  %v950_v5 = vld [vmem:[#allocation2 + $0x28] sm:$0xf]  ;;  %v958_v6 = vld [vmem:[#allocation2 + $0x2c] sm:$0x1]  ;;  %v1062_v10 = vshrl.u32 %v4061_v60, 16 }
 0x10d   : > { %932 = vst [vmem:[#allocation2 + $0x34] sm:$0x1] %v931_v2  ;;  %929 = vst [vmem:[#allocation2 + $0x30] sm:$0xf] %v928_v3  ;;  %v4062_v9 = vcombine.low %v950_v5, %v958_v6  ;;  %v4093_v38 = vcombine.low %v5652_v55, %v950_v5  ;;  %v4814_v53 = vld [vmem:[#allocation7 + $0x180] ss:$8 sps:$4 sm:$0xff]  }
 0x10e   : > { %v1066_v11 = vrot.slane %v1064_v0, 1  ;;  %v4819_v57 = vld [vmem:[#allocation7 + $0x194] ss:$8 sps:$4 sm:$0xff]   ;;  %v4817_v0 = vld [vmem:[#allocation7 + $0x190] ss:$8 sps:$4 sm:$0xff]  }
 0x10f   : > { %2023 = vmatpush1.bf16.msra.mxu0 %v4796_v63  ;;  %v876_v12 = vpop.permute.xlu0 %875  ;;  %v874_v13 = vpop.permute.xlu1 %873  ;;  %v1069_v15 = vshrl.u32 %v4062_v9, 16  ;;  %v1071_v16 = vshll.u32 %v4062_v9, 16  ;;  %v622_v20 = vld [vmem:[#allocation2 + $0x48] sm:$0xf]  ;;  %v630_v33 = vld [vmem:[#allocation2 + $0x50] sm:$0xf] }
 0x110   : > { %v937_v17 = vsel %vm5610_vm5, %v876_v12, %v936_v7  ;;  %v934_v18 = vsel %vm5616_vm8, %v874_v13, %v933_v8  ;;  %2024 = vmatprep.subr.bf16.mxu0 %v4804_v4  ;;  %v1067_v21 = vor.u32 %v1066_v11, %v1062_v10  ;;  %v4824_v5 = vld [vmem:[#allocation7 + $0x1a4] ss:$8 sps:$4 sm:$0xff]   ;;  %v639_v9 = vld [vmem:[#allocation2 + $0x5c] sm:$0x1] }
 0x111   : > { %938 = vst [vmem:[#allocation2 + $0x3c] sm:$0x1] %v937_v17  ;;  %935 = vst [vmem:[#allocation2 + $0x38] sm:$0xf] %v934_v18  ;;  %v1073_v22 = vrot.slane %v1071_v16, 1 }
 0x112   : > { %v4822_v16 = vld [vmem:[#allocation7 + $0x1a0] ss:$8 sps:$4 sm:$0xff]  }
 0x113   : > { %2025 = vmatpush1.bf16.msra.mxu0 %v4802_v14  ;;  %v572_v24 = vpop.permute.xlu1 %571  ;;  %v1074_v26 = vor.u32 %v1073_v22, %v1069_v15  ;;  %v574_v27 = vpop.permute.xlu0 %573  ;;  %v4827_v22 = vld [vmem:[#allocation7 + $0x1b4] ss:$8 sps:$4 sm:$0xff]  }
 0x114   : > { %v623_v28 = vsel %vm5616_vm8, %v572_v24, %v622_v20  ;;  %2026 = vmatprep.subr.bf16.mxu0 %v4807_v19  ;;  %v628_v29 = vsel %vm5610_vm5, %v574_v27, %v627_v23  ;;  %v5667_v31 = vld [vmem:[#allocation2 + $0x30] sm:$0xf]  ;;  %v959_v32 = vld [vmem:[#allocation2 + $0x34] sm:$0x1]  ;;  %v645_v24 = vld [vmem:[#allocation2 + $0x64] sm:$0x1] }
 0x115   : > { %624 = vst [vmem:[#allocation2 + $0x48] sm:$0xf] %v623_v28  ;;  %v4094_v34 = vcombine.low %v1067_v21, %v1074_v26  ;;  %629 = vst [vmem:[#allocation2 + $0x4c] sm:$0x1] %v628_v29  ;;  %v4063_v37 = vcombine.low %v5667_v31, %v959_v32  ;;  %v4825_v28 = vld [vmem:[#allocation7 + $0x1b0] ss:$8 sps:$4 sm:$0xff]  }
 0x117   : > { %2027 = vmatpush1.bf16.msra.mxu0 %v4805_v25  ;;  %v576_v40 = vpop.permute.xlu1 %575  ;;  %1993 = vmatprep.mubr.bf16.mxu0 %v4094_v34  ;;  %v578_v42 = vpop.permute.xlu0 %577  ;;  %v1078_v43 = vshll.u32 %v4063_v37, 16  ;;  %v1076_v50 = vshrl.u32 %v4063_v37, 16  ;;  %v4828_v37 = vld [vmem:[#allocation7 + $0x1c0] ss:$8 sps:$4 sm:$0xff]  }
 0x118   : > { %v631_v44 = vsel %vm5616_vm8, %v576_v40, %v630_v33  ;;  %1994 = vmatmul.mubr.bf16.gmra.mrb[8].mxu0 %v4093_v38  ;;  %2028 = vmatprep.subr.bf16.mxu0 %v4813_v30  ;;  %v634_v45 = vsel %vm5610_vm5, %v578_v42, %v633_v35  ;;  %v952_v47 = vld [vmem:[#allocation2 + $0x38] sm:$0xf]  ;;  %v960_v48 = vld [vmem:[#allocation2 + $0x3c] sm:$0x1]  ;;  %v4830_v33 = vld [vmem:[#allocation7 + $0x1c4] ss:$8 sps:$4 sm:$0xff]  }
 0x119   : > { %632 = vst [vmem:[#allocation2 + $0x50] sm:$0xf] %v631_v44  ;;  %635 = vst [vmem:[#allocation2 + $0x54] sm:$0x1] %v634_v45  ;;  %v4064_v49 = vcombine.low %v952_v47, %v960_v48  ;;  %v1080_v51 = vrot.slane %v1078_v43, 1  ;;  %v4099_v13 = vcombine.low %v5667_v31, %v952_v47 }
 0x11a   : > { %v4833_v40 = vld [vmem:[#allocation7 + $0x1d4] ss:$8 sps:$4 sm:$0xff]   ;;  %v651_v44 = vld [vmem:[#allocation2 + $0x6c] sm:$0x1]  ;;  %v4831_v47 = vld [vmem:[#allocation7 + $0x1d0] ss:$8 sps:$4 sm:$0xff]  }
 0x11b   : > { %2029 = vmatpush1.bf16.msra.mxu0 %v4811_v41  ;;  %v438_v52 = vpop.permute.xlu1 %437  ;;  %v440_v54 = vpop.permute.xlu0 %439  ;;  %v1083_v55 = vshrl.u32 %v4064_v49, 16  ;;  %v1085_v56 = vshll.u32 %v4064_v49, 16  ;;  %v1081_v60 = vor.u32 %v1080_v51, %v1076_v50 }
 0x11c   : > { %461 = vst.msk [vmem:[#allocation2 + $0x58] sm:$0xf] %vm458_vm4, %v438_v52  ;;  %2030 = vmatprep.subr.bf16.mxu0 %v4816_v46  ;;  %462 = vst.msk [vmem:[#allocation2 + $0x60] sm:$0xf] %vm458_vm4, %v440_v54  ;;  %v5677_v58 = vld [vmem:[#allocation2 + $0x48] sm:$0xf] }
 0x11d   : > { %v969_v59 = vld [vmem:[#allocation2 + $0x4c] sm:$0x1]  ;;  %v1087_v61 = vrot.slane %v1085_v56, 1  ;;  %v657_v56 = vld [vmem:[#allocation2 + $0x74] sm:$0x1] }
 0x11e   : > { %v4065_v62 = vcombine.low %v5677_v58, %v969_v59  ;;  %v4838_v52 = vld [vmem:[#allocation7 + $0x1e4] ss:$8 sps:$4 sm:$0xff]  }
 0x11f   : > { %2031 = vmatpush1.bf16.msra.mxu0 %v4814_v53  ;;  %v442_v63 = vpop.permute.xlu1 %441  ;;  %v1088_v2 = vor.u32 %v1087_v61, %v1083_v55  ;;  %v444_v3 = vpop.permute.xlu0 %443 }
 0x120   : > { %v1132_v4 = vshll.u32 %v4065_v62, 16  ;;  %463 = vst.msk [vmem:[#allocation2 + $0x68] sm:$0xf] %vm458_vm4, %v442_v63  ;;  %2032 = vmatprep.subr.bf16.mxu0 %v4819_v57  ;;  %464 = vst.msk [vmem:[#allocation2 + $0x70] sm:$0xf] %vm458_vm4, %v444_v3  ;;  %v1130_v11 = vshrl.u32 %v4065_v62, 16 }
 0x121   : > { %v5682_v6 = vld [vmem:[#allocation2 + $0x50] sm:$0xf]  ;;  %v970_v7 = vld [vmem:[#allocation2 + $0x54] sm:$0x1]  ;;  %v4100_v8 = vcombine.low %v1081_v60, %v1088_v2  ;;  %v4836_v60 = vld [vmem:[#allocation7 + $0x1e0] ss:$8 sps:$4 sm:$0xff]  }
 0x122   : > { %v4066_v10 = vcombine.low %v5682_v6, %v970_v7  ;;  %v1134_v12 = vrot.slane %v1132_v4, 1 }
 0x123   : > { %2033 = vmatpush1.bf16.msra.mxu0 %v4817_v0  ;;  %v580_v14 = vpop.permute.xlu1 %579  ;;  %v636_v15 = vld [vmem:[#allocation2 + $0x58] sm:$0xf]  ;;  %2003 = vmatprep.mubr.bf16.mxu0 %v4100_v8  ;;  %v582_v17 = vpop.permute.xlu0 %581  ;;  %v642_v23 = vld [vmem:[#allocation2 + $0x60] sm:$0xf]  ;;  %v663_v8 = vld [vmem:[#allocation2 + $0x7c] sm:$0x1] }
 0x124   : > { %v1137_v18 = vshrl.u32 %v4066_v10, 16  ;;  %v1139_v19 = vshll.u32 %v4066_v10, 16  ;;  %v637_v20 = vsel %vm5616_vm8, %v580_v14, %v636_v15  ;;  %2004 = vmatmul.mubr.bf16.gmra.mrb[12].mxu0 %v4099_v13  ;;  %2034 = vmatprep.subr.bf16.mxu0 %v4824_v5  ;;  %v640_v21 = vsel %vm5610_vm5, %v582_v17, %v639_v9  ;;  %v4841_v5 = vld [vmem:[#allocation7 + $0x1f4] ss:$8 sps:$4 sm:$0xff]   ;;  %v4845_v17 = vld [vmem:[#allocation7 + $0x204] ss:$8 sps:$4 sm:$0xff]  }
 0x125   : > { %638 = vst [vmem:[#allocation2 + $0x58] sm:$0xf] %v637_v20  ;;  %641 = vst [vmem:[#allocation2 + $0x5c] sm:$0x1] %v640_v21  ;;  %v1135_v25 = vor.u32 %v1134_v12, %v1130_v11  ;;  %v4839_v11 = vld [vmem:[#allocation7 + $0x1f0] ss:$8 sps:$4 sm:$0xff]  }
 0x126   : > { %v1141_v26 = vrot.slane %v1139_v19, 1  ;;  %v669_v21 = vld [vmem:[#allocation2 + $0x84] sm:$0x1] }
 0x127   : > { %2035 = vmatpush1.bf16.msra.mxu0 %v4822_v16  ;;  %v584_v27 = vpop.permute.xlu1 %583  ;;  %v586_v29 = vpop.permute.xlu0 %585  ;;  %v648_v43 = vld [vmem:[#allocation2 + $0x68] sm:$0xf]  ;;  %v654_v55 = vld [vmem:[#allocation2 + $0x70] sm:$0xf] }
 0x128   : > { %v1142_v30 = vor.u32 %v1141_v26, %v1137_v18  ;;  %v643_v31 = vsel %vm5616_vm8, %v584_v27, %v642_v23  ;;  %2036 = vmatprep.subr.bf16.mxu0 %v4827_v22  ;;  %v646_v32 = vsel %vm5610_vm5, %v586_v29, %v645_v24  ;;  %v4843_v24 = vld [vmem:[#allocation7 + $0x200] ss:$8 sps:$4 sm:$0xff]   ;;  %v4083_v29 = vcombine.low %v5677_v58, %v5682_v6  ;;  %v4854_v58 = vld [vmem:[#allocation7 + $0x224] ss:$8 sps:$4 sm:$0xff]  }
 0x129   : > { %644 = vst [vmem:[#allocation2 + $0x60] sm:$0xf] %v643_v31  ;;  %647 = vst [vmem:[#allocation2 + $0x64] sm:$0x1] %v646_v32  ;;  %v4848_v31 = vld [vmem:[#allocation7 + $0x214] ss:$8 sps:$4 sm:$0xff]  }
 0x12a   : > { %v4084_v34 = vcombine.low %v1135_v25, %v1142_v30 }
 0x12b   : > { %2037 = vmatpush1.bf16.msra.mxu0 %v4825_v28  ;;  %v446_v35 = vpop.permute.xlu1 %445  ;;  %v448_v38 = vpop.permute.xlu0 %447 }
 0x12c   : > { %2046 = vmatprep.mubr.bf16.mxu0 %v4084_v34  ;;  %465 = vst.msk [vmem:[#allocation2 + $0x78] sm:$0xf] %vm458_vm4, %v446_v35  ;;  %2038 = vmatprep.subr.bf16.mxu0 %v4830_v33  ;;  %466 = vst.msk [vmem:[#allocation2 + $0x80] sm:$0xf] %vm458_vm4, %v448_v38  ;;  %v5696_v41 = vld [vmem:[#allocation2 + $0x58] sm:$0xf] }
 0x12d   : > { %v971_v42 = vld [vmem:[#allocation2 + $0x5c] sm:$0x1] }
 0x12e   : > { %v4067_v45 = vcombine.low %v5696_v41, %v971_v42 }
 0x12f   : > { %2039 = vmatpush1.bf16.msra.mxu0 %v4828_v37  ;;  %v588_v46 = vpop.permute.xlu1 %587  ;;  %v590_v48 = vpop.permute.xlu0 %589 }
 0x130   : > { %v1146_v49 = vshll.u32 %v4067_v45, 16  ;;  %v649_v50 = vsel %vm5616_vm8, %v588_v46, %v648_v43  ;;  %2040 = vmatprep.subr.bf16.mxu0 %v4833_v40  ;;  %v652_v51 = vsel %vm5610_vm5, %v590_v48, %v651_v44  ;;  %v5703_v53 = vld [vmem:[#allocation2 + $0x60] sm:$0xf]  ;;  %v972_v54 = vld [vmem:[#allocation2 + $0x64] sm:$0x1]  ;;  %v1144_v62 = vshrl.u32 %v4067_v45, 16 }
 0x131   : > { %650 = vst [vmem:[#allocation2 + $0x68] sm:$0xf] %v649_v50  ;;  %653 = vst [vmem:[#allocation2 + $0x6c] sm:$0x1] %v652_v51  ;;  %v4068_v57 = vcombine.low %v5703_v53, %v972_v54  ;;  %v4846_v40 = vld [vmem:[#allocation7 + $0x210] ss:$8 sps:$4 sm:$0xff]   ;;  %v4089_v51 = vcombine.low %v5696_v41, %v5703_v53 }
 0x132   : > { %v1148_v63 = vrot.slane %v1146_v49, 1  ;;  %v942_v43 = vld [vmem:[#allocation2 + $0x44] sm:$0x1]  ;;  %v5730_v49 = vld [vmem:[#allocation2 + $0x10] sm:$0xf] }
 0x133   : > { %2041 = vmatpush1.bf16.msra.mxu0 %v4831_v47  ;;  %v592_v59 = vpop.permute.xlu1 %591  ;;  %v594_v61 = vpop.permute.xlu0 %593  ;;  %v1151_v0 = vshrl.u32 %v4068_v57, 16  ;;  %v1153_v2 = vshll.u32 %v4068_v57, 16  ;;  %v660_v7 = vld [vmem:[#allocation2 + $0x78] sm:$0xf]  ;;  %v666_v20 = vld [vmem:[#allocation2 + $0x80] sm:$0xf] }
 0x134   : > { %v655_v3 = vsel %vm5616_vm8, %v592_v59, %v654_v55  ;;  %2042 = vmatprep.subr.bf16.mxu0 %v4838_v52  ;;  %v658_v4 = vsel %vm5610_vm5, %v594_v61, %v657_v56  ;;  %v1149_v13 = vor.u32 %v1148_v63, %v1144_v62  ;;  %v986_v50 = vld [vmem:[#allocation2 + $0x14] sm:$0x1]  ;;  %v4852_v52 = vld [vmem:[#allocation7 + $0x220] ss:$8 sps:$4 sm:$0xff]   ;;  %v985_v59 = vld [vmem:[#allocation2 + $0xc] sm:$0x1] }
 0x135   : > { %656 = vst [vmem:[#allocation2 + $0x70] sm:$0xf] %v655_v3  ;;  %659 = vst [vmem:[#allocation2 + $0x74] sm:$0x1] %v658_v4  ;;  %v1155_v9 = vrot.slane %v1153_v2, 1 }
 0x136   : > { %v4857_v55 = vld [vmem:[#allocation7 + $0x234] ss:$8 sps:$4 sm:$0xff]   ;;  %v5736_v63 = vld [vmem:[#allocation2 + $0x8] sm:$0xf] }
 0x137   : > { %2043 = vmatpush1.bf16.msra.mxu0 %v4836_v60  ;;  %v596_v10 = vpop.permute.xlu1 %595  ;;  %v598_v12 = vpop.permute.xlu0 %597  ;;  %v1156_v14 = vor.u32 %v1155_v9, %v1151_v0  ;;  %v4074_v0 = vcombine.low %v5730_v49, %v986_v50  ;;  %v4073_v9 = vcombine.low %v5736_v63, %v985_v59  ;;  %v990_v59 = vld [vmem:[#allocation2 + $0x34] sm:$0x1] }
 0x138   : > { %v661_v15 = vsel %vm5616_vm8, %v596_v10, %v660_v7  ;;  %2044 = vmatprep.subr.bf16.mxu0 %v4841_v5  ;;  %v664_v16 = vsel %vm5610_vm5, %v598_v12, %v663_v8  ;;  %v5714_v18 = vld [vmem:[#allocation2 + $0x68] sm:$0xf]  ;;  %v973_v19 = vld [vmem:[#allocation2 + $0x6c] sm:$0x1]  ;;  %v4855_v7 = vld [vmem:[#allocation7 + $0x230] ss:$8 sps:$4 sm:$0xff]  }
 0x139   : > { %662 = vst [vmem:[#allocation2 + $0x78] sm:$0xf] %v661_v15  ;;  %665 = vst [vmem:[#allocation2 + $0x7c] sm:$0x1] %v664_v16  ;;  %v4069_v22 = vcombine.low %v5714_v18, %v973_v19  ;;  %v4090_v26 = vcombine.low %v1149_v13, %v1156_v14  ;;  %v1235_v14 = vshll.u32 %v4074_v0, 16  ;;  %v1228_v19 = vshll.u32 %v4073_v9, 16 }
 0x13a   : > { %v4861_v16 = vld [vmem:[#allocation7 + $0x240] ss:$8 sps:$4 sm:$0xff]  }
 0x13b   : > { %2045 = vmatpush1.bf16.msra.mxu0 %v4839_v11  ;;  %v600_v23 = vpop.permute.xlu1 %599  ;;  %v602_v25 = vpop.permute.xlu0 %601  ;;  %v1160_v27 = vshll.u32 %v4069_v22, 16  ;;  %v1158_v35 = vshrl.u32 %v4069_v22, 16  ;;  %v4863_v11 = vld [vmem:[#allocation7 + $0x244] ss:$8 sps:$4 sm:$0xff]   ;;  %v1233_v22 = vshrl.u32 %v4074_v0, 16 }
 0x13c   : > { %v667_v28 = vsel %vm5616_vm8, %v600_v23, %v666_v20  ;;  %2087 = vmatprep.subr.bf16.mxu0 %v4845_v17  ;;  %v670_v30 = vsel %vm5610_vm5, %v602_v25, %v669_v21  ;;  %v5723_v32 = vld [vmem:[#allocation2 + $0x70] sm:$0xf]  ;;  %v974_v33 = vld [vmem:[#allocation2 + $0x74] sm:$0x1]  ;;  %v1237_v23 = vrot.slane %v1235_v14, 1 }
 0x13d   : > { %668 = vst [vmem:[#allocation2 + $0x80] sm:$0xf] %v667_v28  ;;  %671 = vst [vmem:[#allocation2 + $0x84] sm:$0x1] %v670_v30  ;;  %v4070_v34 = vcombine.low %v5723_v32, %v974_v33  ;;  %v1162_v37 = vrot.slane %v1160_v27, 1  ;;  %v4095_v15 = vcombine.low %v5714_v18, %v5723_v32 }
 0x13e   : > { %2047 = vmatmul.mubr.bf16.vlgmr.msra.gmra.mrb[0].mxu0 %v4083_v29  ;;  %v4866_v20 = vld [vmem:[#allocation7 + $0x254] ss:$8 sps:$4 sm:$0xff]   ;;  %v4872_v25 = vld [vmem:[#allocation7 + $0x264] ss:$8 sps:$4 sm:$0xff]   ;;  %v1238_v27 = vor.u32 %v1237_v23, %v1233_v22  ;;  %v4870_v28 = vld [vmem:[#allocation7 + $0x260] ss:$8 sps:$4 sm:$0xff]  }
 0x13f   : > { %2088 = vmatpush1.bf16.msra.mxu0 %v4843_v24  ;;  %v727_v38 = vpop.permute.xlu1 %726  ;;  %2056 = vmatprep.mubr.bf16.mxu0 %v4090_v26  ;;  %v1165_v6 = vshrl.u32 %v4070_v34, 16  ;;  %v1167_v42 = vshll.u32 %v4070_v34, 16  ;;  %v1163_v46 = vor.u32 %v1162_v37, %v1158_v35  ;;  %v878_v2 = vpop.permute.xlu0 %877  ;;  %v1230_v24 = vrot.slane %v1228_v19, 1  ;;  %v4877_v30 = vld [vmem:[#allocation7 + $0x274] ss:$8 sps:$4 sm:$0xff]  }
 0x140   : > { %744 = vst.msk [vmem:[#allocation2 + $0x40] sm:$0xf] %vm458_vm4, %v727_v38  ;;  %2089 = vmatprep.subr.bf16.mxu0 %v4848_v31  ;;  %v5727_v44 = vld [vmem:[#allocation2 + $0x78] sm:$0xf]  ;;  %v975_v45 = vld [vmem:[#allocation2 + $0x7c] sm:$0x1] }
 0x141   : > { %v1169_v47 = vrot.slane %v1167_v42, 1  ;;  %v4071_v48 = vcombine.low %v5727_v44, %v975_v45  ;;  %v1226_v26 = vshrl.u32 %v4073_v9, 16  ;;  %v4875_v32 = vld [vmem:[#allocation7 + $0x270] ss:$8 sps:$4 sm:$0xff]   ;;  %v4880_v33 = vld [vmem:[#allocation7 + $0x284] ss:$8 sps:$4 sm:$0xff]  }
 0x142   : > { %v4878_v34 = vld [vmem:[#allocation7 + $0x280] ss:$8 sps:$4 sm:$0xff]   ;;  %v4883_v35 = vld [vmem:[#allocation7 + $0x294] ss:$8 sps:$4 sm:$0xff]   ;;  %v4881_v37 = vld [vmem:[#allocation7 + $0x290] ss:$8 sps:$4 sm:$0xff]  }
 0x143   : > { %2090 = vmatpush1.bf16.msra.mxu0 %v4846_v40  ;;  %v880_v54 = vpop.permute.xlu1 %879  ;;  %v1170_v56 = vor.u32 %v1169_v47, %v1165_v6  ;;  %v1174_v57 = vshll.u32 %v4071_v48, 16  ;;  %v1172_v3 = vshrl.u32 %v4071_v48, 16  ;;  %v1231_v29 = vor.u32 %v1230_v24, %v1226_v26  ;;  %v4886_v38 = vld [vmem:[#allocation7 + $0x2a4] ss:$8 sps:$4 sm:$0xff]   ;;  %v4884_v40 = vld [vmem:[#allocation7 + $0x2a0] ss:$8 sps:$4 sm:$0xff]  }
 0x144   : > { %2091 = vmatprep.subr.bf16.mxu0 %v4854_v58  ;;  %v943_v60 = vsel %vm5610_vm5, %v880_v54, %v942_v43  ;;  %v968_v61 = vld [vmem:[#allocation2 + $0x80] sm:$0xf]  ;;  %v976_v62 = vld [vmem:[#allocation2 + $0x84] sm:$0x1]  ;;  %v4889_v58 = vld [vmem:[#allocation7 + $0x2b4] ss:$8 sps:$4 sm:$0xff]  }
 0x145   : > { %944 = vst [vmem:[#allocation2 + $0x44] sm:$0x1] %v943_v60  ;;  %v4096_v41 = vcombine.low %v1163_v46, %v1170_v56  ;;  %v4072_v53 = vcombine.low %v968_v61, %v976_v62  ;;  %v1176_v4 = vrot.slane %v1174_v57, 1  ;;  %v4101_v18 = vcombine.low %v5727_v44, %v968_v61  ;;  %v4887_v6 = vld [vmem:[#allocation7 + $0x2b0] ss:$8 sps:$4 sm:$0xff]  }
 0x146   : > { %2057 = vmatmul.mubr.bf16.gmra.mrb[4].mxu0 %v4089_v51  ;;  %v4086_v31 = vcombine.low %v1231_v29, %v1238_v27  ;;  %v4892_v42 = vld [vmem:[#allocation7 + $0x2c4] ss:$8 sps:$4 sm:$0xff]   ;;  %v979_v43 = vld [vmem:[#allocation2 + $0x18] sm:$0xf]  ;;  %v980_v44 = vld [vmem:[#allocation2 + $0x20] sm:$0xf] }
 0x147   : > { %2092 = vmatpush1.bf16.msra.mxu0 %v4852_v52  ;;  %v939_v5 = vld [vmem:[#allocation2 + $0x40] sm:$0xf]  ;;  %2066 = vmatprep.mubr.bf16.mxu0 %v4096_v41  ;;  %v1179_v8 = vshrl.u32 %v4072_v53, 16  ;;  %v1181_v36 = vshll.u32 %v4072_v53, 16  ;;  %v1177_v12 = vor.u32 %v1176_v4, %v1172_v3  ;;  %v987_v45 = vld [vmem:[#allocation2 + $0x1c] sm:$0x1]  ;;  %v4091_v27 = vcombine.low %v979_v43, %v980_v44 }
 0x148   : > { %v940_v10 = vsel %vm5616_vm8, %v878_v2, %v939_v5  ;;  %2093 = vmatprep.subr.bf16.mxu0 %v4857_v55  ;;  %v988_v46 = vld [vmem:[#allocation2 + $0x24] sm:$0x1]  ;;  %v4890_v47 = vld [vmem:[#allocation7 + $0x2c0] ss:$8 sps:$4 sm:$0xff]   ;;  %v4895_v48 = vld [vmem:[#allocation7 + $0x2d4] ss:$8 sps:$4 sm:$0xff]   ;;  %v4075_v50 = vcombine.low %v979_v43, %v987_v45 }
 0x149   : > { %941 = vst [vmem:[#allocation2 + $0x40] sm:$0xf] %v940_v10  ;;  %v1183_v13 = vrot.slane %v1181_v36, 1  ;;  %v4076_v51 = vcombine.low %v980_v44, %v988_v46  ;;  %v4893_v52 = vld [vmem:[#allocation7 + $0x2d0] ss:$8 sps:$4 sm:$0xff]   ;;  %v4914_v43 = vld [vmem:[#allocation9 + $0x48] sm:$0xff]  }
 0x14a   : > { %v4898_v54 = vld [vmem:[#allocation7 + $0x2e4] ss:$8 sps:$4 sm:$0xff]   ;;  %v1242_v55 = vshll.u32 %v4075_v50, 16  ;;  %v982_v57 = vld [vmem:[#allocation2 + $0x30] sm:$0xf]  ;;  %v1240_v62 = vshrl.u32 %v4075_v50, 16 }
 0x14b   : > { %2094 = vmatpush1.bf16.msra.mxu0 %v4855_v7  ;;  %v1184_v17 = vor.u32 %v1183_v13, %v1179_v8  ;;  %v1249_v56 = vshll.u32 %v4076_v51, 16  ;;  %v4896_v60 = vld [vmem:[#allocation7 + $0x2e0] ss:$8 sps:$4 sm:$0xff]   ;;  %v4901_v61 = vld [vmem:[#allocation7 + $0x2f4] ss:$8 sps:$4 sm:$0xff]   ;;  %v1247_v53 = vshrl.u32 %v4076_v51, 16  ;;  %v4078_v4 = vcombine.low %v982_v57, %v990_v59 }
 0x14c   : > { %2095 = vmatprep.subr.bf16.mxu0 %v4863_v11  ;;  %v981_v0 = vld [vmem:[#allocation2 + $0x28] sm:$0xf]  ;;  %v989_v2 = vld [vmem:[#allocation2 + $0x2c] sm:$0x1]  ;;  %v1244_v41 = vrot.slane %v1242_v55, 1  ;;  %v4085_v13 = vcombine.low %v5736_v63, %v5730_v49  ;;  %v4916_v50 = vld [vmem:[#allocation9 + $0x50] sm:$0xff]  }
 0x14d   : > { %v4102_v21 = vcombine.low %v1177_v12, %v1184_v17  ;;  %v1251_v3 = vrot.slane %v1249_v56, 1  ;;  %v4899_v5 = vld [vmem:[#allocation7 + $0x2f0] ss:$8 sps:$4 sm:$0xff]   ;;  %v4077_v7 = vcombine.low %v981_v0, %v989_v2  ;;  %v1263_v9 = vshll.u32 %v4078_v4, 16  ;;  %v992_v11 = vld [vmem:[#allocation2 + $0x44] sm:$0x1] }
 0x14e   : > { %2067 = vmatmul.mubr.bf16.gmra.mrb[8].mxu0 %v4095_v15  ;;  %v1245_v8 = vor.u32 %v1244_v41, %v1240_v62  ;;  %v983_v14 = vld [vmem:[#allocation2 + $0x38] sm:$0xf]  ;;  %v991_v15 = vld [vmem:[#allocation2 + $0x3c] sm:$0x1]  ;;  %v1261_v17 = vshrl.u32 %v4078_v4, 16  ;;  %v4915_v44 = vld [vmem:[#allocation9 + $0x8] sm:$0xff]  }
 0x14f   : > { %2096 = vmatpush1.bf16.msra.mxu0 %v4861_v16  ;;  %2076 = vmatprep.mubr.bf16.mxu0 %v4102_v21  ;;  %v1252_v36 = vor.u32 %v1251_v3, %v1247_v53  ;;  %v1256_v12 = vshll.u32 %v4077_v7, 16  ;;  %v1265_v19 = vrot.slane %v1263_v9, 1  ;;  %v1254_v21 = vshrl.u32 %v4077_v7, 16  ;;  %v2179_v45 = vld [vmem:[#allocation3 + $0x10] sm:$0x1]  ;;  %v4917_v51 = vld [vmem:[#allocation9 + $0x10] sm:$0xff]  }
 0x150   : > { %2097 = vmatprep.subr.bf16.mxu0 %v4866_v20  ;;  %v984_v10 = vld [vmem:[#allocation2 + $0x40] sm:$0xf]  ;;  %v4079_v23 = vcombine.low %v983_v14, %v991_v15  ;;  %v2210_v46 = vld [vmem:[#allocation3 + $0x14] sm:$0x1]  ;;  %v4919_v59 = vld [vmem:[#allocation9 + $0x18] sm:$0xff]  }
 0x151   : > { %v4092_v16 = vcombine.low %v1245_v8, %v1252_v36  ;;  %v4080_v20 = vcombine.low %v984_v10, %v992_v11  ;;  %v1258_v22 = vrot.slane %v1256_v12, 1  ;;  %v2204_v41 = vld [vmem:[#allocation3 + $0x4] sm:$0x1]  ;;  %v4920_v3 = vld [vmem:[#allocation9 + $0x60] sm:$0xff]   ;;  %v2188_v7 = vld [vmem:[#allocation3 + $0x28] sm:$0x1] }
 0x152   : > { %v1270_v26 = vshll.u32 %v4079_v23, 16  ;;  %v1268_v49 = vshrl.u32 %v4079_v23, 16  ;;  %v2205_v4 = vsel %vm5749_vm9, 0, %v2204_v41  ;;  %v2219_v8 = vld [vmem:[#allocation3 + $0x2c] sm:$0x1]  ;;  %v2189_v36 = vsel %vm5435_vm2, 0, %v2188_v7 }
 0x153   : > { %2098 = vmatpush1.bf16.msra.mxu0 %v4864_v39  ;;  %v1266_v39 = vor.u32 %v1265_v19, %v1261_v17  ;;  %v1277_v24 = vshll.u32 %v4080_v20, 16  ;;  %2206 = vst [vmem:[#allocation3 + $0x4] sm:$0x1] %v2205_v4  ;;  %v2220_v9 = vsel %vm5749_vm9, 0, %v2219_v8  ;;  %v4923_v11 = vld [vmem:[#allocation9 + $0x28] sm:$0xff]   ;;  %v4925_v17 = vld [vmem:[#allocation9 + $0x30] sm:$0xff]  }
 0x154   : > { %2099 = vmatprep.subr.bf16.mxu0 %v4872_v25  ;;  %v1259_v25 = vor.u32 %v1258_v22, %v1254_v21  ;;  %v1272_v63 = vrot.slane %v1270_v26, 1  ;;  %2190 = vst [vmem:[#allocation3 + $0x28] sm:$0x1] %v2189_v36  ;;  %2221 = vst [vmem:[#allocation3 + $0x2c] sm:$0x1] %v2220_v9  ;;  %v4926_v21 = vld [vmem:[#allocation9 + $0x78] sm:$0xff]  }
 0x155   : > { %v1279_v29 = vrot.slane %v1277_v24, 1  ;;  %v2191_v12 = vld [vmem:[#allocation3 + $0x30] sm:$0x1]  ;;  %v2194_v19 = vld [vmem:[#allocation3 + $0x38] sm:$0x1] }
 0x156   : > { %2077 = vmatmul.mubr.bf16.gmra.mrb[12].mxu0 %v4101_v18  ;;  %v4098_v18 = vcombine.low %v1259_v25, %v1266_v39  ;;  %v2195_v22 = vsel %vm5435_vm2, 0, %v2194_v19  ;;  %v2197_v39 = vld [vmem:[#allocation3 + $0x40] sm:$0x1]  ;;  %v2228_v24 = vld [vmem:[#allocation3 + $0x44] sm:$0x1]  ;;  %v4927_v25 = vld [vmem:[#allocation9 + $0x38] sm:$0xff]  }
 0x157   : > { %2100 = vmatpush1.bf16.msra.mxu0 %v4870_v28  ;;  %2119 = vmatprep.mubr.bf16.mxu0 %v4086_v31  ;;  %v1275_v28 = vshrl.u32 %v4080_v20, 16  ;;  %v1273_v31 = vor.u32 %v1272_v63, %v1268_v49  ;;  %v2225_v20 = vld [vmem:[#allocation3 + $0x3c] sm:$0x1]  ;;  %2196 = vst [vmem:[#allocation3 + $0x38] sm:$0x1] %v2195_v22  ;;  %v2198_v26 = vsel %vm5435_vm2, 0, %v2197_v39 }
 0x158   : > { %2101 = vmatprep.subr.bf16.mxu0 %v4877_v30  ;;  %v2226_v23 = vsel %vm5749_vm9, 0, %v2225_v20  ;;  %2199 = vst [vmem:[#allocation3 + $0x40] sm:$0x1] %v2198_v26 }
 0x159   : > { %v1280_v30 = vor.u32 %v1279_v29, %v1275_v28  ;;  %2227 = vst [vmem:[#allocation3 + $0x3c] sm:$0x1] %v2226_v23  ;;  %v2200_v28 = vld [vmem:[#allocation3 + $0x48] sm:$0x1]  ;;  %v2231_v29 = vld [vmem:[#allocation3 + $0x4c] sm:$0x1] }
 0x15a   : > { %v2201_v49 = vsel %vm5435_vm2, 0, %v2200_v28  ;;  %v2232_v63 = vsel %vm5749_vm9, 0, %v2231_v29  ;;  %v5820_v7 = vld [vmem:[#allocation3 + $0x4] sm:$0x1] }
 0x15b   : > { %2102 = vmatpush1.bf16.msra.mxu0 %v4875_v32  ;;  %v4097_v32 = vcombine.low %v981_v0, %v982_v57  ;;  %v4918_v57 = vld [vmem:[#allocation9 + $0x58] sm:$0xff]   ;;  %v2216_v0 = vld [vmem:[#allocation3 + $0x24] sm:$0x1]  ;;  %2202 = vst [vmem:[#allocation3 + $0x48] sm:$0x1] %v2201_v49 }
 0x15c   : > { %2103 = vmatprep.subr.bf16.mxu0 %v4880_v33  ;;  %v4104_v33 = vcombine.low %v1273_v31, %v1280_v30  ;;  %v2217_v53 = vsel %vm5749_vm9, 0, %v2216_v0  ;;  %2233 = vst [vmem:[#allocation3 + $0x4c] sm:$0x1] %v2232_v63  ;;  %v1403_v30 = vlaneseq }
 0x15d   : > { %2218 = vst [vmem:[#allocation3 + $0x24] sm:$0x1] %v2217_v53 }
 0x15e   : > { %v5793_v31 = vshrl.u32 %v1403_v30, 7 }
 0x15f   : > { %2104 = vmatpush1.bf16.msra.mxu0 %v4878_v34  ;;  %v4103_v34 = vcombine.low %v983_v14, %v984_v10  ;;  %v4922_v10 = vld [vmem:[#allocation9 + $0x68] sm:$0xff]   ;;  %v2192_v14 = vsel %vm5435_vm2, 0, %v2191_v12 }
 0x160   : > { %2105 = vmatprep.subr.bf16.mxu0 %v4883_v35  ;;  %v4912_v35 = vld [vmem:[#allocation9 + $0x40] sm:$0xff]   ;;  %2193 = vst [vmem:[#allocation3 + $0x30] sm:$0x1] %v2192_v14 }
 0x161   : > { %4413 = vmatprep.subr.bf16.mxu1 %v4912_v35 }
 0x163   : > { %2106 = vmatpush1.bf16.msra.mxu0 %v4881_v37  ;;  %v4913_v37 = vld [vmem:[#allocation9] sm:$0xff]  }
 0x164   : > { %2107 = vmatprep.subr.bf16.mxu0 %v4886_v38  ;;  %4414 = vmatpush3.bf16.msra.mxu1 %v4913_v37  ;;  %v2176_v38 = vld [vmem:[#allocation3 + $0x8] sm:$0x1] }
 0x165   : > { %4415 = vmatprep.subr.bf16.mxu1 %v4914_v43 }
 0x167   : > { %2108 = vmatpush1.bf16.msra.mxu0 %v4884_v40 }
 0x168   : > { %2109 = vmatprep.subr.bf16.mxu0 %v4889_v58  ;;  %v2207_v58 = vld [vmem:[#allocation3 + $0xc] sm:$0x1]  ;;  %4416 = vmatpush3.bf16.msra.mxu1 %v4915_v44 }
 0x169   : > { %4417 = vmatprep.subr.bf16.mxu1 %v4916_v50 }
 0x16b   : > { %2110 = vmatpush1.bf16.msra.mxu0 %v4887_v6  ;;  %v2177_v6 = vsel %vm5435_vm2, 0, %v2176_v38 }
 0x16c   : > { %2111 = vmatprep.subr.bf16.mxu0 %v4892_v42  ;;  %v2208_v42 = vsel %vm5749_vm9, 0, %v2207_v58  ;;  %2178 = vst [vmem:[#allocation3 + $0x8] sm:$0x1] %v2177_v6  ;;  %4418 = vmatpush3.bf16.msra.mxu1 %v4917_v51 }
 0x16d   : > { %2209 = vst [vmem:[#allocation3 + $0xc] sm:$0x1] %v2208_v42  ;;  %4419 = vmatprep.subr.bf16.mxu1 %v4918_v57 }
 0x16f   : > { %2112 = vmatpush1.bf16.msra.mxu0 %v4890_v47  ;;  %v2180_v47 = vsel %vm5435_vm2, 0, %v2179_v45 }
 0x170   : > { %2113 = vmatprep.subr.bf16.mxu0 %v4895_v48  ;;  %v2211_v48 = vsel %vm5749_vm9, 0, %v2210_v46  ;;  %2181 = vst [vmem:[#allocation3 + $0x10] sm:$0x1] %v2180_v47  ;;  %4420 = vmatpush3.bf16.msra.mxu1 %v4919_v59 }
 0x171   : > { %2212 = vst [vmem:[#allocation3 + $0x14] sm:$0x1] %v2211_v48  ;;  %4421 = vmatprep.subr.bf16.mxu1 %v4920_v3 }
 0x173   : > { %2114 = vmatpush1.bf16.msra.mxu0 %v4893_v52  ;;  %v2182_v52 = vld [vmem:[#allocation3 + $0x18] sm:$0x1] }
 0x174   : > { %2115 = vmatprep.subr.bf16.mxu0 %v4898_v54  ;;  %v2213_v54 = vld [vmem:[#allocation3 + $0x1c] sm:$0x1]  ;;  %v2183_v55 = vsel %vm5435_vm2, 0, %v2182_v52  ;;  %v2352_v57 = vld [vmem:[#allocation3 + $0xc] sm:$0x1] }
 0x175   : > { %v2214_v56 = vsel %vm5749_vm9, 0, %v2213_v54  ;;  %2184 = vst [vmem:[#allocation3 + $0x18] sm:$0x1] %v2183_v55 }
 0x176   : > { %2215 = vst [vmem:[#allocation3 + $0x1c] sm:$0x1] %v2214_v56  ;;  %v2349_v56 = vld [vmem:[#allocation3 + $0x8] sm:$0xf] }
 0x177   : > { %2116 = vmatpush1.bf16.msra.mxu0 %v4896_v60  ;;  %v2173_v60 = vld [vmem:[#allocation3] sm:$0x1] }
 0x178   : > { %2117 = vmatprep.subr.bf16.mxu0 %v4901_v61  ;;  %v2185_v61 = vld [vmem:[#allocation3 + $0x20] sm:$0x1]  ;;  %v2174_v2 = vsel %vm5435_vm2, 0, %v2173_v60  ;;  %v2358_v3 = vld [vmem:[#allocation3 + $0x14] sm:$0x1] }
 0x179   : > { %v2186_v62 = vsel %vm5435_vm2, 0, %v2185_v61  ;;  %2175 = vst [vmem:[#allocation3] sm:$0x1] %v2174_v2  ;;  %v2355_v2 = vld [vmem:[#allocation3 + $0x10] sm:$0xf] }
 0x17a   : > { %2187 = vst [vmem:[#allocation3 + $0x20] sm:$0x1] %v2186_v62 }
 0x17b   : > { %2118 = vmatpush1.bf16.msra.mxu0 %v4899_v5  ;;  %v4921_v5 = vld [vmem:[#allocation9 + $0x20] sm:$0xff]  }
 0x17c   : > { %4422 = vmatpush3.bf16.msra.mxu1 %v4921_v5  ;;  %v2361_v20 = vld [vmem:[#allocation3 + $0x18] sm:$0xf] }
 0x17d   : > { %4423 = vmatprep.subr.bf16.mxu1 %v4922_v10 }
 0x17e   : > { %2120 = vmatmul.mubr.bf16.vlgmr.msra.gmra.mrb[0].mxu0 %v4085_v13  ;;  %v2222_v13 = vld [vmem:[#allocation3 + $0x34] sm:$0x1] }
 0x17f   : > { %2129 = vmatprep.mubr.bf16.mxu0 %v4092_v16  ;;  %v2223_v15 = vsel %vm5749_vm9, 0, %v2222_v13  ;;  %v4924_v16 = vld [vmem:[#allocation9 + $0x70] sm:$0xff]  }
 0x180   : > { %2224 = vst [vmem:[#allocation3 + $0x34] sm:$0x1] %v2223_v15  ;;  %4424 = vmatpush3.bf16.msra.mxu1 %v4923_v11  ;;  %v5818_v5 = vld [vmem:[#allocation3] sm:$0xf] }
 0x181   : > { %4425 = vmatprep.subr.bf16.mxu1 %v4924_v16  ;;  %v5832_v15 = vcombine.low %v5818_v5, %v5820_v7 }
 0x183   : > { %v2513_v49 = vshll.u32 %v5832_v15, 16 }
 0x184   : > { %4426 = vmatpush3.bf16.msra.mxu1 %v4925_v17 }
 0x185   : > { %4427 = vmatprep.subr.bf16.mxu1 %v4926_v21 }
 0x186   : > { %2130 = vmatmul.mubr.bf16.gmra.mrb[4].mxu0 %v4091_v27  ;;  %v2229_v27 = vsel %vm5749_vm9, 0, %v2228_v24  ;;  %v2364_v24 = vld [vmem:[#allocation3 + $0x1c] sm:$0x1] }
 0x187   : > { %2139 = vmatprep.mubr.bf16.mxu0 %v4098_v18  ;;  %2230 = vst [vmem:[#allocation3 + $0x44] sm:$0x1] %v2229_v27  ;;  %v4932_v18 = vld [vmem:[#allocation9 + $0xc0] sm:$0xff]   ;;  %v2367_v27 = vld [vmem:[#allocation3 + $0x20] sm:$0xf] }
 0x188   : > { %4428 = vmatpush3.bf16.msra.mxu1 %v4927_v25 }
 0x189   : > { %4453 = vmatprep.subr.bf16.mxu1 %v4932_v18 }
 0x18e   : > { %2140 = vmatmul.mubr.bf16.gmra.mrb[8].mxu0 %v4097_v32  ;;  %v1405_v32 = vsub.s32 0, %v5793_v31 }
 0x18f   : > { %2149 = vmatprep.mubr.bf16.mxu0 %v4104_v33  ;;  %v1401_v33 = vld [vmem:[%s6093_s2] sm:$0x3] }
 0x196   : > { %2150 = vmatmul.mubr.bf16.gmra.mrb[12].mxu0 %v4103_v34  ;;  %v5799_v34 = vrot.slane %v1401_v33, %v1405_v32 }
 0x251   : > { %v2121_v35 = vpop.f32.mrb[0].mxu0 }
 0x252   : > { %v4609_v37 = vadd.f32 %v2121_v35, %v5799_v34  ;;  %v5802_v38 = vpop.f32.mrb[1].mxu0  ;;  %v2370_v35 = vld [vmem:[#allocation3 + $0x24] sm:$0x1] }
 0x253   : > { %v2125_v40 = vpop.f32.mrb[2].mxu0 }
 0x254   : > { %v2160_v58 = vmax.f32 %v4609_v37, 0.0  ;;  %v4611_v6 = vadd.f32 %v2125_v40, %v5799_v34  ;;  %v5805_v42 = vpop.f32.mrb[3].mxu0 }
 0x256   : > { %v4404_v43 = vpack.c.bf16 %v2160_v58, %v2160_v58  ;;  %v2161_v44 = vmax.f32 %v4611_v6, 0.0 }
 0x258   : > { %v2267_v45 = vshrl.u32 %v4404_v43, 16  ;;  %v4405_v46 = vpack.c.bf16 %v2161_v44, %v2161_v44  ;;  %v2270_v50 = vshll.u32 %v4404_v43, 16 }
 0x259   : > { %v2131_v47 = vpop.f32.mrb[4].mxu0 }
 0x25a   : > { %v2269_v48 = vrot.slane %v2267_v45, 7  ;;  %v2275_v51 = vshrl.u32 %v4405_v46, 16  ;;  %v4613_v52 = vadd.f32 %v2131_v47, %v5799_v34  ;;  %v5808_v54 = vpop.f32.mrb[5].mxu0  ;;  %v2278_v59 = vshll.u32 %v4405_v46, 16 }
 0x25b   : > { %v2135_v60 = vpop.f32.mrb[6].mxu0 }
 0x25c   : > { %v2272_v61 = vor.u32 %v2270_v50, %v2269_v48  ;;  %v2273_v62 = vrot.slane %v2269_v48, 4  ;;  %v2277_v0 = vrot.slane %v2275_v51, 7  ;;  %v2162_v41 = vmax.f32 %v4613_v52, 0.0  ;;  %v5815_v53 = vpop.f32.mrb[7].mxu0 }
 0x25d   : > { %v4615_v4 = vadd.f32 %v2135_v60, %v5799_v34  ;;  %v2515_v60 = vrot.slane %v2513_v49, 1 }
 0x25e   : > { %v2350_v8 = vsel %vm5811_vm11, %v2272_v61, %v2349_v56  ;;  %v2353_v36 = vsel %vm5435_vm2, %v2273_v62, %v2352_v57  ;;  %v2280_v9 = vor.u32 %v2278_v59, %v2277_v0  ;;  %v2281_v10 = vrot.slane %v2277_v0, 4  ;;  %v2373_v56 = vld [vmem:[#allocation3 + $0x28] sm:$0xf]  ;;  %v2376_v0 = vld [vmem:[#allocation3 + $0x2c] sm:$0x1] }
 0x25f   : > { %2351 = vst [vmem:[#allocation3 + $0x8] sm:$0xf] %v2350_v8  ;;  %2354 = vst [vmem:[#allocation3 + $0xc] sm:$0x1] %v2353_v36  ;;  %v4406_v11 = vpack.c.bf16 %v2162_v41, %v2162_v41  ;;  %v2163_v12 = vmax.f32 %v4615_v4, 0.0  ;;  %v2511_v59 = vshrl.u32 %v5832_v15, 16 }
 0x260   : > { %v2356_v13 = vsel %vm5811_vm11, %v2280_v9, %v2355_v2  ;;  %v2359_v14 = vsel %vm5435_vm2, %v2281_v10, %v2358_v3 }
 0x261   : > { %2357 = vst [vmem:[#allocation3 + $0x10] sm:$0xf] %v2356_v13  ;;  %2360 = vst [vmem:[#allocation3 + $0x14] sm:$0x1] %v2359_v14  ;;  %v2283_v16 = vshrl.u32 %v4406_v11, 16  ;;  %v4407_v17 = vpack.c.bf16 %v2163_v12, %v2163_v12  ;;  %v2141_v19 = vpop.f32.mrb[8].mxu0 }
 0x262   : > { %v4617_v21 = vadd.f32 %v2141_v19, %v5799_v34  ;;  %v5835_v22 = vpop.f32.mrb[9].mxu0  ;;  %v2286_v39 = vshll.u32 %v4406_v11, 16 }
 0x263   : > { %v2285_v23 = vrot.slane %v2283_v16, 7  ;;  %v2291_v25 = vshrl.u32 %v4407_v17, 16  ;;  %v2145_v26 = vpop.f32.mrb[10].mxu0  ;;  %v2294_v33 = vshll.u32 %v4407_v17, 16  ;;  %v2379_v16 = vld [vmem:[#allocation3 + $0x30] sm:$0xf] }
 0x264   : > { %v2164_v18 = vmax.f32 %v4617_v21, 0.0  ;;  %v4619_v28 = vadd.f32 %v2145_v26, %v5799_v34  ;;  %v5838_v29 = vpop.f32.mrb[11].mxu0  ;;  %v2382_v17 = vld [vmem:[#allocation3 + $0x34] sm:$0x1] }
 0x265   : > { %v2288_v63 = vor.u32 %v2286_v39, %v2285_v23  ;;  %v2289_v30 = vrot.slane %v2285_v23, 4  ;;  %v2293_v32 = vrot.slane %v2291_v25, 7 }
 0x266   : > { %v4408_v37 = vpack.c.bf16 %v2164_v18, %v2164_v18  ;;  %v2165_v40 = vmax.f32 %v4619_v28, 0.0  ;;  %v5841_v58 = vld [vmem:[#allocation3 + $0x8] sm:$0xf]  ;;  %v5843_v6 = vld [vmem:[#allocation3 + $0xc] sm:$0x1] }
 0x267   : > { %v2362_v43 = vsel %vm5811_vm11, %v2288_v63, %v2361_v20  ;;  %v2365_v44 = vsel %vm5435_vm2, %v2289_v30, %v2364_v24  ;;  %v2296_v45 = vor.u32 %v2294_v33, %v2293_v32  ;;  %v2297_v46 = vrot.slane %v2293_v32, 4 }
 0x268   : > { %2363 = vst [vmem:[#allocation3 + $0x18] sm:$0xf] %v2362_v43  ;;  %2366 = vst [vmem:[#allocation3 + $0x1c] sm:$0x1] %v2365_v44  ;;  %v2299_v47 = vshrl.u32 %v4408_v37, 16  ;;  %v4409_v48 = vpack.c.bf16 %v2165_v40, %v2165_v40  ;;  %v4210_v50 = vcombine.low %v5841_v58, %v5843_v6  ;;  %v2302_v62 = vshll.u32 %v4408_v37, 16 }
 0x269   : > { %v2368_v51 = vsel %vm5811_vm11, %v2296_v45, %v2367_v27  ;;  %v2371_v52 = vsel %vm5435_vm2, %v2297_v46, %v2370_v35  ;;  %v2151_v57 = vpop.f32.mrb[12].mxu0  ;;  %v5859_v9 = vld [vmem:[#allocation3 + $0x10] sm:$0xf]  ;;  %v5863_v15 = vld [vmem:[#allocation3 + $0x14] sm:$0x1]  ;;  %v2516_v20 = vor.u32 %v2515_v60, %v2511_v59 }
 0x26a   : > { %2369 = vst [vmem:[#allocation3 + $0x20] sm:$0xf] %v2368_v51  ;;  %2372 = vst [vmem:[#allocation3 + $0x24] sm:$0x1] %v2371_v52  ;;  %v2301_v61 = vrot.slane %v2299_v47, 7  ;;  %v2307_v2 = vshrl.u32 %v4409_v48, 16  ;;  %v4621_v41 = vadd.f32 %v2151_v57, %v5799_v34  ;;  %v4258_v47 = vcombine.low %v5818_v5, %v5841_v58 }
 0x26b   : > { %v5857_v3 = vpop.f32.mrb[13].mxu0  ;;  %v2310_v4 = vshll.u32 %v4409_v48, 16  ;;  %v2520_v36 = vshll.u32 %v4210_v50, 16  ;;  %v2518_v21 = vshrl.u32 %v4210_v50, 16  ;;  %v4934_v43 = vld [vmem:[#allocation9 + $0x80] sm:$0xff]   ;;  %v4935_v48 = vld [vmem:[#allocation9 + $0xc8] sm:$0xff]  }
 0x26c   : > { %v2155_v8 = vpop.f32.mrb[14].mxu0  ;;  %v2304_v10 = vor.u32 %v2302_v62, %v2301_v61  ;;  %v2305_v11 = vrot.slane %v2301_v61, 4  ;;  %v2309_v12 = vrot.slane %v2307_v2, 7  ;;  %v2166_v13 = vmax.f32 %v4621_v41, 0.0  ;;  %v2385_v46 = vld [vmem:[#allocation3 + $0x38] sm:$0xf] }
 0x26d   : > { %v5861_v14 = vpop.f32.mrb[15].mxu0  ;;  %v4623_v19 = vadd.f32 %v2155_v8, %v5799_v34  ;;  %v2522_v23 = vrot.slane %v2520_v36, 1  ;;  %v4211_v34 = vcombine.low %v5859_v9, %v5863_v15  ;;  %v2388_v57 = vld [vmem:[#allocation3 + $0x3c] sm:$0x1]  ;;  %v2391_v61 = vld [vmem:[#allocation3 + $0x40] sm:$0xf] }
 0x26e   : > { %v2374_v39 = vsel %vm5811_vm11, %v2304_v10, %v2373_v56  ;;  %v2377_v24 = vsel %vm5435_vm2, %v2305_v11, %v2376_v0  ;;  %v2312_v25 = vor.u32 %v2310_v4, %v2309_v12  ;;  %v2313_v26 = vrot.slane %v2309_v12, 4  ;;  %v2394_v36 = vld [vmem:[#allocation3 + $0x44] sm:$0x1]  ;;  %v4936_v10 = vld [vmem:[#allocation9 + $0x88] sm:$0xff]  }
 0x26f   : > { %2375 = vst [vmem:[#allocation3 + $0x28] sm:$0xf] %v2374_v39  ;;  %2378 = vst [vmem:[#allocation3 + $0x2c] sm:$0x1] %v2377_v24  ;;  %v4410_v27 = vpack.c.bf16 %v2166_v13, %v2166_v13  ;;  %v2167_v18 = vmax.f32 %v4623_v19, 0.0  ;;  %v2523_v28 = vor.u32 %v2522_v23, %v2518_v21  ;;  %v2527_v50 = vshll.u32 %v4211_v34, 16 }
 0x270   : > { %v5870_v49 = vld [vmem:[#allocation3 + $0x18] sm:$0xf]  ;;  %v5872_v63 = vld [vmem:[#allocation3 + $0x1c] sm:$0x1]  ;;  %v2380_v30 = vsel %vm5811_vm11, %v2312_v25, %v2379_v16  ;;  %v2383_v32 = vsel %vm5435_vm2, %v2313_v26, %v2382_v17  ;;  %v2525_v62 = vshrl.u32 %v4211_v34, 16  ;;  %v4939_v13 = vld [vmem:[#allocation9 + $0xd0] sm:$0xff]  }
 0x271   : > { %v4212_v33 = vcombine.low %v5870_v49, %v5872_v63  ;;  %2381 = vst [vmem:[#allocation3 + $0x30] sm:$0xf] %v2380_v30  ;;  %2384 = vst [vmem:[#allocation3 + $0x34] sm:$0x1] %v2383_v32  ;;  %v2315_v35 = vshrl.u32 %v4410_v27, 16  ;;  %v4411_v37 = vpack.c.bf16 %v2167_v18, %v2167_v18  ;;  %v4259_v40 = vcombine.low %v2516_v20, %v2523_v28  ;;  %v4941_v34 = vld [vmem:[#allocation9 + $0x90] sm:$0xff]  }
 0x272   : > { %v5882_v44 = vld [vmem:[#allocation3 + $0x20] sm:$0xf]  ;;  %v5884_v45 = vld [vmem:[#allocation3 + $0x24] sm:$0x1]  ;;  %v2318_v56 = vshll.u32 %v4410_v27, 16  ;;  %v2529_v0 = vrot.slane %v2527_v50, 1  ;;  %v4267_v30 = vcombine.low %v5859_v9, %v5870_v49 }
 0x273   : > { %v2534_v51 = vshll.u32 %v4212_v33, 16  ;;  %v2317_v52 = vrot.slane %v2315_v35, 7  ;;  %v2323_v59 = vshrl.u32 %v4411_v37, 16  ;;  %3589 = vmatprep.mubr.bf16.mxu1 %v4259_v40  ;;  %v4213_v60 = vcombine.low %v5882_v44, %v5884_v45  ;;  %v4942_v32 = vld [vmem:[#allocation9 + $0xd8] sm:$0xff]  }
 0x274   : > { %3590 = vmatmul.mubr.bf16.vlgmr.msra.gmra.mrb[0].mxu1 %v4258_v47  ;;  %v2532_v2 = vshrl.u32 %v4212_v33, 16  ;;  %v2326_v58 = vshll.u32 %v4411_v37, 16  ;;  %v2530_v11 = vor.u32 %v2529_v0, %v2525_v62 }
 0x275   : > { %v2536_v41 = vrot.slane %v2534_v51, 1  ;;  %v2320_v4 = vor.u32 %v2318_v56, %v2317_v52  ;;  %v2321_v8 = vrot.slane %v2317_v52, 4  ;;  %v2325_v5 = vrot.slane %v2323_v59, 7  ;;  %4454 = vmatpush3.bf16.msra.mxu1 %v4934_v43  ;;  %v4948_v56 = vld [vmem:[#allocation9 + $0xa0] sm:$0xff]   ;;  %v4949_v59 = vld [vmem:[#allocation9 + $0xe8] sm:$0xff]  }
 0x276   : > { %4455 = vmatprep.subr.bf16.mxu1 %v4935_v48  ;;  %v2402_v16 = vld [vmem:[#allocation3 + $0x28] sm:$0xf]  ;;  %v5890_v17 = vld [vmem:[#allocation3 + $0x2c] sm:$0x1]  ;;  %v2541_v19 = vshll.u32 %v4213_v60, 16  ;;  %v2539_v55 = vshrl.u32 %v4213_v60, 16 }
 0x277   : > { %v2537_v12 = vor.u32 %v2536_v41, %v2532_v2  ;;  %v2386_v20 = vsel %vm5811_vm11, %v2320_v4, %v2385_v46  ;;  %v2389_v21 = vsel %vm5435_vm2, %v2321_v8, %v2388_v57  ;;  %v2328_v23 = vor.u32 %v2326_v58, %v2325_v5  ;;  %v4946_v48 = vld [vmem:[#allocation9 + $0xe0] sm:$0xff]   ;;  %v4950_v41 = vld [vmem:[#allocation9 + $0xa8] sm:$0xff]   ;;  %v2413_v58 = vld [vmem:[#allocation3] sm:$0xe] }
 0x278   : > { %v2329_v39 = vrot.slane %v2325_v5, 4  ;;  %2387 = vst [vmem:[#allocation3 + $0x38] sm:$0xf] %v2386_v20  ;;  %2390 = vst [vmem:[#allocation3 + $0x3c] sm:$0x1] %v2389_v21  ;;  %v4214_v25 = vcombine.low %v2402_v16, %v5890_v17  ;;  %v2543_v33 = vrot.slane %v2541_v19, 1  ;;  %v4276_v57 = vcombine.low %v5882_v44, %v2402_v16 }
 0x279   : > { %v4268_v24 = vcombine.low %v2530_v11, %v2537_v12  ;;  %v2403_v26 = vld [vmem:[#allocation3 + $0x30] sm:$0xf]  ;;  %v5897_v27 = vld [vmem:[#allocation3 + $0x34] sm:$0x1]  ;;  %v2392_v18 = vsel %vm5811_vm11, %v2328_v23, %v2391_v61  ;;  %4456 = vmatpush3.bf16.msra.mxu1 %v4936_v10  ;;  %v4953_v5 = vld [vmem:[#allocation9 + $0xf0] sm:$0xff]   ;;  %v4217_v12 = vcombine.low %v2413_v58, %v5820_v7 }
 0x27a   : > { %v2395_v28 = vsel %vm5435_vm2, %v2329_v39, %v2394_v36  ;;  %2393 = vst [vmem:[#allocation3 + $0x40] sm:$0xf] %v2392_v18  ;;  %4457 = vmatprep.subr.bf16.mxu1 %v4939_v13  ;;  %v2548_v35 = vshll.u32 %v4214_v25, 16  ;;  %v4215_v37 = vcombine.low %v2403_v26, %v5897_v27  ;;  %v2546_v40 = vshrl.u32 %v4214_v25, 16  ;;  %v2414_v36 = vld [vmem:[#allocation3 + $0x8] sm:$0xe] }
 0x27b   : > { %2396 = vst [vmem:[#allocation3 + $0x44] sm:$0x1] %v2395_v28  ;;  %3597 = vmatprep.mubr.bf16.mxu1 %v4268_v24  ;;  %v2544_v46 = vor.u32 %v2543_v33, %v2539_v55  ;;  %v5910_v11 = vld [vmem:[#allocation3 + $0x10] sm:$0xf]  ;;  %v4955_v44 = vld [vmem:[#allocation9 + $0xb0] sm:$0xff]   ;;  %v4218_v13 = vcombine.low %v2414_v36, %v5843_v6  ;;  %v4959_v20 = vld [vmem:[#allocation9 + $0xf8] sm:$0xff]  }
 0x27c   : > { %3598 = vmatmul.mubr.bf16.gmra.mrb[4].mxu1 %v4267_v30  ;;  %v2550_v43 = vrot.slane %v2548_v35, 1  ;;  %v2555_v50 = vshll.u32 %v4215_v37, 16  ;;  %v2553_v62 = vshrl.u32 %v4215_v37, 16  ;;  %v5914_v19 = vld [vmem:[#allocation3 + $0x8] sm:$0xf]  ;;  %v2590_v39 = vrot.slane %v4217_v12, 1 }
 0x27d   : > { %4458 = vmatpush3.bf16.msra.mxu1 %v4941_v34  ;;  %v4261_v21 = vcombine.low %v5914_v19, %v5910_v11  ;;  %v4960_v23 = vld [vmem:[#allocation9 + $0xb8] sm:$0xff]   ;;  %v2591_v24 = vrot.slane %v4218_v13, 1  ;;  %v4961_v25 = vld [vmem:[#allocation9 + $0x140] sm:$0xff]   ;;  %v2416_v7 = vld [vmem:[#allocation3 + $0x18] sm:$0xe] }
 0x27e   : > { %4459 = vmatprep.subr.bf16.mxu1 %v4942_v32  ;;  %v2551_v47 = vor.u32 %v2550_v43, %v2546_v40  ;;  %v2557_v60 = vrot.slane %v2555_v50, 1  ;;  %v5918_v18 = vld [vmem:[#allocation3 + $0x20] sm:$0xf]  ;;  %v4962_v6 = vld [vmem:[#allocation9 + $0x100] sm:$0xff]   ;;  %v5920_v34 = vld [vmem:[#allocation3 + $0x18] sm:$0xf]  ;;  %v4220_v32 = vcombine.low %v2416_v7, %v5872_v63 }
 0x27f   : > { %v2404_v51 = vld [vmem:[#allocation3 + $0x38] sm:$0xf]  ;;  %v5906_v52 = vld [vmem:[#allocation3 + $0x3c] sm:$0x1]  ;;  %v4260_v28 = vcombine.low %v2590_v39, %v2591_v24  ;;  %v4270_v33 = vcombine.low %v5920_v34, %v5918_v18  ;;  %v4968_v55 = vld [vmem:[#allocation9 + $0x150] sm:$0xff]  }
 0x280   : > { %v4277_v9 = vcombine.low %v2544_v46, %v2551_v47  ;;  %v4216_v49 = vcombine.low %v2404_v51, %v5906_v52  ;;  %v2558_v4 = vor.u32 %v2557_v60, %v2553_v62  ;;  %v4285_v16 = vcombine.low %v2403_v26, %v2404_v51  ;;  %v2415_v26 = vld [vmem:[#allocation3 + $0x10] sm:$0xe]  ;;  %v4966_v30 = vld [vmem:[#allocation9 + $0x148] sm:$0xff]   ;;  %v2418_v43 = vld [vmem:[#allocation3 + $0x28] sm:$0xe] }
 0x281   : > { %4460 = vmatpush3.bf16.msra.mxu1 %v4943_v1  ;;  %v4219_v35 = vcombine.low %v2415_v26, %v5863_v15  ;;  %v4967_v37 = vld [vmem:[#allocation9 + $0x108] sm:$0xff]   ;;  %v2593_v40 = vrot.slane %v4220_v32, 1  ;;  %v5926_v46 = vld [vmem:[#allocation3 + $0x30] sm:$0xf]  ;;  %v4971_v47 = vld [vmem:[#allocation9 + $0x110] sm:$0xff]   ;;  %v4222_v15 = vcombine.low %v2418_v43, %v5890_v17 }
 0x282   : > { %3605 = vmatprep.mubr.bf16.mxu1 %v4277_v9  ;;  %4461 = vmatprep.subr.bf16.mxu1 %v4946_v48  ;;  %v2562_v61 = vshll.u32 %v4216_v49, 16  ;;  %v2560_v0 = vshrl.u32 %v4216_v49, 16  ;;  %v2417_v48 = vld [vmem:[#allocation3 + $0x20] sm:$0xe]  ;;  %v5928_v50 = vld [vmem:[#allocation3 + $0x28] sm:$0xf] }
 0x283   : > { %v2592_v1 = vrot.slane %v4219_v35, 1  ;;  %v4975_v51 = vld [vmem:[#allocation9 + $0x158] sm:$0xff]   ;;  %v4279_v9 = vcombine.low %v5928_v50, %v5926_v46  ;;  %v4221_v49 = vcombine.low %v2417_v48, %v5884_v45  ;;  %v2430_v60 = vld [vmem:[#allocation3 + $0x14] sm:$0x1]  ;;  %v4984_v58 = vld [vmem:[#allocation9 + $0x168] sm:$0xff]  }
 0x284   : > { %3606 = vmatmul.mubr.bf16.gmra.mrb[8].mxu1 %v4276_v57  ;;  %v2564_v2 = vrot.slane %v2562_v61, 1  ;;  %v4977_v57 = vld [vmem:[#allocation9 + $0x160] sm:$0xff]   ;;  %v2420_v61 = vld [vmem:[#allocation3 + $0x38] sm:$0xe]  ;;  %v2432_v24 = vld [vmem:[#allocation3 + $0x24] sm:$0x1] }
 0x285   : > { %4462 = vmatpush3.bf16.msra.mxu1 %v4948_v56  ;;  %v4269_v63 = vcombine.low %v2592_v1, %v2593_v40  ;;  %v4976_v56 = vld [vmem:[#allocation9 + $0x118] sm:$0xff]   ;;  %v2594_v62 = vrot.slane %v4221_v49, 1  ;;  %v4980_v17 = vld [vmem:[#allocation9 + $0x120] sm:$0xff]   ;;  %v4224_v36 = vcombine.low %v2420_v61, %v5906_v52  ;;  %v2431_v26 = vld [vmem:[#allocation3 + $0x1c] sm:$0x1] }
 0x286   : > { %4463 = vmatprep.subr.bf16.mxu1 %v4949_v59  ;;  %v2565_v8 = vor.u32 %v2564_v2, %v2560_v0  ;;  %v2595_v59 = vrot.slane %v4222_v15, 1  ;;  %v5934_v0 = vld [vmem:[#allocation3 + $0x40] sm:$0xf]  ;;  %v2438_v2 = vld [vmem:[#allocation3 + $0x10] sm:$0xe]  ;;  %v4227_v1 = vcombine.low %v5920_v34, %v2431_v26 }
 0x287   : > { %v4234_v12 = vcombine.low %v2438_v2, %v2430_v60  ;;  %v2597_v39 = vrot.slane %v4224_v36, 1  ;;  %v2439_v35 = vld [vmem:[#allocation3 + $0x18] sm:$0xe]  ;;  %v4995_v61 = vld [vmem:[#allocation9 + $0x180] sm:$0xff]  }
 0x288   : > { %v4286_v10 = vcombine.low %v2558_v4, %v2565_v8  ;;  %v2419_v4 = vld [vmem:[#allocation3 + $0x30] sm:$0xe]  ;;  %v4226_v8 = vcombine.low %v5910_v11, %v2430_v60  ;;  %v4278_v45 = vcombine.low %v2594_v62, %v2595_v59  ;;  %v4985_v11 = vld [vmem:[#allocation9 + $0x128] sm:$0xff]   ;;  %v4235_v48 = vcombine.low %v2439_v35, %v2431_v26  ;;  %v2433_v60 = vld [vmem:[#allocation3 + $0x2c] sm:$0x1] }
 0x289   : > { %4464 = vmatpush3.bf16.msra.mxu1 %v4950_v41  ;;  %v2429_v41 = vld [vmem:[#allocation3 + $0xc] sm:$0x1]  ;;  %v2719_v52 = vrot.slane %v4234_v12, 1  ;;  %v2442_v59 = vld [vmem:[#allocation3 + $0x30] sm:$0xe] }
 0x28a   : > { %3613 = vmatprep.mubr.bf16.mxu1 %v4286_v10  ;;  %4465 = vmatprep.subr.bf16.mxu1 %v4953_v5  ;;  %v5937_v5 = vld [vmem:[#allocation3 + $0x38] sm:$0xf]  ;;  %v2437_v10 = vld [vmem:[#allocation3 + $0x8] sm:$0xe]  ;;  %v4225_v13 = vcombine.low %v5914_v19, %v2429_v41  ;;  %v2646_v43 = vshrl.u32 %v4226_v8, 16  ;;  %v2720_v62 = vrot.slane %v4235_v48, 1 }
 0x28b   : > { %v5952_v26 = vld [vmem:[#allocation3 + $0x10] sm:$0xf] }
 0x28c   : > { %3614 = vmatmul.mubr.bf16.gmra.mrb[12].mxu1 %v4285_v16  ;;  %v4223_v16 = vcombine.low %v2419_v4, %v5897_v27  ;;  %v4228_v27 = vcombine.low %v5918_v18, %v2432_v24  ;;  %v4994_v18 = vld [vmem:[#allocation9 + $0x1c0] sm:$0xff]   ;;  %v2441_v4 = vld [vmem:[#allocation3 + $0x28] sm:$0xe] }
 0x28d   : > { %4466 = vmatpush3.bf16.msra.mxu1 %v4955_v44  ;;  %3654 = vmatprep.mubr.bf16.mxu1 %v4261_v21  ;;  %v4288_v44 = vcombine.low %v5937_v5, %v5934_v0  ;;  %v2648_v21 = vshll.u32 %v4226_v8, 16  ;;  %v4237_v12 = vcombine.low %v2441_v4, %v2433_v60  ;;  %v5968_v4 = vld [vmem:[#allocation3 + $0x24] sm:$0x1] }
 0x28e   : > { %4467 = vmatprep.subr.bf16.mxu1 %v4959_v20  ;;  %v4233_v20 = vcombine.low %v2437_v10, %v2429_v41  ;;  %v2596_v7 = vrot.slane %v4223_v16, 1  ;;  %v2662_v15 = vshll.u32 %v4228_v27, 16  ;;  %v4998_v41 = vld [vmem:[#allocation9 + $0x1c8] sm:$0xff]   ;;  %v2660_v10 = vshrl.u32 %v4228_v27, 16  ;;  %v5000_v16 = vld [vmem:[#allocation9 + $0x1d0] sm:$0xff]  }
 0x290   : > { %v2718_v19 = vrot.slane %v4233_v20, 1  ;;  %v4287_v32 = vcombine.low %v2596_v7, %v2597_v39  ;;  %v2436_v20 = vld [vmem:[#allocation3 + $0x44] sm:$0x1] }
 0x291   : > { %4468 = vmatpush3.bf16.msra.mxu1 %v4960_v23  ;;  %v4986_v23 = vld [vmem:[#allocation9 + $0x170] sm:$0xff]  }
 0x292   : > { %4493 = vmatprep.subr.bf16.mxu1 %v4961_v25  ;;  %v2641_v25 = vshll.u32 %v4225_v13, 16  ;;  %v5001_v7 = vld [vmem:[#allocation9 + $0x190] sm:$0xff]  }
 0x294   : > { %3655 = vmatmul.mubr.bf16.vlgmr.msra.gmra.mrb[16].mxu1 %v4260_v28  ;;  %v4989_v28 = vld [vmem:[#allocation9 + $0x130] sm:$0xff]   ;;  %v2643_v40 = vrot.slane %v2641_v25, 1  ;;  %v2435_v25 = vld [vmem:[#allocation3 + $0x3c] sm:$0x1] }
 0x295   : > { %4494 = vmatpush3.bf16.msra.mxu1 %v4962_v6  ;;  %3662 = vmatprep.mubr.bf16.mxu1 %v4270_v33  ;;  %v2440_v6 = vld [vmem:[#allocation3 + $0x20] sm:$0xe]  ;;  %v4992_v33 = vld [vmem:[#allocation9 + $0x178] sm:$0xff]  }
 0x296   : > { %4495 = vmatprep.subr.bf16.mxu1 %v4966_v30  ;;  %v2650_v30 = vrot.slane %v2648_v21, 1 }
 0x299   : > { %4496 = vmatpush3.bf16.msra.mxu1 %v4967_v37  ;;  %v4263_v37 = vcombine.low %v2718_v19, %v2719_v52  ;;  %v2444_v52 = vld [vmem:[#allocation3 + $0x40] sm:$0xe] }
 0x29a   : > { %4497 = vmatprep.subr.bf16.mxu1 %v4968_v55  ;;  %v4236_v55 = vcombine.low %v2440_v6, %v2432_v24  ;;  %v2722_v6 = vrot.slane %v4237_v12, 1 }
 0x29c   : > { %3663 = vmatmul.mubr.bf16.gmra.mrb[20].mxu1 %v4269_v63  ;;  %v2639_v63 = vshrl.u32 %v4225_v13, 16  ;;  %v2721_v49 = vrot.slane %v4236_v55, 1 }
 0x29d   : > { %4498 = vmatpush3.bf16.msra.mxu1 %v4971_v47  ;;  %3670 = vmatprep.mubr.bf16.mxu1 %v4279_v9  ;;  %v4993_v47 = vld [vmem:[#allocation9 + $0x138] sm:$0xff]   ;;  %v2434_v9 = vld [vmem:[#allocation3 + $0x34] sm:$0x1] }
 0x29e   : > { %4499 = vmatprep.subr.bf16.mxu1 %v4975_v51  ;;  %v2651_v51 = vor.u32 %v2650_v30, %v2646_v43  ;;  %v4230_v34 = vcombine.low %v5926_v46, %v2434_v9  ;;  %v4272_v8 = vcombine.low %v2720_v62, %v2721_v49  ;;  %v2653_v46 = vshrl.u32 %v4227_v1, 16  ;;  %v5004_v30 = vld [vmem:[#allocation9 + $0x1d8] sm:$0xff]  }
 0x2a0   : > { %v2676_v13 = vshll.u32 %v4230_v34, 16 }
 0x2a1   : > { %4500 = vmatpush3.bf16.msra.mxu1 %v4976_v56  ;;  %v2644_v56 = vor.u32 %v2643_v40, %v2639_v63  ;;  %v4231_v40 = vcombine.low %v5937_v5, %v2435_v25  ;;  %v5962_v5 = vld [vmem:[#allocation3 + $0x28] sm:$0xf] }
 0x2a2   : > { %4501 = vmatprep.subr.bf16.mxu1 %v4977_v57  ;;  %v2655_v57 = vshll.u32 %v4227_v1, 16  ;;  %v2678_v27 = vrot.slane %v2676_v13, 1  ;;  %v2674_v1 = vshrl.u32 %v4230_v34, 16 }
 0x2a3   : > { %v4262_v2 = vcombine.low %v2644_v56, %v2651_v51  ;;  %v5006_v51 = vld [vmem:[#allocation9 + $0x1e0] sm:$0xff]   ;;  %v2683_v56 = vshll.u32 %v4231_v40, 16 }
 0x2a4   : > { %3671 = vmatmul.mubr.bf16.gmra.mrb[24].mxu1 %v4278_v45  ;;  %v4238_v45 = vcombine.low %v2442_v59, %v2434_v9  ;;  %v2657_v36 = vrot.slane %v2655_v57, 1  ;;  %v5964_v59 = vld [vmem:[#allocation3 + $0x2c] sm:$0x1] }
 0x2a5   : > { %4502 = vmatpush3.bf16.msra.mxu1 %v4980_v17  ;;  %3678 = vmatprep.mubr.bf16.mxu1 %v4288_v44  ;;  %v2664_v17 = vrot.slane %v2662_v15, 1  ;;  %v4999_v44 = vld [vmem:[#allocation9 + $0x188] sm:$0xff]  }
 0x2a6   : > { %4503 = vmatprep.subr.bf16.mxu1 %v4984_v58  ;;  %v4229_v58 = vcombine.low %v5928_v50, %v2433_v60  ;;  %v2723_v21 = vrot.slane %v4238_v45, 1  ;;  %v2658_v24 = vor.u32 %v2657_v36, %v2653_v46  ;;  %v5950_v50 = vld [vmem:[#allocation3 + $0x1c] sm:$0x1]  ;;  %v5007_v60 = vld [vmem:[#allocation9 + $0x1a0] sm:$0xff]   ;;  %v2685_v36 = vrot.slane %v2683_v56, 1  ;;  %v5012_v46 = vld [vmem:[#allocation9 + $0x1f0] sm:$0xff]  }
 0x2a7   : > { %v5992_v56 = vld [vmem:[#allocation3 + $0x4c] sm:$0x1] }
 0x2a8   : > { %v2669_v39 = vshll.u32 %v4229_v58, 16  ;;  %v4281_v35 = vcombine.low %v2722_v6, %v2723_v21  ;;  %v2667_v15 = vshrl.u32 %v4229_v58, 16  ;;  %v4244_v58 = vcombine.low %v5962_v5, %v5964_v59  ;;  %v5013_v6 = vld [vmem:[#allocation9 + $0x1b0] sm:$0xff]  }
 0x2a9   : > { %4504 = vmatpush3.bf16.msra.mxu1 %v4985_v11  ;;  %v2665_v11 = vor.u32 %v2664_v17, %v2660_v10  ;;  %v5966_v17 = vld [vmem:[#allocation3 + $0x20] sm:$0xf] }
 0x2aa   : > { %4505 = vmatprep.subr.bf16.mxu1 %v4986_v23  ;;  %v5948_v23 = vld [vmem:[#allocation3 + $0x18] sm:$0xf]  ;;  %v2671_v43 = vrot.slane %v2669_v39, 1 }
 0x2ab   : > { %v4271_v19 = vcombine.low %v2658_v24, %v2665_v11  ;;  %v4242_v55 = vcombine.low %v5948_v23, %v5950_v50  ;;  %v2681_v11 = vshrl.u32 %v4231_v40, 16  ;;  %v2790_v24 = vshll.u32 %v4244_v58, 16 }
 0x2ac   : > { %3679 = vmatmul.mubr.bf16.gmra.mrb[28].mxu1 %v4287_v32  ;;  %v2443_v32 = vld [vmem:[#allocation3 + $0x38] sm:$0xe]  ;;  %v2672_v57 = vor.u32 %v2671_v43, %v2667_v15  ;;  %v5017_v43 = vld [vmem:[#allocation9 + $0x1b8] sm:$0xff]  }
 0x2ad   : > { %4506 = vmatpush3.bf16.msra.mxu1 %v4989_v28  ;;  %3719 = vmatprep.mubr.bf16.mxu1 %v4263_v37  ;;  %v4232_v28 = vcombine.low %v5934_v0, %v2436_v20  ;;  %v4240_v37 = vcombine.low %v2444_v52, %v2436_v20  ;;  %v5005_v0 = vld [vmem:[#allocation9 + $0x198] sm:$0xff]   ;;  %v2776_v49 = vshll.u32 %v4242_v55, 16  ;;  %v2774_v13 = vshrl.u32 %v4242_v55, 16 }
 0x2ae   : > { %4507 = vmatprep.subr.bf16.mxu1 %v4992_v33  ;;  %v5955_v33 = vld [vmem:[#allocation3 + $0x14] sm:$0x1]  ;;  %v2686_v52 = vor.u32 %v2685_v36, %v2681_v11  ;;  %v2792_v55 = vrot.slane %v2790_v24, 1  ;;  %v5025_v36 = vld [vmem:[#allocation9 + $0x210] sm:$0xff]  }
 0x2af   : > { %v4241_v48 = vcombine.low %v5952_v26, %v5955_v33  ;;  %v2690_v63 = vshll.u32 %v4232_v28, 16  ;;  %v2725_v9 = vrot.slane %v4240_v37, 1  ;;  %v2778_v45 = vrot.slane %v2776_v49, 1  ;;  %v5990_v49 = vld [vmem:[#allocation3 + $0x44] sm:$0x1]  ;;  %v5030_v24 = vld [vmem:[#allocation9 + $0x220] sm:$0xff]  }
 0x2b0   : > { %v2688_v10 = vshrl.u32 %v4232_v28, 16 }
 0x2b1   : > { %4508 = vmatpush3.bf16.msra.mxu1 %v4993_v47  ;;  %v4239_v47 = vcombine.low %v2443_v32, %v2435_v25  ;;  %v2769_v62 = vshll.u32 %v4241_v48, 16  ;;  %v2767_v21 = vshrl.u32 %v4241_v48, 16  ;;  %v2779_v39 = vor.u32 %v2778_v45, %v2774_v13  ;;  %v5974_v25 = vld [vmem:[#allocation3 + $0x38] sm:$0xf]  ;;  %v5978_v32 = vld [vmem:[#allocation3 + $0x30] sm:$0xf] }
 0x2b2   : > { %4533 = vmatprep.subr.bf16.mxu1 %v4994_v18  ;;  %v2679_v18 = vor.u32 %v2678_v27, %v2674_v1  ;;  %v5016_v27 = vld [vmem:[#allocation9 + $0x1f8] sm:$0xff]   ;;  %v5018_v48 = vld [vmem:[#allocation9 + $0x200] sm:$0xff]   ;;  %v4273_v13 = vcombine.low %v5966_v17, %v5962_v5  ;;  %v5034_v5 = vld [vmem:[#allocation9 + $0x228] sm:$0xff]  }
 0x2b3   : > { %v2771_v12 = vrot.slane %v2769_v62, 1  ;;  %v5024_v62 = vld [vmem:[#allocation9 + $0x208] sm:$0xff]  }
 0x2b4   : > { %3720 = vmatmul.mubr.bf16.vlgmr.msra.gmra.mrb[32].mxu1 %v4262_v2  ;;  %v4280_v34 = vcombine.low %v2672_v57, %v2679_v18  ;;  %v5010_v2 = vld [vmem:[#allocation9 + $0x1e8] sm:$0xff]   ;;  %v5986_v18 = vld [vmem:[#allocation3 + $0x48] sm:$0xf] }
 0x2b5   : > { %4534 = vmatpush3.bf16.msra.mxu1 %v4995_v61  ;;  %3727 = vmatprep.mubr.bf16.mxu1 %v4272_v8  ;;  %v2724_v61 = vrot.slane %v4239_v47, 1  ;;  %v2772_v28 = vor.u32 %v2771_v12, %v2767_v21 }
 0x2b6   : > { %4535 = vmatprep.subr.bf16.mxu1 %v4998_v41  ;;  %v2692_v41 = vrot.slane %v2690_v63, 1 }
 0x2b7   : > { %v4290_v8 = vcombine.low %v2724_v61, %v2725_v9  ;;  %v4265_v37 = vcombine.low %v2772_v28, %v2779_v39  ;;  %v5988_v9 = vld [vmem:[#allocation3 + $0x40] sm:$0xf]  ;;  %v4264_v61 = vcombine.low %v5952_v26, %v5948_v23  ;;  %v2463_v28 = vld [vmem:[#allocation3 + $0x18] sm:$0xe] }
 0x2b8   : > { %v2693_v20 = vor.u32 %v2692_v41, %v2688_v10  ;;  %v4247_v41 = vcombine.low %v5988_v9, %v5990_v49 }
 0x2b9   : > { %4536 = vmatpush3.bf16.msra.mxu1 %v4999_v44  ;;  %v5011_v44 = vld [vmem:[#allocation9 + $0x1a8] sm:$0xff]  }
 0x2ba   : > { %4537 = vmatprep.subr.bf16.mxu1 %v5000_v16  ;;  %v4243_v16 = vcombine.low %v5966_v17, %v5968_v4  ;;  %v2811_v12 = vshll.u32 %v4247_v41, 16  ;;  %v2809_v39 = vshrl.u32 %v4247_v41, 16  ;;  %v2462_v17 = vld [vmem:[#allocation3 + $0x10] sm:$0xe] }
 0x2bc   : > { %3728 = vmatmul.mubr.bf16.gmra.mrb[36].mxu1 %v4271_v19  ;;  %v2783_v19 = vshll.u32 %v4243_v16, 16  ;;  %v2781_v63 = vshrl.u32 %v4243_v16, 16  ;;  %v5029_v16 = vld [vmem:[#allocation9 + $0x218] sm:$0xff]   ;;  %v2813_v11 = vrot.slane %v2811_v12, 1 }
 0x2bd   : > { %4538 = vmatpush3.bf16.msra.mxu1 %v5001_v7  ;;  %3735 = vmatprep.mubr.bf16.mxu1 %v4281_v35  ;;  %v5976_v7 = vld [vmem:[#allocation3 + $0x3c] sm:$0x1]  ;;  %v5980_v35 = vld [vmem:[#allocation3 + $0x34] sm:$0x1] }
 0x2be   : > { %4539 = vmatprep.subr.bf16.mxu1 %v5004_v30  ;;  %v4289_v30 = vcombine.low %v2686_v52, %v2693_v20  ;;  %v4246_v40 = vcombine.low %v5974_v25, %v5976_v7  ;;  %v2785_v1 = vrot.slane %v2783_v19, 1  ;;  %v4245_v47 = vcombine.low %v5978_v32, %v5980_v35 }
 0x2bf   : > { %v2814_v52 = vor.u32 %v2813_v11, %v2809_v39  ;;  %v4282_v19 = vcombine.low %v5978_v32, %v5974_v25  ;;  %v4291_v32 = vcombine.low %v5988_v9, %v5986_v18 }
 0x2c0   : > { %v2804_v15 = vshll.u32 %v4246_v40, 16  ;;  %v2786_v57 = vor.u32 %v2785_v1, %v2781_v63  ;;  %v2795_v10 = vshrl.u32 %v4245_v47, 16  ;;  %v2467_v1 = vld [vmem:[#allocation3 + $0x38] sm:$0xe] }
 0x2c1   : > { %4540 = vmatpush3.bf16.msra.mxu1 %v5005_v0  ;;  %v2788_v0 = vshrl.u32 %v4244_v58, 16  ;;  %v2802_v58 = vshrl.u32 %v4246_v40, 16  ;;  %v2465_v40 = vld [vmem:[#allocation3 + $0x28] sm:$0xe] }
 0x2c2   : > { %4541 = vmatprep.subr.bf16.mxu1 %v5006_v51  ;;  %v4252_v25 = vcombine.low %v2465_v40, %v5964_v59  ;;  %v2468_v59 = vld [vmem:[#allocation3 + $0x40] sm:$0xe] }
 0x2c3   : > { %v2793_v51 = vor.u32 %v2792_v55, %v2788_v0  ;;  %v5035_v55 = vld [vmem:[#allocation9 + $0x230] sm:$0xff]  }
 0x2c4   : > { %3736 = vmatmul.mubr.bf16.gmra.mrb[40].mxu1 %v4280_v34  ;;  %v2464_v0 = vld [vmem:[#allocation3 + $0x20] sm:$0xe] }
 0x2c5   : > { %4542 = vmatpush3.bf16.msra.mxu1 %v5007_v60  ;;  %3743 = vmatprep.mubr.bf16.mxu1 %v4290_v8  ;;  %v2797_v60 = vshll.u32 %v4245_v47, 16  ;;  %v4274_v34 = vcombine.low %v2786_v57, %v2793_v51  ;;  %v4248_v8 = vcombine.low %v5986_v18, %v5992_v56  ;;  %v4254_v51 = vcombine.low %v2467_v1, %v5976_v7 }
 0x2c6   : > { %4543 = vmatprep.subr.bf16.mxu1 %v5010_v2  ;;  %v2806_v2 = vrot.slane %v2804_v15, 1  ;;  %v2849_v57 = vrot.slane %v4252_v25, 1 }
 0x2c7   : > { %v2799_v45 = vrot.slane %v2797_v60, 1  ;;  %v2818_v23 = vshll.u32 %v4248_v8, 16  ;;  %v2816_v20 = vshrl.u32 %v4248_v8, 16  ;;  %v2851_v60 = vrot.slane %v4254_v51, 1 }
 0x2c9   : > { %4544 = vmatpush3.bf16.msra.mxu1 %v5011_v44  ;;  %v2807_v44 = vor.u32 %v2806_v2, %v2802_v58  ;;  %v2800_v26 = vor.u32 %v2799_v45, %v2795_v10  ;;  %v2820_v21 = vrot.slane %v2818_v23, 1 }
 0x2ca   : > { %4545 = vmatprep.subr.bf16.mxu1 %v5012_v46 }
 0x2cb   : > { %v4283_v46 = vcombine.low %v2800_v26, %v2807_v44 }
 0x2cc   : > { %3744 = vmatmul.mubr.bf16.gmra.mrb[44].mxu1 %v4289_v30 }
 0x2cd   : > { %4546 = vmatpush3.bf16.msra.mxu1 %v5013_v6  ;;  %3784 = vmatprep.mubr.bf16.mxu1 %v4265_v37  ;;  %v2821_v6 = vor.u32 %v2820_v21, %v2816_v20  ;;  %v4249_v37 = vcombine.low %v2462_v17, %v5955_v33  ;;  %v4251_v33 = vcombine.low %v2464_v0, %v5968_v4  ;;  %v4257_v17 = vld [vmem:[%s6095_s4] ss:$0 sm:$0xff] }
 0x2ce   : > { %4547 = vmatprep.subr.bf16.mxu1 %v5016_v27  ;;  %v4250_v27 = vcombine.low %v2463_v28, %v5950_v50  ;;  %v5039_v50 = vld [vmem:[#allocation9 + $0x238] sm:$0xff]  }
 0x2cf   : > { %v4292_v30 = vcombine.low %v2814_v52, %v2821_v6  ;;  %v2846_v47 = vrot.slane %v4249_v37, 1 }
 0x2d1   : > { %4548 = vmatpush3.bf16.msra.mxu1 %v5017_v43  ;;  %v2847_v43 = vrot.slane %v4250_v27, 1 }
 0x2d2   : > { %4585 = vmatprep.subr.bf16.mxu1 %v5018_v48 }
 0x2d3   : > { %v4266_v63 = vcombine.low %v2846_v47, %v2847_v43 }
 0x2d4   : > { %3785 = vmatmul.mubr.bf16.vlgmr.msra.gmra.mrb[48].mxu1 %v4264_v61  ;;  %v2469_v61 = vld [vmem:[#allocation3 + $0x48] sm:$0xe] }
 0x2d5   : > { %4586 = vmatpush3.bf16.msra.mxu1 %v5018_v48  ;;  %3792 = vmatprep.mubr.bf16.mxu1 %v4274_v34  ;;  %v2466_v48 = vld [vmem:[#allocation3 + $0x30] sm:$0xe]  ;;  %v4255_v34 = vcombine.low %v2468_v59, %v5990_v49  ;;  %v4256_v7 = vcombine.low %v2469_v61, %v5992_v56 }
 0x2d6   : > { %4587 = vmatprep.subr.bf16.mxu1 %v5024_v62  ;;  %v4253_v15 = vcombine.low %v2466_v48, %v5980_v35 }
 0x2d7   : > { %v2852_v4 = vrot.slane %v4255_v34, 1  ;;  %v2853_v41 = vrot.slane %v4256_v7, 1 }
 0x2d8   : > { %v2850_v18 = vrot.slane %v4253_v15, 1 }
 0x2d9   : > { %4588 = vmatpush3.bf16.msra.mxu1 %v5024_v62  ;;  %v2848_v62 = vrot.slane %v4251_v33, 1  ;;  %v4293_v8 = vcombine.low %v2852_v4, %v2853_v41 }
 0x2da   : > { %4589 = vmatprep.subr.bf16.mxu1 %v5025_v36  ;;  %v4284_v2 = vcombine.low %v2850_v18, %v2851_v60 }
 0x2db   : > { %v4275_v9 = vcombine.low %v2848_v62, %v2849_v57 }
 0x2dc   : > { %3793 = vmatmul.mubr.bf16.gmra.mrb[52].mxu1 %v4273_v13 }
 0x2dd   : > { %4590 = vmatpush3.bf16.msra.mxu1 %v5025_v36  ;;  %3800 = vmatprep.mubr.bf16.mxu1 %v4283_v46 }
 0x2de   : > { %4591 = vmatprep.subr.bf16.mxu1 %v5029_v16 }
 0x2e1   : > { %4592 = vmatpush3.bf16.msra.mxu1 %v5029_v16 }
 0x2e2   : > { %4593 = vmatprep.subr.bf16.mxu1 %v5030_v24 }
 0x2e4   : > { %3801 = vmatmul.mubr.bf16.gmra.mrb[56].mxu1 %v4282_v19 }
 0x2e5   : > { %4594 = vmatpush3.bf16.msra.mxu1 %v5030_v24  ;;  %3808 = vmatprep.mubr.bf16.mxu1 %v4292_v30 }
 0x2e6   : > { %4595 = vmatprep.subr.bf16.mxu1 %v5034_v5 }
 0x2e9   : > { %4596 = vmatpush3.bf16.msra.mxu1 %v5034_v5 }
 0x2ea   : > { %4597 = vmatprep.subr.bf16.mxu1 %v5035_v55 }
 0x2ec   : > { %3809 = vmatmul.mubr.bf16.gmra.mrb[60].mxu1 %v4291_v32 }
 0x2ed   : > { %4598 = vmatpush3.bf16.msra.mxu1 %v5035_v55  ;;  %4601 = vmatprep.mubr.bf16.mxu1 %v4266_v63 }
 0x2ee   : > { %4599 = vmatprep.subr.bf16.mxu1 %v5039_v50 }
 0x2f1   : > { %4600 = vmatpush3.bf16.msra.mxu1 %v5039_v50 }
 0x2f4   : > { %4602 = vmatmul.mubr.bf16.vlgmr.msra.gmra.mrb[64].mxu1 %v4275_v9 }
 0x2f5   : > { %4605 = vmatprep.mubr.bf16.mxu1 %v4284_v2 }
 0x2fc   : > { %4606 = vmatmul.mubr.bf16.gmra.mrb[68].mxu1 %v4293_v8 }
 0x347   : > { %v4429_v35 = vpop.f32.mrb[0].mxu1 }
 0x348   : > { %v4430_v45 = vpop.f32.mrb[1].mxu1 }
 0x349   : > { %v4431_v58 = vadd.f32 %v4430_v45, %v4429_v35  ;;  %v4432_v36 = vpop.f32.mrb[2].mxu1 }
 0x34a   : > { %v4433_v10 = vpop.f32.mrb[3].mxu1 }
 0x34b   : > { %v4434_v44 = vadd.f32 %v4433_v10, %v4432_v36  ;;  %v3592_v37 = vadd.f32 %v4431_v58, %v4257_v17 }
 0x34d   : > { %v3595_v1 = vadd.f32 %v4434_v44, %v4257_v17 }
 0x34f   : > { %v4435_v12 = vpop.f32.mrb[4].mxu1 }
 0x350   : > { %v4436_v23 = vpop.f32.mrb[5].mxu1 }
 0x351   : > { %v4437_v26 = vadd.f32 %v4436_v23, %v4435_v12  ;;  %v4438_v13 = vpop.f32.mrb[6].mxu1 }
 0x352   : > { %v4439_v49 = vpop.f32.mrb[7].mxu1 }
 0x353   : > { %v4440_v16 = vadd.f32 %v4439_v49, %v4438_v13  ;;  %v3600_v48 = vadd.f32 %v4437_v26, %v4257_v17 }
 0x355   : > { %v3603_v15 = vadd.f32 %v4440_v16, %v4257_v17 }
 0x357   : > { %v4441_v56 = vpop.f32.mrb[8].mxu1 }
 0x358   : > { %v4442_v46 = vpop.f32.mrb[9].mxu1 }
 0x359   : > { %v4443_v11 = vadd.f32 %v4442_v46, %v4441_v56  ;;  %v4444_v20 = vpop.f32.mrb[10].mxu1 }
 0x35a   : > { %v4445_v21 = vpop.f32.mrb[11].mxu1 }
 0x35b   : > { %v4446_v39 = vadd.f32 %v4445_v21, %v4444_v20  ;;  %v3608_v18 = vadd.f32 %v4443_v11, %v4257_v17 }
 0x35d   : > { %v3611_v2 = vadd.f32 %v4446_v39, %v4257_v17 }
 0x35f   : > { %v4447_v24 = vpop.f32.mrb[12].mxu1 }
 0x360   : > { %v4448_v52 = vpop.f32.mrb[13].mxu1 }
 0x361   : > { %v4449_v6 = vadd.f32 %v4448_v52, %v4447_v24  ;;  %v4450_v28 = vpop.f32.mrb[14].mxu1 }
 0x362   : > { %v4451_v19 = vpop.f32.mrb[15].mxu1 }
 0x363   : > { %v4452_v5 = vadd.f32 %v4451_v19, %v4450_v28  ;;  %v3616_v58 = vadd.f32 %v4449_v6, %v4257_v17 }
 0x365   : > { %v3619_v12 = vadd.f32 %v4452_v5, %v4257_v17 }
 0x367   : > { %v4469_v30 = vpop.f32.mrb[16].mxu1 }
 0x368   : > { %v4470_v27 = vpop.f32.mrb[17].mxu1 }
 0x369   : > { %v4471_v55 = vadd.f32 %v4470_v27, %v4469_v30  ;;  %v4472_v40 = vpop.f32.mrb[18].mxu1 }
 0x36a   : > { %v4473_v43 = vpop.f32.mrb[19].mxu1 }
 0x36b   : > { %v3657_v0 = vadd.f32 %v4471_v55, %v3592_v37  ;;  %v4474_v47 = vadd.f32 %v4473_v43, %v4472_v40 }
 0x36d   : > { %v3660_v25 = vadd.f32 %v4474_v47, %v3595_v1 }
 0x36f   : > { %v4475_v32 = vpop.f32.mrb[20].mxu1 }
 0x370   : > { %v4476_v50 = vpop.f32.mrb[21].mxu1 }
 0x371   : > { %v4477_v63 = vadd.f32 %v4476_v50, %v4475_v32  ;;  %v4478_v51 = vpop.f32.mrb[22].mxu1 }
 0x372   : > { %v4479_v33 = vpop.f32.mrb[23].mxu1 }
 0x373   : > { %v3665_v57 = vadd.f32 %v4477_v63, %v3600_v48  ;;  %v4480_v60 = vadd.f32 %v4479_v33, %v4478_v51 }
 0x375   : > { %v3668_v59 = vadd.f32 %v4480_v60, %v3603_v15 }
 0x377   : > { %v4481_v61 = vpop.f32.mrb[24].mxu1 }
 0x378   : > { %v4482_v62 = vpop.f32.mrb[25].mxu1 }
 0x379   : > { %v4483_v9 = vadd.f32 %v4482_v62, %v4481_v61  ;;  %v4484_v34 = vpop.f32.mrb[26].mxu1 }
 0x37a   : > { %v4485_v7 = vpop.f32.mrb[27].mxu1 }
 0x37b   : > { %v3673_v4 = vadd.f32 %v4483_v9, %v3608_v18  ;;  %v4486_v41 = vadd.f32 %v4485_v7, %v4484_v34 }
 0x37d   : > { %v3676_v8 = vadd.f32 %v4486_v41, %v3611_v2 }
 0x37f   : > { %v4487_v35 = vpop.f32.mrb[28].mxu1 }
 0x380   : > { %v4488_v45 = vpop.f32.mrb[29].mxu1 }
 0x381   : > { %v4489_v36 = vadd.f32 %v4488_v45, %v4487_v35  ;;  %v4490_v10 = vpop.f32.mrb[30].mxu1 }
 0x382   : > { %v4491_v44 = vpop.f32.mrb[31].mxu1 }
 0x383   : > { %v3681_v23 = vadd.f32 %v4489_v36, %v3616_v58  ;;  %v4492_v26 = vadd.f32 %v4491_v44, %v4490_v10 }
 0x385   : > { %v3684_v13 = vadd.f32 %v4492_v26, %v3619_v12 }
 0x387   : > { %v4509_v49 = vpop.f32.mrb[32].mxu1 }
 0x388   : > { %v4510_v16 = vpop.f32.mrb[33].mxu1 }
 0x389   : > { %v4511_v56 = vadd.f32 %v4510_v16, %v4509_v49  ;;  %v4512_v46 = vpop.f32.mrb[34].mxu1 }
 0x38a   : > { %v4513_v11 = vpop.f32.mrb[35].mxu1 }
 0x38b   : > { %v3722_v20 = vadd.f32 %v4511_v56, %v3657_v0  ;;  %v4514_v21 = vadd.f32 %v4513_v11, %v4512_v46  ;;  %v1409_v46 = vsub.s32 1, %v5793_v31 }
 0x38d   : > { %v3725_v39 = vadd.f32 %v4514_v21, %v3660_v25 }
 0x38f   : > { %v4515_v24 = vpop.f32.mrb[36].mxu1 }
 0x390   : > { %v4516_v52 = vpop.f32.mrb[37].mxu1 }
 0x391   : > { %v4517_v28 = vadd.f32 %v4516_v52, %v4515_v24  ;;  %v4518_v19 = vpop.f32.mrb[38].mxu1  ;;  %v5044_v52 = vld [vmem:[%s6093_s2] sm:$0x3] }
 0x392   : > { %v4519_v6 = vpop.f32.mrb[39].mxu1 }
 0x393   : > { %v3730_v30 = vadd.f32 %v4517_v28, %v3665_v57  ;;  %v4520_v27 = vadd.f32 %v4519_v6, %v4518_v19  ;;  %v1410_v28 = vrot.slane %v5044_v52, %v1409_v46 }
 0x395   : > { %v3733_v37 = vadd.f32 %v4520_v27, %v3668_v59 }
 0x397   : > { %v4521_v5 = vpop.f32.mrb[40].mxu1 }
 0x398   : > { %v4522_v17 = vpop.f32.mrb[41].mxu1 }
 0x399   : > { %v4523_v55 = vadd.f32 %v4522_v17, %v4521_v5  ;;  %v4524_v40 = vpop.f32.mrb[42].mxu1  ;;  %v4610_v5 = vadd.f32 %v5802_v38, %v1410_v28 }
 0x39a   : > { %v4525_v43 = vpop.f32.mrb[43].mxu1 }
 0x39b   : > { %v3738_v1 = vadd.f32 %v4523_v55, %v3673_v4  ;;  %v4526_v47 = vadd.f32 %v4525_v43, %v4524_v40  ;;  %v4616_v55 = vadd.f32 %v5815_v53, %v1410_v28 }
 0x39d   : > { %v3741_v32 = vadd.f32 %v4526_v47, %v3676_v8  ;;  %v4612_v47 = vadd.f32 %v5805_v42, %v1410_v28  ;;  %v4622_v42 = vadd.f32 %v5857_v3, %v1410_v28  ;;  %v4620_v3 = vadd.f32 %v5838_v29, %v1410_v28 }
 0x39f   : > { %v4527_v50 = vpop.f32.mrb[44].mxu1 }
 0x3a0   : > { %v4528_v0 = vpop.f32.mrb[45].mxu1 }
 0x3a1   : > { %v4529_v48 = vadd.f32 %v4528_v0, %v4527_v50  ;;  %v4530_v25 = vpop.f32.mrb[46].mxu1 }
 0x3a2   : > { %v4531_v63 = vpop.f32.mrb[47].mxu1 }
 0x3a3   : > { %v3746_v51 = vadd.f32 %v4529_v48, %v3681_v23  ;;  %v4532_v33 = vadd.f32 %v4531_v63, %v4530_v25 }
 0x3a5   : > { %v3749_v15 = vadd.f32 %v4532_v33, %v3684_v13 }
 0x3a7   : > { %v4549_v60 = vpop.f32.mrb[48].mxu1 }
 0x3a8   : > { %v4550_v57 = vpop.f32.mrb[49].mxu1 }
 0x3a9   : > { %v4551_v61 = vadd.f32 %v4550_v57, %v4549_v60  ;;  %v4552_v59 = vpop.f32.mrb[50].mxu1 }
 0x3aa   : > { %v4553_v62 = vpop.f32.mrb[51].mxu1 }
 0x3ab   : > { %v4554_v18 = vadd.f32 %v4553_v62, %v4552_v59  ;;  %v3787_v9 = vadd.f32 %v4551_v61, %v3722_v20  ;;  %v4624_v61 = vadd.f32 %v5861_v14, %v1410_v28 }
 0x3ad   : > { %v3790_v34 = vadd.f32 %v4554_v18, %v3725_v39 }
 0x3af   : > { %v4555_v7 = vpop.f32.mrb[52].mxu1 }
 0x3b0   : > { %v4556_v2 = vpop.f32.mrb[53].mxu1 }
 0x3b1   : > { %v4557_v4 = vadd.f32 %v4556_v2, %v4555_v7  ;;  %v4558_v41 = vpop.f32.mrb[54].mxu1 }
 0x3b2   : > { %v4559_v8 = vpop.f32.mrb[55].mxu1 }
 0x3b3   : > { %v4560_v35 = vadd.f32 %v4559_v8, %v4558_v41  ;;  %v3795_v45 = vadd.f32 %v4557_v4, %v3730_v30  ;;  %v4614_v30 = vadd.f32 %v5808_v54, %v1410_v28 }
 0x3b5   : > { %v3798_v58 = vadd.f32 %v4560_v35, %v3733_v37 }
 0x3b7   : > { %v4561_v36 = vpop.f32.mrb[56].mxu1 }
 0x3b8   : > { %v4562_v10 = vpop.f32.mrb[57].mxu1 }
 0x3b9   : > { %v4563_v44 = vadd.f32 %v4562_v10, %v4561_v36  ;;  %v4564_v12 = vpop.f32.mrb[58].mxu1 }
 0x3ba   : > { %v4565_v23 = vpop.f32.mrb[59].mxu1 }
 0x3bb   : > { %v4566_v26 = vadd.f32 %v4565_v23, %v4564_v12  ;;  %v3803_v13 = vadd.f32 %v4563_v44, %v3738_v1 }
 0x3bd   : > { %v3806_v49 = vadd.f32 %v4566_v26, %v3741_v32 }
 0x3bf   : > { %v4567_v16 = vpop.f32.mrb[60].mxu1 }
 0x3c0   : > { %v4568_v56 = vpop.f32.mrb[61].mxu1 }
 0x3c1   : > { %v4569_v11 = vadd.f32 %v4568_v56, %v4567_v16  ;;  %v4570_v20 = vpop.f32.mrb[62].mxu1 }
 0x3c2   : > { %v4571_v21 = vpop.f32.mrb[63].mxu1 }
 0x3c3   : > { %v4572_v39 = vadd.f32 %v4571_v21, %v4570_v20  ;;  %v3811_v24 = vadd.f32 %v4569_v11, %v3746_v51 }
 0x3c5   : > { %v3814_v19 = vadd.f32 %v4572_v39, %v3749_v15  ;;  %v4618_v15 = vadd.f32 %v5835_v22, %v1410_v28 }
 0x3c7   : > { %v4603_v6 = vpop.f32.mrb[64].mxu1 }
 0x3c8   : > { %v3860_v27 = vadd.f32 %v4603_v6, %v3795_v45  ;;  %v3851_v37 = vpop.f32.mrb[65].mxu1 }
 0x3c9   : > { %v3852_v31 = vadd.f32 %v3851_v37, %v3787_v9  ;;  %v4604_v17 = vpop.f32.mrb[66].mxu1 }
 0x3ca   : > { %v3884_v40 = vadd.f32 %v4614_v30, %v3860_v27  ;;  %v3863_v43 = vadd.f32 %v4604_v17, %v3798_v58  ;;  %v3854_v1 = vpop.f32.mrb[67].mxu1 }
 0x3cb   : > { %v3882_v32 = vadd.f32 %v4610_v5, %v3852_v31  ;;  %v3855_v50 = vadd.f32 %v3854_v1, %v3790_v34 }
 0x3cc   : > { %v3892_v0 = vmax.f32 %v3884_v40, 0.0  ;;  %v3885_v48 = vadd.f32 %v4616_v55, %v3863_v43 }
 0x3cd   : > { %v3890_v25 = vmax.f32 %v3882_v32, 0.0  ;;  %v3883_v54 = vadd.f32 %v4612_v47, %v3855_v50 }
 0x3ce   : > { %3900 = vst [vmem:[%s6026_s9 + $0x10] sm:$0xff] %v3892_v0  ;;  %v3893_v38 = vmax.f32 %v3885_v48, 0.0 }
 0x3cf   : > { %3898 = vst [vmem:[%s6026_s9] sm:$0xff] %v3890_v25  ;;  %v3891_v53 = vmax.f32 %v3883_v54, 0.0  ;;  %v4607_v63 = vpop.f32.mrb[68].mxu1 }
 0x3d0   : > { %3901 = vst [vmem:[%s6026_s9 + $0x18] sm:$0xff] %v3893_v38  ;;  %v3876_v51 = vadd.f32 %v4607_v63, %v3811_v24  ;;  %v3867_v33 = vpop.f32.mrb[69].mxu1 }
 0x3d1   : > { %3899 = vst [vmem:[%s6026_s9 + $0x8] sm:$0xff] %v3891_v53  ;;  %v3868_v60 = vadd.f32 %v3867_v33, %v3803_v13  ;;  %v4608_v57 = vpop.f32.mrb[70].mxu1 }
 0x3d2   : > { %v3888_v59 = vadd.f32 %v4622_v42, %v3876_v51  ;;  %v3879_v62 = vadd.f32 %v4608_v57, %v3814_v19  ;;  %v3870_v18 = vpop.f32.mrb[71].mxu1 }
 0x3d3   : > { %v3886_v9 = vadd.f32 %v4618_v15, %v3868_v60  ;;  %v3871_v34 = vadd.f32 %v3870_v18, %v3806_v49 }
 0x3d4   : > { %v3896_v22 = vmax.f32 %v3888_v59, 0.0  ;;  %v3889_v7 = vadd.f32 %v4624_v61, %v3879_v62 }
 0x3d5   : > { %v3894_v14 = vmax.f32 %v3886_v9, 0.0  ;;  %v3887_v2 = vadd.f32 %v4620_v3, %v3871_v34 }
 0x3d6   : > { %3904 = vst [vmem:[%s6026_s9 + $0x30] sm:$0xff] %v3896_v22  ;;  %v3897_v4 = vmax.f32 %v3889_v7, 0.0 }
 0x3d7   : > { %3902 = vst [vmem:[%s6026_s9 + $0x20] sm:$0xff] %v3894_v14  ;;  %v3895_v29 = vmax.f32 %v3887_v2, 0.0 }
 0x3d8   : > { %3905 = vst [vmem:[%s6026_s9 + $0x38] sm:$0xff] %v3897_v4 }
 0x3d9   : > { %3903 = vst [vmem:[%s6026_s9 + $0x28] sm:$0xff] %v3895_v29 }
 0x3da   : > { %5144 = shalt.err (!%p5141_p2)
}
 0x3db   : > { %s5145_s28 = scalar_lea.hbm %s6044_s7, 1024  ;;  %s5149_s29 = scalar_lea.hbm %s6096_s5, 2048 }
 0x3dc   : > { %p5146_p13 = scmp.ne.s32.totalorder %s6044_s7, %s5145_s28  ;;  %p5150_p4 = scmp.lt.u32.totalorder %s6044_s7, %s6096_s5 }
 0x3dd   : > { %p5151_p7 = scmp.lt.u32.totalorder %s5149_s29, %s5145_s28  ;;  %p5153_p11 = scmp.lt.u32.totalorder %s5145_s28, %s6044_s7 }
 0x3de   : > { %p5147_p6 = pnand %p5146_p13, %p6120_p0 }
 0x3df   : > { %p5152_p8 = por %p5151_p7, %p5150_p4 }
 0x3e0   : > { %p5148_p10 = pneg %p5147_p6 }
 0x3e1   : > { %p5154_p1 = por %p5153_p11, %p5152_p8 }
 0x3e3   : > { %p5155_p3 = pnand %p5154_p1, %p5148_p10 }
 0x3e5   : > { %5158 = shalt.err (!%p5155_p3)
}
 0x3e6   : > { %s5215_s14 = smov 128   ;;  %s5216_s15 = smov 8  }
 0x3e7   : > { %4667 = dma.vmem_to_hbm [thread:$0]  (%p6120_p0), %s6038_s11, 1024, %s6044_s7, %s3907_s22, %s5215_s14, %s5215_s14, %s5216_s15  }
 0x3e8 PF: > { %s3935_s23 = sand.u32 1, %s5189_s18   ;;  %p6121_p5 = scmp.ne.s32.totalorder %s6101_s25, 0 }
 0x3e9   : > { %p6122_p9 = scmp.ge.s32.totalorder %s5201_s21, 2  ;;  %s3936_s6 = scalar_lea.sflag [#allocation6], %s3935_s23 }
 0x3eb   : > { %p4681_p12 = pnand %p6122_p9, %p6121_p5 }
 0x3ed   : > { %5184 = dma.done.wait (!%p4681_p12), %s3936_s6, 1024  }
 0x3ee   : > { %5186 = vsyncadd (!%p4681_p12), %s3936_s6, 4294966272  ;;  %p19_p2 = scmp.ge.s32.totalorder %s5357_s16, 4   ;;  %s6123_s18 = smov %s5193_s19 }
 0x3ef   : > { %s6124_s19 = smov %s5197_s20  ;;  %s6125_s20 = smov %s5366_s27 }
 0x3f0   : > { %s6126_s21 = smov %s5357_s16  ;;  %21 = sbr.rel (!%p19_p2) target bundleno = 6 (0x6), region = 99 }
 0x3f7   :  { %3941 = vsyncpa [#allocation5], 1 }
 0x3f8   :  { %3943 = vsyncpa [#allocation5 + $0x1], 1 }
 0x3f9   :  { %3944 = vsyncpa [#allocation8], 1 }
 0x3fa   :  { %3945 = vsyncpa [#allocation6], 1 }
 0x3fb   :  { %3947 = vsyncpa [#allocation6 + $0x1], 1 }

</bundles_post_ra>
